<compile_context>
chip_gen: v7x
topology: tpu7x:2x2x1
jax: 0.10.0
libtpu: 0.0.40
codegen_flags: <defaults>
</compile_context>

<pallas_src>
import jax
import jax.numpy as jnp
from jax.experimental import pallas as pl
from jax.experimental.pallas import tpu as pltpu

# ----------------------------------------------------------------------------
# Padded layout constants (lane = last dim, multiples of 128; sublane mult. 8).
# ----------------------------------------------------------------------------
H_IN_RAW, H_HID_RAW = 900, 500
O_RAW = 200
N_SUB, N_AFF = 10, 12

H_IN = 1024          # 900 -> 1024
H_HID = 512          # 500 -> 512
O_DIM = 256          # 200 -> 256 (input and hidden)
CLS_HID = 512
NCLS = 128           # 10 / 12 logits padded to one 128-lane vreg
NEG = -1e30          # padded-logit bias so softmax mass of padding is exactly 0

# Packed-bias static offsets (all multiples of 128).
_B_HB1, _B_HB2, _B_HB3 = 0, 512, 1024
_B_OB1, _B_OB2, _B_OB3 = 1536, 1792, 2048
_B_CB1 = 2304                       # fused head stage-1 bias: cHb1(512)||cOb1(512)
_B_CHB2, _B_COB2 = 3328, 3456       # padded head-2 biases (lanes >=10/12 carry NEG)
BIAS_LEN = 3584


def _softmax_lastdim(x):
    m = jnp.max(x, axis=-1, keepdims=True)
    e = jnp.exp(x - m)
    return e / jnp.sum(e, axis=-1, keepdims=True)


# ----------------------------------------------------------------------------
# Kernel: one batch tile of TM rows; weights are VMEM-resident constant blocks.
# ----------------------------------------------------------------------------
def triple_gcn_spatial_kernel(
    h_in_ref, o_in_ref,
    hW1, hW2, hW3,                 # H_spatial MLP weights (bf16, padded)
    oW1, oW2, oW3,                 # O_spatial MLP weights
    clsW1_h, clsW1_o,              # fused head stage-1: (512,1024) h-block, (256,1024) o-block
    cHW2, cOW2,                    # head stage-2: (512,128) each
    bias_ref,                      # packed f32 biases [1, 3584]
    subact_ref, afford_ref,
):
    def b(off, n):
        return bias_ref[:, off:off + n]          # static, 128-aligned slice

    def mm(x, w_ref):
        # bf16 x bf16 MXU contraction with f32 accumulation. (astype is a
        # no-op for the already-bf16 first-layer inputs.)
        return jnp.dot(x.astype(jnp.bfloat16), w_ref[...],
                       preferred_element_type=jnp.float32)

    # H_spatial: Linear(900,500) -> Linear(500,500) -> Linear(500,500)
    # (dropouts are identity at inference; zero-padded weights keep padded
    #  lanes exactly zero through the whole chain)
    h = h_in_ref[...]
    h = mm(h, hW1) + b(_B_HB1, H_HID)
    h = mm(h, hW2) + b(_B_HB2, H_HID)
    h = mm(h, hW3) + b(_B_HB3, H_HID)

    # O_spatial: Linear(200,200) x3
    o = o_in_ref[...]
    o = mm(o, oW1) + b(_B_OB1, O_DIM)
    o = mm(o, oW2) + b(_B_OB2, O_DIM)
    o = mm(o, oW3) + b(_B_OB3, O_DIM)

    # Classifier heads, concat-free AND fused across the two heads:
    #   Linear(700,512)(cat(h,o)) for both heads ==
    #   h @ [W_sub_h || W_aff_h] + o @ [W_sub_o || W_aff_o] + [b_sub || b_aff]
    # -> lanes 0:512 are the subact hidden state, 512:1024 the afford one.
    hid = mm(h, clsW1_h) + mm(o, clsW1_o) + b(_B_CB1, 2 * CLS_HID)
    s = mm(hid[:, :CLS_HID], cHW2) + b(_B_CHB2, NCLS)   # padded lanes carry -1e30 bias
    a = mm(hid[:, CLS_HID:], cOW2) + b(_B_COB2, NCLS)

    # nn.Softmax() over dim=1 (padded lanes contribute exactly 0 mass; logits
    # are accumulated and softmaxed in f32, so the -1e30 sentinel is safe).
    subact_ref[...] = _softmax_lastdim(s)
    afford_ref[...] = _softmax_lastdim(a)


# ----------------------------------------------------------------------------
# Parameter init (matches weights_init: W ~ N(0, 0.01), b = 0) and kernel prep.
# ----------------------------------------------------------------------------
def init_params(key):
    def linear_params(k, fan_in, fan_out):
        w = 0.01 * jax.random.normal(k, (fan_in, fan_out), jnp.float32)
        b = jnp.zeros((1, fan_out), jnp.float32)
        return [w, b]

    keys = jax.random.split(key, 10)
    params = []
    for (fi, fo), k in zip([(900, 500), (500, 500), (500, 500)], keys[0:3]):
        params += linear_params(k, fi, fo)                       # H_spatial
    for (fi, fo), k in zip([(200, 200), (200, 200), (200, 200)], keys[3:6]):
        params += linear_params(k, fi, fo)                       # O_spatial
    for (fi, fo), k in zip([(700, 512), (512, 10)], keys[6:8]):
        params += linear_params(k, fi, fo)                       # H_subact_cls
    for (fi, fo), k in zip([(700, 512), (512, 12)], keys[8:10]):
        params += linear_params(k, fi, fo)                       # O_afford_cls
    return params


def prepare_params(params):
    """Pad / split / fuse / pack / cast weights into the kernel's TPU layout."""
    (hW1, hb1, hW2, hb2, hW3, hb3,
     oW1, ob1, oW2, ob2, oW3, ob3,
     cHW1, cHb1, cHW2, cHb2,
     cOW1, cOb1, cOW2, cOb2) = params

    def pad_w(w, rows, cols):
        out = jnp.zeros((rows, cols), jnp.float32)
        out = out.at[:w.shape[0], :w.shape[1]].set(w)
        return out.astype(jnp.bfloat16)

    def pad_b(bvec, n, fill=0.0):
        v = jnp.asarray(bvec, jnp.float32).reshape(-1)
        out = jnp.full((n,), fill, jnp.float32)
        return out.at[:v.shape[0]].set(v)

    # Fuse the two heads' stage-1 (700->512) weights along the output lane axis.
    clsW1_h = jnp.concatenate(                           # (512, 1024)
        [pad_w(cHW1[:H_HID_RAW], H_HID, CLS_HID),
         pad_w(cOW1[:H_HID_RAW], H_HID, CLS_HID)], axis=1)
    clsW1_o = jnp.concatenate(                           # (256, 1024)
        [pad_w(cHW1[H_HID_RAW:], O_DIM, CLS_HID),
         pad_w(cOW1[H_HID_RAW:], O_DIM, CLS_HID)], axis=1)

    weights = [
        pad_w(hW1, H_IN, H_HID),                 # (1024, 512)
        pad_w(hW2, H_HID, H_HID),                # (512, 512)
        pad_w(hW3, H_HID, H_HID),                # (512, 512)
        pad_w(oW1, O_DIM, O_DIM),                # (256, 256)
        pad_w(oW2, O_DIM, O_DIM),
        pad_w(oW3, O_DIM, O_DIM),
        clsW1_h,
        clsW1_o,
        pad_w(cHW2, CLS_HID, NCLS),              # (512, 128), cols 10..127 zero
        pad_w(cOW2, CLS_HID, NCLS),              # (512, 128), cols 12..127 zero
    ]
    packed_bias = jnp.concatenate([
        pad_b(hb1, H_HID), pad_b(hb2, H_HID), pad_b(hb3, H_HID),
        pad_b(ob1, O_DIM), pad_b(ob2, O_DIM), pad_b(ob3, O_DIM),
        pad_b(cHb1, CLS_HID), pad_b(cOb1, CLS_HID),          # fused stage-1 bias
        pad_b(cHb2, NCLS, fill=NEG),
        pad_b(cOb2, NCLS, fill=NEG),
    ]).reshape(1, BIAS_LEN)
    return weights + [packed_bias]


# ----------------------------------------------------------------------------
# Forward wrapper.
# ----------------------------------------------------------------------------
def _default_tile_rows():
    """Generation-tuned batch tile: 128 on v5e (4x128 MXU), 256 on v6e/v7x."""
    try:
        kind = jax.devices()[0].device_kind.lower()
        if "v5 lite" in kind or "v5e" in kind or "v5litepod" in kind:
            return 128
    except Exception:
        pass
    return 256


def _const_spec(shape):
    """Constant (never re-fetched) weight/bias block: single pipeline buffer."""
    const = lambda i: (0, 0)
    if hasattr(pl, "Buffered"):
        try:
            return pl.BlockSpec(shape, const, pipeline_mode=pl.Buffered(1))
        except TypeError:
            pass
    return pl.BlockSpec(shape, const)


def triple_gcn_forward(inputs, prepared, mode='spatial', tile_rows=None):
    # inputs = (human_video_segment, object_video_segment, H_spatial_raw, O_spatial_raw)
    assert mode == 'spatial', "only 'spatial' mode is implemented (no InceptionI3d)"

    H_raw = jnp.asarray(inputs[2], jnp.float32).reshape(-1, H_IN_RAW)  # [B, 900] (B=1 in module)
    O_raw = jnp.asarray(inputs[3], jnp.float32).reshape(-1, O_RAW)     # [B, 200]
    B = H_raw.shape[0]

    # Tile: gen-tuned upper bound, capped so B=1 stays one tiny (8-row) step.
    tm_max = tile_rows if tile_rows is not None else _default_tile_rows()
    b_pad8 = ((B + 7) // 8) * 8
    TM = min(tm_max, b_pad8)
    B_pad = ((B + TM - 1) // TM) * TM

    # Pad straight into bf16 buffers (halves the activation DMA bytes).
    h_in = jnp.zeros((B_pad, H_IN), jnp.bfloat16).at[:B, :H_IN_RAW].set(
        H_raw.astype(jnp.bfloat16))
    o_in = jnp.zeros((B_pad, O_DIM), jnp.bfloat16).at[:B, :O_RAW].set(
        O_raw.astype(jnp.bfloat16))

    grid = (B_pad // TM,)
    row = lambda i: (i, 0)          # activations / outputs: tiled over batch

    in_specs = [
        pl.BlockSpec((TM, H_IN), row),
        pl.BlockSpec((TM, O_DIM), row),
        _const_spec((H_IN, H_HID)),
        _const_spec((H_HID, H_HID)),
        _const_spec((H_HID, H_HID)),
        _const_spec((O_DIM, O_DIM)),
        _const_spec((O_DIM, O_DIM)),
        _const_spec((O_DIM, O_DIM)),
        _const_spec((H_HID, 2 * CLS_HID)),
        _const_spec((O_DIM, 2 * CLS_HID)),
        _const_spec((CLS_HID, NCLS)),
        _const_spec((CLS_HID, NCLS)),
        _const_spec((1, BIAS_LEN)),
    ]
    out_specs = (
        pl.BlockSpec((TM, NCLS), row),
        pl.BlockSpec((TM, NCLS), row),
    )

    # Advisory cost estimate so XLA schedules the pad/slice ops around us.
    weight_elems = (H_IN * H_HID + 2 * H_HID * H_HID + 3 * O_DIM * O_DIM
                    + H_HID * 2 * CLS_HID + O_DIM * 2 * CLS_HID
                    + 2 * CLS_HID * NCLS)
    cost = pl.CostEstimate(
        flops=2 * B_pad * weight_elems,
        transcendentals=2 * B_pad * NCLS,
        bytes_accessed=(2 * weight_elems + 4 * BIAS_LEN
                        + 2 * B_pad * (H_IN + O_DIM)
                        + 4 * B_pad * 2 * NCLS),
    )

    subact_p, afford_p = pl.pallas_call(
        triple_gcn_spatial_kernel,
        out_shape=(
            jax.ShapeDtypeStruct((B_pad, NCLS), jnp.float32),
            jax.ShapeDtypeStruct((B_pad, NCLS), jnp.float32),
        ),
        grid=grid,
        in_specs=in_specs,
        out_specs=out_specs,
        compiler_params=pltpu.CompilerParams(
            # Shards batch tiles across v7x's 2 TCs when grid >= 2; a no-op
            # (but harmless) at B=1 where there is a single grid step.
            dimension_semantics=("parallel",),
        ),
        cost_estimate=cost,
    )(h_in, o_in, *prepared)

    return subact_p[:B, :N_SUB], afford_p[:B, :N_AFF]


if __name__ == "__main__":
    key = jax.random.PRNGKey(0)
    kp, kv1, kv2, kh, ko, kbh, kbo = jax.random.split(key, 7)

    params = init_params(kp)
    prepared = prepare_params(params)

    # Video segments are only consumed by the (unavailable) I3D path; kept for
    # signature parity but unused in 'spatial' mode.
    human_video_segment = jax.random.normal(kv1, (1, 3, 8, 16, 16), jnp.float32)
    object_video_segment = jax.random.normal(kv2, (1, 3, 8, 16, 16), jnp.float32)
    H_spatial_raw = jax.random.normal(kh, (900,), jnp.float32)
    O_spatial_raw = jax.random.normal(ko, (200,), jnp.float32)

    inputs = (human_video_segment, object_video_segment, H_spatial_raw, O_spatial_raw)

    # --- B=1, exactly the module's forward() usage -------------------------
    subact_cls_scores, afford_cls_scores = triple_gcn_forward(inputs, prepared, mode='spatial')
    jax.block_until_ready((subact_cls_scores, afford_cls_scores))

    assert subact_cls_scores.shape == (1, N_SUB)
    assert afford_cls_scores.shape == (1, N_AFF)
    # softmax rows must sum to 1 (padded logit lanes carry exactly zero mass)
    assert abs(float(jnp.sum(subact_cls_scores)) - 1.0) < 1e-3
    assert abs(float(jnp.sum(afford_cls_scores)) - 1.0) < 1e-3

    # --- small batched call (exercises the tiled / multi-row path) ---------
    Bb = 16
    H_batch = jax.random.normal(kbh, (Bb, 900), jnp.float32)
    O_batch = jax.random.normal(kbo, (Bb, 200), jnp.float32)
    sub_b, aff_b = triple_gcn_forward(
        (human_video_segment, object_video_segment, H_batch, O_batch),
        prepared, mode='spatial')
    jax.block_until_ready((sub_b, aff_b))
    assert sub_b.shape == (Bb, N_SUB) and aff_b.shape == (Bb, N_AFF)
    assert float(jnp.max(jnp.abs(jnp.sum(sub_b, axis=-1) - 1.0))) < 1e-3
    assert float(jnp.max(jnp.abs(jnp.sum(aff_b, axis=-1) - 1.0))) < 1e-3

    print("KERNEL_OK")
</pallas_src>

<mosaic_0001>
module attributes {stable_mosaic.version = 11 : i64} {
  func.func @triple_gcn_spatial_kernel(%arg0: i32, %arg1: memref<8x1024xbf16, #tpu.memory_space<vmem>>, %arg2: memref<8x256xbf16, #tpu.memory_space<vmem>>, %arg3: memref<1024x512xbf16, #tpu.memory_space<vmem>>, %arg4: memref<512x512xbf16, #tpu.memory_space<vmem>>, %arg5: memref<512x512xbf16, #tpu.memory_space<vmem>>, %arg6: memref<256x256xbf16, #tpu.memory_space<vmem>>, %arg7: memref<256x256xbf16, #tpu.memory_space<vmem>>, %arg8: memref<256x256xbf16, #tpu.memory_space<vmem>>, %arg9: memref<512x1024xbf16, #tpu.memory_space<vmem>>, %arg10: memref<256x1024xbf16, #tpu.memory_space<vmem>>, %arg11: memref<512x128xbf16, #tpu.memory_space<vmem>>, %arg12: memref<512x128xbf16, #tpu.memory_space<vmem>>, %arg13: memref<1x3584xf32, #tpu.memory_space<vmem>>, %arg14: memref<8x128xf32, #tpu.memory_space<vmem>>, %arg15: memref<8x128xf32, #tpu.memory_space<vmem>>) attributes {dimension_semantics = [#tpu.dimension_semantics<parallel>], iteration_bounds = array<i64: 1>, scalar_prefetch = 0 : i64, scratch_operands = 0 : i64, tpu.core_type = #tpu.core_type<tc>, window_params = [{transform_indices = @transform_0, window_bounds = array<i64: 8, 1024>}, {transform_indices = @transform_1, window_bounds = array<i64: 8, 256>}, {pipeline_mode = #tpu.pipeline_mode<synchronous>, transform_indices = @transform_2, window_bounds = array<i64: 1024, 512>}, {pipeline_mode = #tpu.pipeline_mode<synchronous>, transform_indices = @transform_3, window_bounds = array<i64: 512, 512>}, {pipeline_mode = #tpu.pipeline_mode<synchronous>, transform_indices = @transform_4, window_bounds = array<i64: 512, 512>}, {pipeline_mode = #tpu.pipeline_mode<synchronous>, transform_indices = @transform_5, window_bounds = array<i64: 256, 256>}, {pipeline_mode = #tpu.pipeline_mode<synchronous>, transform_indices = @transform_6, window_bounds = array<i64: 256, 256>}, {pipeline_mode = #tpu.pipeline_mode<synchronous>, transform_indices = @transform_7, window_bounds = array<i64: 256, 256>}, {pipeline_mode = #tpu.pipeline_mode<synchronous>, transform_indices = @transform_8, window_bounds = array<i64: 512, 1024>}, {pipeline_mode = #tpu.pipeline_mode<synchronous>, transform_indices = @transform_9, window_bounds = array<i64: 256, 1024>}, {pipeline_mode = #tpu.pipeline_mode<synchronous>, transform_indices = @transform_10, window_bounds = array<i64: 512, 128>}, {pipeline_mode = #tpu.pipeline_mode<synchronous>, transform_indices = @transform_11, window_bounds = array<i64: 512, 128>}, {pipeline_mode = #tpu.pipeline_mode<synchronous>, transform_indices = @transform_12, window_bounds = array<i64: 1, 3584>}, {transform_indices = @transform_13, window_bounds = array<i64: 8, 128>}, {transform_indices = @transform_14, window_bounds = array<i64: 8, 128>}]} {
    %c0 = arith.constant 0 : index
    %c0_0 = arith.constant 0 : index
    %0 = vector.load %arg1[%c0, %c0_0] : memref<8x1024xbf16, #tpu.memory_space<vmem>>, vector<8x1024xbf16>
    %c0_1 = arith.constant 0 : index
    %c0_2 = arith.constant 0 : index
    %1 = vector.load %arg3[%c0_1, %c0_2] : memref<1024x512xbf16, #tpu.memory_space<vmem>>, vector<1024x512xbf16>
    %cst = arith.constant dense<0.000000e+00> : vector<8x512xf32>
    %2 = tpu.matmul %0, %1, %cst {dimension_numbers = #tpu.dot_dimension_numbers<[1], [0], [0], [1], [0, 0, 1, 1], [], []>} : vector<8x1024xbf16>, vector<1024x512xbf16>, vector<8x512xf32> -> vector<8x512xf32>
    %c0_3 = arith.constant 0 : index
    %c0_4 = arith.constant 0 : index
    %3 = vector.load %arg13[%c0_3, %c0_4] : memref<1x3584xf32, #tpu.memory_space<vmem>>, vector<1x512xf32>
    %4 = vector.broadcast %3 : vector<1x512xf32> to vector<8x512xf32>
    %5 = arith.addf %2, %4 : vector<8x512xf32>
    %6 = arith.truncf %5 : vector<8x512xf32> to vector<8x512xbf16>
    %c0_5 = arith.constant 0 : index
    %c0_6 = arith.constant 0 : index
    %7 = vector.load %arg4[%c0_5, %c0_6] : memref<512x512xbf16, #tpu.memory_space<vmem>>, vector<512x512xbf16>
    %cst_7 = arith.constant dense<0.000000e+00> : vector<8x512xf32>
    %8 = tpu.matmul %6, %7, %cst_7 {dimension_numbers = #tpu.dot_dimension_numbers<[1], [0], [0], [1], [0, 0, 1, 1], [], []>} : vector<8x512xbf16>, vector<512x512xbf16>, vector<8x512xf32> -> vector<8x512xf32>
    %c0_8 = arith.constant 0 : index
    %c512 = arith.constant 512 : index
    %9 = vector.load %arg13[%c0_8, %c512] : memref<1x3584xf32, #tpu.memory_space<vmem>>, vector<1x512xf32>
    %10 = vector.broadcast %9 : vector<1x512xf32> to vector<8x512xf32>
    %11 = arith.addf %8, %10 : vector<8x512xf32>
    %12 = arith.truncf %11 : vector<8x512xf32> to vector<8x512xbf16>
    %c0_9 = arith.constant 0 : index
    %c0_10 = arith.constant 0 : index
    %13 = vector.load %arg5[%c0_9, %c0_10] : memref<512x512xbf16, #tpu.memory_space<vmem>>, vector<512x512xbf16>
    %cst_11 = arith.constant dense<0.000000e+00> : vector<8x512xf32>
    %14 = tpu.matmul %12, %13, %cst_11 {dimension_numbers = #tpu.dot_dimension_numbers<[1], [0], [0], [1], [0, 0, 1, 1], [], []>} : vector<8x512xbf16>, vector<512x512xbf16>, vector<8x512xf32> -> vector<8x512xf32>
    %c0_12 = arith.constant 0 : index
    %c1024 = arith.constant 1024 : index
    %15 = vector.load %arg13[%c0_12, %c1024] : memref<1x3584xf32, #tpu.memory_space<vmem>>, vector<1x512xf32>
    %16 = vector.broadcast %15 : vector<1x512xf32> to vector<8x512xf32>
    %17 = arith.addf %14, %16 : vector<8x512xf32>
    %c0_13 = arith.constant 0 : index
    %c0_14 = arith.constant 0 : index
    %18 = vector.load %arg2[%c0_13, %c0_14] : memref<8x256xbf16, #tpu.memory_space<vmem>>, vector<8x256xbf16>
    %c0_15 = arith.constant 0 : index
    %c0_16 = arith.constant 0 : index
    %19 = vector.load %arg6[%c0_15, %c0_16] : memref<256x256xbf16, #tpu.memory_space<vmem>>, vector<256x256xbf16>
    %cst_17 = arith.constant dense<0.000000e+00> : vector<8x256xf32>
    %20 = tpu.matmul %18, %19, %cst_17 {dimension_numbers = #tpu.dot_dimension_numbers<[1], [0], [0], [1], [0, 0, 1, 1], [], []>} : vector<8x256xbf16>, vector<256x256xbf16>, vector<8x256xf32> -> vector<8x256xf32>
    %c0_18 = arith.constant 0 : index
    %c1536 = arith.constant 1536 : index
    %21 = vector.load %arg13[%c0_18, %c1536] : memref<1x3584xf32, #tpu.memory_space<vmem>>, vector<1x256xf32>
    %22 = vector.broadcast %21 : vector<1x256xf32> to vector<8x256xf32>
    %23 = arith.addf %20, %22 : vector<8x256xf32>
    %24 = arith.truncf %23 : vector<8x256xf32> to vector<8x256xbf16>
    %c0_19 = arith.constant 0 : index
    %c0_20 = arith.constant 0 : index
    %25 = vector.load %arg7[%c0_19, %c0_20] : memref<256x256xbf16, #tpu.memory_space<vmem>>, vector<256x256xbf16>
    %cst_21 = arith.constant dense<0.000000e+00> : vector<8x256xf32>
    %26 = tpu.matmul %24, %25, %cst_21 {dimension_numbers = #tpu.dot_dimension_numbers<[1], [0], [0], [1], [0, 0, 1, 1], [], []>} : vector<8x256xbf16>, vector<256x256xbf16>, vector<8x256xf32> -> vector<8x256xf32>
    %c0_22 = arith.constant 0 : index
    %c1792 = arith.constant 1792 : index
    %27 = vector.load %arg13[%c0_22, %c1792] : memref<1x3584xf32, #tpu.memory_space<vmem>>, vector<1x256xf32>
    %28 = vector.broadcast %27 : vector<1x256xf32> to vector<8x256xf32>
    %29 = arith.addf %26, %28 : vector<8x256xf32>
    %30 = arith.truncf %29 : vector<8x256xf32> to vector<8x256xbf16>
    %c0_23 = arith.constant 0 : index
    %c0_24 = arith.constant 0 : index
    %31 = vector.load %arg8[%c0_23, %c0_24] : memref<256x256xbf16, #tpu.memory_space<vmem>>, vector<256x256xbf16>
    %cst_25 = arith.constant dense<0.000000e+00> : vector<8x256xf32>
    %32 = tpu.matmul %30, %31, %cst_25 {dimension_numbers = #tpu.dot_dimension_numbers<[1], [0], [0], [1], [0, 0, 1, 1], [], []>} : vector<8x256xbf16>, vector<256x256xbf16>, vector<8x256xf32> -> vector<8x256xf32>
    %c0_26 = arith.constant 0 : index
    %c2048 = arith.constant 2048 : index
    %33 = vector.load %arg13[%c0_26, %c2048] : memref<1x3584xf32, #tpu.memory_space<vmem>>, vector<1x256xf32>
    %34 = vector.broadcast %33 : vector<1x256xf32> to vector<8x256xf32>
    %35 = arith.addf %32, %34 : vector<8x256xf32>
    %36 = arith.truncf %17 : vector<8x512xf32> to vector<8x512xbf16>
    %c0_27 = arith.constant 0 : index
    %c0_28 = arith.constant 0 : index
    %37 = vector.load %arg9[%c0_27, %c0_28] : memref<512x1024xbf16, #tpu.memory_space<vmem>>, vector<512x1024xbf16>
    %cst_29 = arith.constant dense<0.000000e+00> : vector<8x1024xf32>
    %38 = tpu.matmul %36, %37, %cst_29 {dimension_numbers = #tpu.dot_dimension_numbers<[1], [0], [0], [1], [0, 0, 1, 1], [], []>} : vector<8x512xbf16>, vector<512x1024xbf16>, vector<8x1024xf32> -> vector<8x1024xf32>
    %39 = arith.truncf %35 : vector<8x256xf32> to vector<8x256xbf16>
    %c0_30 = arith.constant 0 : index
    %c0_31 = arith.constant 0 : index
    %40 = vector.load %arg10[%c0_30, %c0_31] : memref<256x1024xbf16, #tpu.memory_space<vmem>>, vector<256x1024xbf16>
    %cst_32 = arith.constant dense<0.000000e+00> : vector<8x1024xf32>
    %41 = tpu.matmul %39, %40, %cst_32 {dimension_numbers = #tpu.dot_dimension_numbers<[1], [0], [0], [1], [0, 0, 1, 1], [], []>} : vector<8x256xbf16>, vector<256x1024xbf16>, vector<8x1024xf32> -> vector<8x1024xf32>
    %42 = arith.addf %38, %41 : vector<8x1024xf32>
    %c0_33 = arith.constant 0 : index
    %c2304 = arith.constant 2304 : index
    %43 = vector.load %arg13[%c0_33, %c2304] : memref<1x3584xf32, #tpu.memory_space<vmem>>, vector<1x1024xf32>
    %44 = vector.broadcast %43 : vector<1x1024xf32> to vector<8x1024xf32>
    %45 = arith.addf %42, %44 : vector<8x1024xf32>
    %46 = vector.extract_strided_slice %45 {offsets = [0, 0], sizes = [8, 512], strides = [1, 1]} : vector<8x1024xf32> to vector<8x512xf32>
    %47 = arith.truncf %46 : vector<8x512xf32> to vector<8x512xbf16>
    %c0_34 = arith.constant 0 : index
    %c0_35 = arith.constant 0 : index
    %48 = vector.load %arg11[%c0_34, %c0_35] : memref<512x128xbf16, #tpu.memory_space<vmem>>, vector<512x128xbf16>
    %cst_36 = arith.constant dense<0.000000e+00> : vector<8x128xf32>
    %49 = tpu.matmul %47, %48, %cst_36 {dimension_numbers = #tpu.dot_dimension_numbers<[1], [0], [0], [1], [0, 0, 1, 1], [], []>} : vector<8x512xbf16>, vector<512x128xbf16>, vector<8x128xf32> -> vector<8x128xf32>
    %c0_37 = arith.constant 0 : index
    %c3328 = arith.constant 3328 : index
    %50 = vector.load %arg13[%c0_37, %c3328] : memref<1x3584xf32, #tpu.memory_space<vmem>>, vector<1x128xf32>
    %51 = vector.broadcast %50 : vector<1x128xf32> to vector<8x128xf32>
    %52 = arith.addf %49, %51 : vector<8x128xf32>
    %53 = vector.extract_strided_slice %45 {offsets = [0, 512], sizes = [8, 512], strides = [1, 1]} : vector<8x1024xf32> to vector<8x512xf32>
    %54 = arith.truncf %53 : vector<8x512xf32> to vector<8x512xbf16>
    %c0_38 = arith.constant 0 : index
    %c0_39 = arith.constant 0 : index
    %55 = vector.load %arg12[%c0_38, %c0_39] : memref<512x128xbf16, #tpu.memory_space<vmem>>, vector<512x128xbf16>
    %cst_40 = arith.constant dense<0.000000e+00> : vector<8x128xf32>
    %56 = tpu.matmul %54, %55, %cst_40 {dimension_numbers = #tpu.dot_dimension_numbers<[1], [0], [0], [1], [0, 0, 1, 1], [], []>} : vector<8x512xbf16>, vector<512x128xbf16>, vector<8x128xf32> -> vector<8x128xf32>
    %c0_41 = arith.constant 0 : index
    %c3456 = arith.constant 3456 : index
    %57 = vector.load %arg13[%c0_41, %c3456] : memref<1x3584xf32, #tpu.memory_space<vmem>>, vector<1x128xf32>
    %58 = vector.broadcast %57 : vector<1x128xf32> to vector<8x128xf32>
    %59 = arith.addf %56, %58 : vector<8x128xf32>
    %cst_42 = arith.constant dense<0xFF800000> : vector<8xf32>
    %60 = vector.multi_reduction <maximumf>, %52, %cst_42 [1] : vector<8x128xf32> to vector<8xf32>
    %61 = vector.shape_cast %60 : vector<8xf32> to vector<8x1xf32>
    %62 = vector.broadcast %61 : vector<8x1xf32> to vector<8x128xf32>
    %63 = arith.subf %52, %62 : vector<8x128xf32>
    %64 = math.exp %63 : vector<8x128xf32>
    %cst_43 = arith.constant dense<0.000000e+00> : vector<8xf32>
    %65 = vector.multi_reduction <add>, %64, %cst_43 [1] : vector<8x128xf32> to vector<8xf32>
    %66 = vector.shape_cast %65 : vector<8xf32> to vector<8x1xf32>
    %67 = vector.broadcast %66 : vector<8x1xf32> to vector<8x128xf32>
    %68 = arith.divf %64, %67 : vector<8x128xf32>
    %c0_44 = arith.constant 0 : index
    %c0_45 = arith.constant 0 : index
    %69 = vector.load %arg14[%c0_44, %c0_45] : memref<8x128xf32, #tpu.memory_space<vmem>>, vector<8x128xf32>
    tpu.vector_store %arg14[%c0_44, %c0_45], %68 {strides = array<i32>} : memref<8x128xf32, #tpu.memory_space<vmem>>, vector<8x128xf32>,
    %cst_46 = arith.constant dense<0xFF800000> : vector<8xf32>
    %70 = vector.multi_reduction <maximumf>, %59, %cst_46 [1] : vector<8x128xf32> to vector<8xf32>
    %71 = vector.shape_cast %70 : vector<8xf32> to vector<8x1xf32>
    %72 = vector.broadcast %71 : vector<8x1xf32> to vector<8x128xf32>
    %73 = arith.subf %59, %72 : vector<8x128xf32>
    %74 = math.exp %73 : vector<8x128xf32>
    %cst_47 = arith.constant dense<0.000000e+00> : vector<8xf32>
    %75 = vector.multi_reduction <add>, %74, %cst_47 [1] : vector<8x128xf32> to vector<8xf32>
    %76 = vector.shape_cast %75 : vector<8xf32> to vector<8x1xf32>
    %77 = vector.broadcast %76 : vector<8x1xf32> to vector<8x128xf32>
    %78 = arith.divf %74, %77 : vector<8x128xf32>
    %c0_48 = arith.constant 0 : index
    %c0_49 = arith.constant 0 : index
    %79 = vector.load %arg15[%c0_48, %c0_49] : memref<8x128xf32, #tpu.memory_space<vmem>>, vector<8x128xf32>
    tpu.vector_store %arg15[%c0_48, %c0_49], %78 {strides = array<i32>} : memref<8x128xf32, #tpu.memory_space<vmem>>, vector<8x128xf32>,
    return
  }
  func.func @transform_0(%arg0: i32) -> (i32, i32) {
    %c0_i32 = arith.constant 0 : i32
    %c0_i32_0 = arith.constant 0 : i32
    return %arg0, %c0_i32 : i32, i32
  }
  func.func @transform_1(%arg0: i32) -> (i32, i32) {
    %c0_i32 = arith.constant 0 : i32
    %c0_i32_0 = arith.constant 0 : i32
    return %arg0, %c0_i32 : i32, i32
  }
  func.func @transform_2(%arg0: i32) -> (i32, i32) {
    %c0_i32 = arith.constant 0 : i32
    %c0_i32_0 = arith.constant 0 : i32
    %c0_i32_1 = arith.constant 0 : i32
    return %c0_i32, %c0_i32_0 : i32, i32
  }
  func.func @transform_3(%arg0: i32) -> (i32, i32) {
    %c0_i32 = arith.constant 0 : i32
    %c0_i32_0 = arith.constant 0 : i32
    %c0_i32_1 = arith.constant 0 : i32
    return %c0_i32, %c0_i32_0 : i32, i32
  }
  func.func @transform_4(%arg0: i32) -> (i32, i32) {
    %c0_i32 = arith.constant 0 : i32
    %c0_i32_0 = arith.constant 0 : i32
    %c0_i32_1 = arith.constant 0 : i32
    return %c0_i32, %c0_i32_0 : i32, i32
  }
  func.func @transform_5(%arg0: i32) -> (i32, i32) {
    %c0_i32 = arith.constant 0 : i32
    %c0_i32_0 = arith.constant 0 : i32
    %c0_i32_1 = arith.constant 0 : i32
    return %c0_i32, %c0_i32_0 : i32, i32
  }
  func.func @transform_6(%arg0: i32) -> (i32, i32) {
    %c0_i32 = arith.constant 0 : i32
    %c0_i32_0 = arith.constant 0 : i32
    %c0_i32_1 = arith.constant 0 : i32
    return %c0_i32, %c0_i32_0 : i32, i32
  }
  func.func @transform_7(%arg0: i32) -> (i32, i32) {
    %c0_i32 = arith.constant 0 : i32
    %c0_i32_0 = arith.constant 0 : i32
    %c0_i32_1 = arith.constant 0 : i32
    return %c0_i32, %c0_i32_0 : i32, i32
  }
  func.func @transform_8(%arg0: i32) -> (i32, i32) {
    %c0_i32 = arith.constant 0 : i32
    %c0_i32_0 = arith.constant 0 : i32
    %c0_i32_1 = arith.constant 0 : i32
    return %c0_i32, %c0_i32_0 : i32, i32
  }
  func.func @transform_9(%arg0: i32) -> (i32, i32) {
    %c0_i32 = arith.constant 0 : i32
    %c0_i32_0 = arith.constant 0 : i32
    %c0_i32_1 = arith.constant 0 : i32
    return %c0_i32, %c0_i32_0 : i32, i32
  }
  func.func @transform_10(%arg0: i32) -> (i32, i32) {
    %c0_i32 = arith.constant 0 : i32
    %c0_i32_0 = arith.constant 0 : i32
    %c0_i32_1 = arith.constant 0 : i32
    return %c0_i32, %c0_i32_0 : i32, i32
  }
  func.func @transform_11(%arg0: i32) -> (i32, i32) {
    %c0_i32 = arith.constant 0 : i32
    %c0_i32_0 = arith.constant 0 : i32
    %c0_i32_1 = arith.constant 0 : i32
    return %c0_i32, %c0_i32_0 : i32, i32
  }
  func.func @transform_12(%arg0: i32) -> (i32, i32) {
    %c0_i32 = arith.constant 0 : i32
    %c0_i32_0 = arith.constant 0 : i32
    %c0_i32_1 = arith.constant 0 : i32
    return %c0_i32, %c0_i32_0 : i32, i32
  }
  func.func @transform_13(%arg0: i32) -> (i32, i32) {
    %c0_i32 = arith.constant 0 : i32
    %c0_i32_0 = arith.constant 0 : i32
    return %arg0, %c0_i32 : i32, i32
  }
  func.func @transform_14(%arg0: i32) -> (i32, i32) {
    %c0_i32 = arith.constant 0 : i32
    %c0_i32_0 = arith.constant 0 : i32
    return %arg0, %c0_i32 : i32, i32
  }
}

</mosaic_0001>

<bundles_post_ra>
// kernel: tpu_custom_call.1
= control target key start
LH: loop header
LB: loop body
LE: loop exit
PB: predicated region body
PF: predicated region fallthrough
CT: control target
= control target key end

     0   :  { %20 = vsyncpa [#allocation3], 0  ;;  %s11449_s0 = inlined_call_operand.hbm [shape: bf16[8,1024], index: 0, kind: input, shape index: {}]   ;;  %s11450_s1 = inlined_call_operand.hbm [shape: bf16[8,256], index: 1, kind: input, shape index: {}]   ;;  %s11451_s2 = inlined_call_operand.hbm [shape: bf16[1024,512], index: 2, kind: input, shape index: {}]   ;;  %s11452_s3 = inlined_call_operand.hbm [shape: bf16[512,512], index: 3, kind: input, shape index: {}]   ;;  %s11453_s4 = inlined_call_operand.hbm [shape: bf16[512,512], index: 4, kind: input, shape index: {}]   ;;  %s11454_s5 = inlined_call_operand.hbm [shape: bf16[256,256], index: 5, kind: input, shape index: {}]   ;;  %s11455_s6 = inlined_call_operand.hbm [shape: bf16[256,256], index: 6, kind: input, shape index: {}]   ;;  %s11456_s7 = inlined_call_operand.hbm [shape: bf16[256,256], index: 7, kind: input, shape index: {}]   ;;  %s11457_s8 = inlined_call_operand.hbm [shape: bf16[512,1024], index: 8, kind: input, shape index: {}]   ;;  %s11458_s9 = inlined_call_operand.hbm [shape: bf16[256,1024], index: 9, kind: input, shape index: {}]   ;;  %s11459_s10 = inlined_call_operand.hbm [shape: bf16[512,128], index: 10, kind: input, shape index: {}]   ;;  %s11460_s11 = inlined_call_operand.hbm [shape: bf16[512,128], index: 11, kind: input, shape index: {}]   ;;  %s11461_s12 = inlined_call_operand.vmem [shape: f32[1,3584], index: 12, kind: input, shape index: {}]   ;;  %s11462_s13 = inlined_call_operand.hbm [shape: f32[8,128], index: 13, kind: output, shape index: {0}]   ;;  %s11463_s14 = inlined_call_operand.hbm [shape: f32[8,128], index: 14, kind: output, shape index: {1}]  }
   0x1   :  { %21 = vsyncpa [#allocation6], 0 }
   0x2   :  { %22 = vsyncpa [#allocation9], 0 }
   0x3   :  { %23 = vsyncpa [#allocation12], 0 }
   0x4   :  { %24 = vsyncpa [#allocation15], 0 }
   0x5   :  { %25 = vsyncpa [#allocation18], 0 }
   0x6   :  { %26 = vsyncpa [#allocation21], 0 }
   0x7   :  { %27 = vsyncpa [#allocation4], 0 }
   0x8   :  { %28 = vsyncpa [#allocation24], 0  ;;  %s10941_s29 = smov [#allocation5]   ;;  %s10615_s17 = scalar_lea.hbm %s11450_s1, 128 }
   0x9   :  { %s45_s30 = sshll.u32 %s10941_s29, 4  ;;  %p10616_p0 = scmp.ne.s32.totalorder %s11450_s1, %s10615_s17  ;;  %s46_s30 = int_to_ptr.vmem [resolvable:$true] %s45_s30 }
   0xa   :  { %p10619_p1 = scmp.lt.u32.totalorder %s10615_s17, %s11450_s1 }
   0xc   :  { %p10621_p2 = pnand %p10619_p1, %p10616_p0 }
   0xe   :  { %10624 = shalt.err (!%p10621_p2)
}
   0xf   :  { %s10625_s22 = scalar_lea.vmem %s46_s30, 128  ;;  %p10630_p4 = scmp.lt.s32.totalorder %s46_s30, %s46_s30 }
  0x10   :  { %p10626_p3 = scmp.ne.s32.totalorder %s46_s30, %s10625_s22  ;;  %p10631_p5 = scmp.lt.s32.totalorder %s10625_s22, %s10625_s22 }
  0x12   :  { %p10632_p6 = por %p10631_p5, %p10630_p4 }
  0x14   :  { %p10633_p7 = pnand %p10632_p6, %p10626_p3 }
  0x16   :  { %10636 = shalt.err (!%p10633_p7)
}
  0x17   :  { %48 = dma.hbm_to_vmem [thread:$0]  %s11450_s1, 128, %s46_s30, [#allocation6]  }
  0x18   :  { %s10942_s25 = smov [#allocation8]   ;;  %s10943_s27 = smov [#allocation11]  }
  0x19   :  { %s66_s26 = sshll.u32 %s10942_s25, 4  ;;  %s90_s28 = sshll.u32 %s10943_s27, 4  ;;  %s67_s26 = int_to_ptr.vmem [resolvable:$true] %s66_s26  ;;  %s91_s28 = int_to_ptr.vmem [resolvable:$true] %s90_s28 }
  0x1a   :  { %s10637_s16 = scalar_lea.hbm %s11452_s3, 16384 }
  0x1b   :  { %p10638_p8 = scmp.ne.s32.totalorder %s11452_s3, %s10637_s16  ;;  %p10641_p9 = scmp.lt.u32.totalorder %s10637_s16, %s11452_s3 }
  0x1d   :  { %p10643_p10 = pnand %p10641_p9, %p10638_p8 }
  0x1f   :  { %10646 = shalt.err (!%p10643_p10)
}
  0x20   :  { %s10647_s1 = scalar_lea.vmem %s67_s26, 16384  ;;  %p10652_p12 = scmp.lt.s32.totalorder %s67_s26, %s67_s26 }
  0x21   :  { %p10648_p11 = scmp.ne.s32.totalorder %s67_s26, %s10647_s1  ;;  %p10653_p13 = scmp.lt.s32.totalorder %s10647_s1, %s10647_s1 }
  0x23   :  { %p10654_p0 = por %p10653_p13, %p10652_p12 }
  0x25   :  { %p10655_p1 = pnand %p10654_p0, %p10648_p11 }
  0x27   :  { %10658 = shalt.err (!%p10655_p1)
}
  0x28   :  { %s10944_s30 = smov 256   ;;  %s10945_s21 = smov 16  }
  0x29   :  { %72 = dma.hbm_to_vmem [thread:$0]  %s11452_s3, 16384, %s67_s26, [#allocation9], %s10944_s30, %s10944_s30, %s10945_s21  }
  0x2a   :  { %s10659_s27 = scalar_lea.hbm %s11454_s5, 4096 }
  0x2b   :  { %p10660_p2 = scmp.ne.s32.totalorder %s11454_s5, %s10659_s27  ;;  %p10663_p3 = scmp.lt.u32.totalorder %s10659_s27, %s11454_s5 }
  0x2d   :  { %p10665_p4 = pnand %p10663_p3, %p10660_p2 }
  0x2f   :  { %10668 = shalt.err (!%p10665_p4)
}
  0x30   :  { %s10669_s18 = scalar_lea.vmem %s91_s28, 4096  ;;  %p10674_p6 = scmp.lt.s32.totalorder %s91_s28, %s91_s28 }
  0x31   :  { %p10670_p5 = scmp.ne.s32.totalorder %s91_s28, %s10669_s18  ;;  %p10675_p7 = scmp.lt.s32.totalorder %s10669_s18, %s10669_s18 }
  0x33   :  { %p10676_p8 = por %p10675_p7, %p10674_p6 }
  0x35   :  { %p10677_p9 = pnand %p10676_p8, %p10670_p5 }
  0x37   :  { %10680 = shalt.err (!%p10677_p9)
}
  0x38   :  { %s10946_s3 = smov 128   ;;  %s10947_s26 = smov 8  }
  0x39   :  { %96 = dma.hbm_to_vmem [thread:$0]  %s11454_s5, 4096, %s91_s28, [#allocation12], %s10946_s3, %s10946_s3, %s10947_s26  }
  0x3a   :  { %s10948_s1 = smov [#allocation14]   ;;  %s10681_s25 = scalar_lea.hbm %s11456_s7, 4096 }
  0x3b   :  { %s114_s22 = sshll.u32 %s10948_s1, 4  ;;  %p10682_p10 = scmp.ne.s32.totalorder %s11456_s7, %s10681_s25  ;;  %s115_s22 = int_to_ptr.vmem [resolvable:$true] %s114_s22 }
  0x3c   :  { %p10685_p11 = scmp.lt.u32.totalorder %s10681_s25, %s11456_s7 }
  0x3e   :  { %p10687_p12 = pnand %p10685_p11, %p10682_p10 }
  0x40   :  { %10690 = shalt.err (!%p10687_p12)
}
  0x41   :  { %s10691_s17 = scalar_lea.vmem %s115_s22, 4096  ;;  %p10696_p0 = scmp.lt.s32.totalorder %s115_s22, %s115_s22 }
  0x42   :  { %p10692_p13 = scmp.ne.s32.totalorder %s115_s22, %s10691_s17  ;;  %p10697_p1 = scmp.lt.s32.totalorder %s10691_s17, %s10691_s17 }
  0x44   :  { %p10698_p2 = por %p10697_p1, %p10696_p0 }
  0x46   :  { %p10699_p3 = pnand %p10698_p2, %p10692_p13 }
  0x48   :  { %10702 = shalt.err (!%p10699_p3)
}
  0x49   :  { %120 = dma.hbm_to_vmem [thread:$0]  %s11456_s7, 4096, %s115_s22, [#allocation15], %s10946_s3, %s10946_s3, %s10947_s26  }
  0x4a   :  { %s10949_s18 = smov [#allocation17]   ;;  %s10950_s20 = smov [#allocation2]  }
  0x4b   :  { %s138_s19 = sshll.u32 %s10949_s18, 4  ;;  %s35_s1 = sshll.u32 %s10950_s20, 4  ;;  %s139_s19 = int_to_ptr.vmem [resolvable:$true] %s138_s19  ;;  %s36_s1 = int_to_ptr.vmem [resolvable:$true] %s35_s1 }
  0x4c   :  { %s10703_s25 = scalar_lea.hbm %s11458_s9, 16384 }
  0x4d   :  { %p10704_p4 = scmp.ne.s32.totalorder %s11458_s9, %s10703_s25  ;;  %p10707_p5 = scmp.lt.u32.totalorder %s10703_s25, %s11458_s9 }
  0x4f   :  { %p10709_p6 = pnand %p10707_p5, %p10704_p4 }
  0x51   :  { %10712 = shalt.err (!%p10709_p6)
}
  0x52   :  { %s10713_s7 = scalar_lea.vmem %s139_s19, 16384  ;;  %p10718_p8 = scmp.lt.s32.totalorder %s139_s19, %s139_s19 }
  0x53   :  { %p10714_p7 = scmp.ne.s32.totalorder %s139_s19, %s10713_s7  ;;  %p10719_p9 = scmp.lt.s32.totalorder %s10713_s7, %s10713_s7 }
  0x55   :  { %p10720_p10 = por %p10719_p9, %p10718_p8 }
  0x57   :  { %p10721_p11 = pnand %p10720_p10, %p10714_p7 }
  0x59   :  { %10724 = shalt.err (!%p10721_p11)
}
  0x5a   :  { %s10951_s22 = smov 512   ;;  %s10952_s17 = smov 32  }
  0x5b   :  { %144 = dma.hbm_to_vmem [thread:$0]  %s11458_s9, 16384, %s139_s19, [#allocation18], %s10951_s22, %s10951_s22, %s10952_s17  }
  0x5c   :  { %s10725_s23 = scalar_lea.hbm %s11449_s0, 512 }
  0x5d   :  { %p10726_p12 = scmp.ne.s32.totalorder %s11449_s0, %s10725_s23  ;;  %p10729_p13 = scmp.lt.u32.totalorder %s10725_s23, %s11449_s0 }
  0x5f   :  { %p10731_p0 = pnand %p10729_p13, %p10726_p12 }
  0x61   :  { %10734 = shalt.err (!%p10731_p0)
}
  0x62   :  { %s10735_s15 = scalar_lea.vmem %s36_s1, 512  ;;  %p10740_p2 = scmp.lt.s32.totalorder %s36_s1, %s36_s1 }
  0x63   :  { %p10736_p1 = scmp.ne.s32.totalorder %s36_s1, %s10735_s15  ;;  %p10741_p3 = scmp.lt.s32.totalorder %s10735_s15, %s10735_s15 }
  0x65   :  { %p10742_p4 = por %p10741_p3, %p10740_p2 }
  0x67   :  { %p10743_p5 = pnand %p10742_p4, %p10736_p1 }
  0x69   :  { %10746 = shalt.err (!%p10743_p5)
}
  0x6a   :  { %38 = dma.hbm_to_vmem [thread:$0]  %s11449_s0, 512, %s36_s1, [#allocation3]  }
  0x6b   :  { %s10953_s16 = smov [#allocation7]   ;;  %s10954_s5 = smov [#allocation10]  }
  0x6c   :  { %s54_s7 = sshll.u32 %s10953_s16, 4  ;;  %s78_s28 = sshll.u32 %s10954_s5, 4  ;;  %s55_s7 = int_to_ptr.vmem [resolvable:$true] %s54_s7  ;;  %s11122_s28 = int_to_ptr.vmem [resolvable:$true] %s78_s28 }
  0x6d   :  { %s10747_s23 = scalar_lea.hbm %s11451_s2, 32768 }
  0x6e   :  { %p10748_p6 = scmp.ne.s32.totalorder %s11451_s2, %s10747_s23  ;;  %p10751_p7 = scmp.lt.u32.totalorder %s10747_s23, %s11451_s2 }
  0x70   :  { %p10753_p8 = pnand %p10751_p7, %p10748_p6 }
  0x72   :  { %10756 = shalt.err (!%p10753_p8)
}
  0x73   :  { %s10757_s0 = scalar_lea.vmem %s55_s7, 32768  ;;  %p10762_p10 = scmp.lt.s32.totalorder %s55_s7, %s55_s7 }
  0x74   :  { %p10758_p9 = scmp.ne.s32.totalorder %s55_s7, %s10757_s0  ;;  %p10763_p11 = scmp.lt.s32.totalorder %s10757_s0, %s10757_s0 }
  0x76   :  { %p10764_p12 = por %p10763_p11, %p10762_p10 }
  0x78   :  { %p10765_p13 = pnand %p10764_p12, %p10758_p9 }
  0x7a   :  { %10768 = shalt.err (!%p10765_p13)
}
  0x7b   :  { %60 = dma.hbm_to_vmem [thread:$0]  %s11451_s2, 32768, %s55_s7, [#allocation6], %s10944_s30, %s10944_s30, %s10945_s21  }
  0x7c   :  { %s10769_s16 = scalar_lea.hbm %s11453_s4, 16384 }
  0x7d   :  { %p10770_p0 = scmp.ne.s32.totalorder %s11453_s4, %s10769_s16  ;;  %p10773_p1 = scmp.lt.u32.totalorder %s10769_s16, %s11453_s4 }
  0x7f   :  { %p10775_p2 = pnand %p10773_p1, %p10770_p0 }
  0x81   :  { %10778 = shalt.err (!%p10775_p2)
}
  0x82   :  { %s10779_s24 = scalar_lea.vmem %s11122_s28, 16384  ;;  %p10784_p4 = scmp.lt.s32.totalorder %s11122_s28, %s11122_s28 }
  0x83   :  { %p10780_p3 = scmp.ne.s32.totalorder %s11122_s28, %s10779_s24  ;;  %p10785_p5 = scmp.lt.s32.totalorder %s10779_s24, %s10779_s24 }
  0x85   :  { %p10786_p6 = por %p10785_p5, %p10784_p4 }
  0x87   :  { %p10787_p7 = pnand %p10786_p6, %p10780_p3 }
  0x89   :  { %10790 = shalt.err (!%p10787_p7)
}
  0x8a   :  { %84 = dma.hbm_to_vmem [thread:$0]  %s11453_s4, 16384, %s11122_s28, [#allocation9], %s10944_s30, %s10944_s30, %s10945_s21  }
  0x8b   :  { %s10955_s25 = smov [#allocation13]   ;;  %s10956_s29 = smov [#allocation16]  }
  0x8c   :  { %s102_s27 = sshll.u32 %s10955_s25, 4  ;;  %s126_s0 = sshll.u32 %s10956_s29, 4  ;;  %s103_s27 = int_to_ptr.vmem [resolvable:$true] %s102_s27  ;;  %s11159_s0 = int_to_ptr.vmem [resolvable:$true] %s126_s0 }
  0x8d   :  { %s10791_s9 = scalar_lea.hbm %s11455_s6, 4096 }
  0x8e   :  { %p10792_p8 = scmp.ne.s32.totalorder %s11455_s6, %s10791_s9  ;;  %p10795_p9 = scmp.lt.u32.totalorder %s10791_s9, %s11455_s6 }
  0x90   :  { %p10797_p10 = pnand %p10795_p9, %p10792_p8 }
  0x92   :  { %10800 = shalt.err (!%p10797_p10)
}
  0x93   :  { %s10801_s4 = scalar_lea.vmem %s103_s27, 4096  ;;  %p10806_p12 = scmp.lt.s32.totalorder %s103_s27, %s103_s27 }
  0x94   :  { %p10802_p11 = scmp.ne.s32.totalorder %s103_s27, %s10801_s4  ;;  %p10807_p13 = scmp.lt.s32.totalorder %s10801_s4, %s10801_s4 }
  0x96   :  { %p10808_p0 = por %p10807_p13, %p10806_p12 }
  0x98   :  { %p10809_p1 = pnand %p10808_p0, %p10802_p11 }
  0x9a   :  { %10812 = shalt.err (!%p10809_p1)
}
  0x9b   :  { %108 = dma.hbm_to_vmem [thread:$0]  %s11455_s6, 4096, %s103_s27, [#allocation12], %s10946_s3, %s10946_s3, %s10947_s26  }
  0x9c   :  { %s10813_s23 = scalar_lea.hbm %s11457_s8, 32768 }
  0x9d   :  { %p10814_p2 = scmp.ne.s32.totalorder %s11457_s8, %s10813_s23  ;;  %p10817_p3 = scmp.lt.u32.totalorder %s10813_s23, %s11457_s8 }
  0x9f   :  { %p10819_p4 = pnand %p10817_p3, %p10814_p2 }
  0xa1   :  { %10822 = shalt.err (!%p10819_p4)
}
  0xa2   :  { %s10823_s29 = scalar_lea.vmem %s11159_s0, 32768  ;;  %p10828_p6 = scmp.lt.s32.totalorder %s11159_s0, %s11159_s0 }
  0xa3   :  { %p10824_p5 = scmp.ne.s32.totalorder %s11159_s0, %s10823_s29  ;;  %p10829_p7 = scmp.lt.s32.totalorder %s10823_s29, %s10823_s29 }
  0xa5   :  { %p10830_p8 = por %p10829_p7, %p10828_p6 }
  0xa7   :  { %p10831_p9 = pnand %p10830_p8, %p10824_p5 }
  0xa9   :  { %10834 = shalt.err (!%p10831_p9)
}
  0xaa   :  { %132 = dma.hbm_to_vmem [thread:$0]  %s11457_s8, 32768, %s11159_s0, [#allocation15], %s10951_s22, %s10951_s22, %s10952_s17  }
  0xab   :  { %s10957_s26 = smov [#allocation19]   ;;  %s10835_s9 = scalar_lea.hbm %s11459_s10, 4096 }
  0xac   :  { %s150_s27 = sshll.u32 %s10957_s26, 4  ;;  %p10836_p10 = scmp.ne.s32.totalorder %s11459_s10, %s10835_s9  ;;  %s151_s27 = int_to_ptr.vmem [resolvable:$true] %s150_s27 }
  0xad   :  { %p10839_p11 = scmp.lt.u32.totalorder %s10835_s9, %s11459_s10 }
  0xaf   :  { %p10841_p12 = pnand %p10839_p11, %p10836_p10 }
  0xb1   :  { %10844 = shalt.err (!%p10841_p12)
}
  0xb2   :  { %s10845_s4 = scalar_lea.vmem %s151_s27, 4096  ;;  %p10850_p0 = scmp.lt.s32.totalorder %s151_s27, %s151_s27 }
  0xb3   :  { %p10846_p13 = scmp.ne.s32.totalorder %s151_s27, %s10845_s4  ;;  %p10851_p1 = scmp.lt.s32.totalorder %s10845_s4, %s10845_s4 }
  0xb5   :  { %p10852_p2 = por %p10851_p1, %p10850_p0 }
  0xb7   :  { %p10853_p3 = pnand %p10852_p2, %p10846_p13 }
  0xb9   :  { %10856 = shalt.err (!%p10853_p3)
}
  0xba   :  { %s10958_s8 = smov 64   ;;  %s10959_s22 = smov 4  }
  0xbb   :  { %156 = dma.hbm_to_vmem [thread:$0]  %s11459_s10, 4096, %s151_s27, [#allocation18], %s10958_s8, %s10958_s8, %s10959_s22  }
  0xbc   :  { %s10960_s30 = smov [#allocation20]   ;;  %s10857_s23 = scalar_lea.hbm %s11460_s11, 4096 }
  0xbd   :  { %s162_s21 = sshll.u32 %s10960_s30, 4  ;;  %p10858_p4 = scmp.ne.s32.totalorder %s11460_s11, %s10857_s23  ;;  %s163_s21 = int_to_ptr.vmem [resolvable:$true] %s162_s21 }
  0xbe   :  { %p10861_p5 = scmp.lt.u32.totalorder %s10857_s23, %s11460_s11 }
  0xc0   :  { %p10863_p6 = pnand %p10861_p5, %p10858_p4 }
  0xc2   :  { %10866 = shalt.err (!%p10863_p6)
}
  0xc3   :  { %s10867_s29 = scalar_lea.vmem %s163_s21, 4096  ;;  %p10872_p8 = scmp.lt.s32.totalorder %s163_s21, %s163_s21 }
  0xc4   :  { %p10868_p7 = scmp.ne.s32.totalorder %s163_s21, %s10867_s29  ;;  %p10873_p9 = scmp.lt.s32.totalorder %s10867_s29, %s10867_s29 }
  0xc6   :  { %p10874_p10 = por %p10873_p9, %p10872_p8 }
  0xc8   :  { %p10875_p11 = pnand %p10874_p10, %p10868_p7 }
  0xca   :  { %10878 = shalt.err (!%p10875_p11)
}
  0xcb   :  { %168 = dma.hbm_to_vmem [thread:$0]  %s11460_s11, 4096, %s163_s21, [#allocation21], %s10958_s8, %s10958_s8, %s10959_s22  }
  0xcc   :  { %10923 = dma.done.wait [#allocation3], 512  }
  0xcd   :  { %10924 = vsyncadd [#allocation3], 4294966784 }
  0xce   :  { %10925 = dma.done.wait [#allocation6], 32896  }
  0xcf   :  { %10926 = vsyncadd [#allocation6], 4294934400 }
  0xd0   :  { %10927 = dma.done.wait [#allocation9], 32768  }
  0xd1   :  { %10928 = vsyncadd [#allocation9], 4294934528 }
  0xd2   :  { %10929 = dma.done.wait [#allocation12], 8192  }
  0xd3   :  { %10930 = vsyncadd [#allocation12], 4294959104 }
  0xd4   :  { %10931 = dma.done.wait [#allocation15], 36864  }
  0xd5   :  { %10932 = vsyncadd [#allocation15], 4294930432 }
  0xd6   :  { %10933 = dma.done.wait [#allocation18], 20480  }
  0xd7   :  { %10934 = vsyncadd [#allocation18], 4294946816 }
  0xd8   :  { %10935 = dma.done.wait [#allocation21], 4096  }
  0xd9   :  { %10936 = vsyncadd [#allocation21], 4294963200  ;;  %v9620_v0 = vld [vmem:[#allocation7 + $0x4] ss:$16 sps:$4 sm:$0xff]   ;;  %v9622_v1 = vld [vmem:[#allocation7 + $0xc] ss:$16 sps:$4 sm:$0xff]  }
  0xda   :  { %1798 = vmatprep.subr.bf16.mxu0 %v9620_v0  ;;  %v9624_v2 = vld [vmem:[#allocation7] ss:$16 sps:$4 sm:$0xff]   ;;  %v9625_v3 = vld [vmem:[#allocation7 + $0x8] ss:$16 sps:$4 sm:$0xff]   ;;  %1962 = vmatprep.subr.bf16.mxu1 %v9622_v1  ;;  %v9626_v4 = vld [vmem:[#allocation7 + $0x24] ss:$16 sps:$4 sm:$0xff]  }
  0xdb   :  { %1799 = vmatpush1.bf16.msra.mxu0 %v9624_v2  ;;  %1963 = vmatpush1.bf16.msra.mxu1 %v9625_v3  ;;  %v9628_v5 = vld [vmem:[#allocation7 + $0x2c] ss:$16 sps:$4 sm:$0xff]   ;;  %v9630_v6 = vld [vmem:[#allocation7 + $0x20] ss:$16 sps:$4 sm:$0xff]   ;;  %v9631_v7 = vld [vmem:[#allocation7 + $0x28] ss:$16 sps:$4 sm:$0xff]  }
  0xdc   :  { %1800 = vmatprep.subr.bf16.mxu0 %v9626_v4  ;;  %1964 = vmatprep.subr.bf16.mxu1 %v9628_v5  ;;  %v9632_v8 = vld [vmem:[#allocation7 + $0x44] ss:$16 sps:$4 sm:$0xff]   ;;  %v9634_v9 = vld [vmem:[#allocation7 + $0x4c] ss:$16 sps:$4 sm:$0xff]   ;;  %v9636_v10 = vld [vmem:[#allocation7 + $0x40] ss:$16 sps:$4 sm:$0xff]  }
  0xdd   :  { %v9637_v11 = vld [vmem:[#allocation7 + $0x48] ss:$16 sps:$4 sm:$0xff]   ;;  %v9638_v12 = vld [vmem:[#allocation7 + $0x64] ss:$16 sps:$4 sm:$0xff]   ;;  %v9640_v13 = vld [vmem:[#allocation7 + $0x6c] ss:$16 sps:$4 sm:$0xff]  }
  0xde   :  { %v9642_v14 = vld [vmem:[#allocation7 + $0x60] ss:$16 sps:$4 sm:$0xff]   ;;  %v9643_v15 = vld [vmem:[#allocation7 + $0x68] ss:$16 sps:$4 sm:$0xff]   ;;  %v9644_v16 = vld [vmem:[#allocation7 + $0x84] ss:$16 sps:$4 sm:$0xff]  }
  0xdf   :  { %1801 = vmatpush1.bf16.msra.mxu0 %v9630_v6  ;;  %1965 = vmatpush1.bf16.msra.mxu1 %v9631_v7  ;;  %v9646_v17 = vld [vmem:[#allocation7 + $0x8c] ss:$16 sps:$4 sm:$0xff]   ;;  %v9648_v18 = vld [vmem:[#allocation7 + $0x80] ss:$16 sps:$4 sm:$0xff]   ;;  %v9649_v19 = vld [vmem:[#allocation7 + $0x88] ss:$16 sps:$4 sm:$0xff]  }
  0xe0   :  { %1802 = vmatprep.subr.bf16.mxu0 %v9632_v8  ;;  %1966 = vmatprep.subr.bf16.mxu1 %v9634_v9  ;;  %v9650_v20 = vld [vmem:[#allocation7 + $0xa4] ss:$16 sps:$4 sm:$0xff]   ;;  %v9652_v21 = vld [vmem:[#allocation7 + $0xac] ss:$16 sps:$4 sm:$0xff]   ;;  %v9654_v22 = vld [vmem:[#allocation7 + $0xa0] ss:$16 sps:$4 sm:$0xff]  }
  0xe1   :  { %v9655_v23 = vld [vmem:[#allocation7 + $0xa8] ss:$16 sps:$4 sm:$0xff]   ;;  %v9656_v24 = vld [vmem:[#allocation7 + $0xc4] ss:$16 sps:$4 sm:$0xff]   ;;  %v9658_v25 = vld [vmem:[#allocation7 + $0xcc] ss:$16 sps:$4 sm:$0xff]  }
  0xe2   :  { %v9660_v26 = vld [vmem:[#allocation7 + $0xc0] ss:$16 sps:$4 sm:$0xff]   ;;  %v9661_v27 = vld [vmem:[#allocation7 + $0xc8] ss:$16 sps:$4 sm:$0xff]   ;;  %v9662_v28 = vld [vmem:[#allocation7 + $0xe4] ss:$16 sps:$4 sm:$0xff]  }
  0xe3   :  { %1803 = vmatpush1.bf16.msra.mxu0 %v9636_v10  ;;  %1967 = vmatpush1.bf16.msra.mxu1 %v9637_v11  ;;  %v9664_v29 = vld [vmem:[#allocation7 + $0xec] ss:$16 sps:$4 sm:$0xff]   ;;  %v9666_v30 = vld [vmem:[#allocation7 + $0xe0] ss:$16 sps:$4 sm:$0xff]   ;;  %v9667_v31 = vld [vmem:[#allocation7 + $0xe8] ss:$16 sps:$4 sm:$0xff]  }
  0xe4   :  { %1804 = vmatprep.subr.bf16.mxu0 %v9638_v12  ;;  %1968 = vmatprep.subr.bf16.mxu1 %v9640_v13  ;;  %v9668_v32 = vld [vmem:[#allocation7 + $0x104] ss:$16 sps:$4 sm:$0xff]   ;;  %v9670_v33 = vld [vmem:[#allocation7 + $0x10c] ss:$16 sps:$4 sm:$0xff]   ;;  %v9672_v34 = vld [vmem:[#allocation7 + $0x100] ss:$16 sps:$4 sm:$0xff]  }
  0xe5   :  { %v9673_v35 = vld [vmem:[#allocation7 + $0x108] ss:$16 sps:$4 sm:$0xff]   ;;  %v9674_v36 = vld [vmem:[#allocation7 + $0x124] ss:$16 sps:$4 sm:$0xff]   ;;  %v9676_v37 = vld [vmem:[#allocation7 + $0x12c] ss:$16 sps:$4 sm:$0xff]  }
  0xe6   :  { %v9678_v38 = vld [vmem:[#allocation7 + $0x120] ss:$16 sps:$4 sm:$0xff]   ;;  %v9679_v39 = vld [vmem:[#allocation7 + $0x128] ss:$16 sps:$4 sm:$0xff]   ;;  %v9680_v40 = vld [vmem:[#allocation7 + $0x144] ss:$16 sps:$4 sm:$0xff]  }
  0xe7   :  { %1805 = vmatpush1.bf16.msra.mxu0 %v9642_v14  ;;  %1969 = vmatpush1.bf16.msra.mxu1 %v9643_v15  ;;  %v9682_v41 = vld [vmem:[#allocation7 + $0x14c] ss:$16 sps:$4 sm:$0xff]   ;;  %v9684_v42 = vld [vmem:[#allocation7 + $0x140] ss:$16 sps:$4 sm:$0xff]   ;;  %v9685_v43 = vld [vmem:[#allocation7 + $0x148] ss:$16 sps:$4 sm:$0xff]  }
  0xe8   :  { %1806 = vmatprep.subr.bf16.mxu0 %v9644_v16  ;;  %1970 = vmatprep.subr.bf16.mxu1 %v9646_v17  ;;  %v9686_v44 = vld [vmem:[#allocation7 + $0x164] ss:$16 sps:$4 sm:$0xff]   ;;  %v9688_v45 = vld [vmem:[#allocation7 + $0x16c] ss:$16 sps:$4 sm:$0xff]   ;;  %v9690_v47 = vld [vmem:[#allocation7 + $0x160] ss:$16 sps:$4 sm:$0xff]  }
  0xe9   :  { %v208_v46 = vld [vmem:[#allocation2] sm:$0xff]  ;;  %v9692_v50 = vld [vmem:[#allocation7 + $0x184] ss:$16 sps:$4 sm:$0xff]   ;;  %v9696_v52 = vld [vmem:[#allocation7 + $0x180] ss:$16 sps:$4 sm:$0xff]  }
  0xea   :  { %v8391_v48 = vcombine.high %v208_v46, %v208_v46  ;;  %v9691_v49 = vld [vmem:[#allocation7 + $0x168] ss:$16 sps:$4 sm:$0xff]   ;;  %v9694_v51 = vld [vmem:[#allocation7 + $0x18c] ss:$16 sps:$4 sm:$0xff]   ;;  %v9698_v54 = vld [vmem:[#allocation7 + $0x1a4] ss:$16 sps:$4 sm:$0xff]   ;;  %v8390_v4 = vcombine.low %v208_v46, %v208_v46 }
  0xeb   :  { %1807 = vmatpush1.bf16.msra.mxu0 %v9648_v18  ;;  %1971 = vmatpush1.bf16.msra.mxu1 %v9649_v19  ;;  %v9697_v53 = vld [vmem:[#allocation7 + $0x188] ss:$16 sps:$4 sm:$0xff]   ;;  %v9700_v55 = vld [vmem:[#allocation7 + $0x1ac] ss:$16 sps:$4 sm:$0xff]   ;;  %v9702_v56 = vld [vmem:[#allocation7 + $0x1a0] ss:$16 sps:$4 sm:$0xff]  }
  0xec   :  { %1808 = vmatprep.subr.bf16.mxu0 %v9650_v20  ;;  %1972 = vmatprep.subr.bf16.mxu1 %v9652_v21  ;;  %v9703_v57 = vld [vmem:[#allocation7 + $0x1a8] ss:$16 sps:$4 sm:$0xff]   ;;  %v9704_v58 = vld [vmem:[#allocation7 + $0x1c4] ss:$16 sps:$4 sm:$0xff]   ;;  %v9706_v59 = vld [vmem:[#allocation7 + $0x1cc] ss:$16 sps:$4 sm:$0xff]  }
  0xed   :  { %1830 = vmatprep.mubr.bf16.mxu0 %v8391_v48  ;;  %1994 = vmatprep.mubr.bf16.mxu1 %v8391_v48  ;;  %v9708_v60 = vld [vmem:[#allocation7 + $0x1c0] ss:$16 sps:$4 sm:$0xff]   ;;  %v9709_v61 = vld [vmem:[#allocation7 + $0x1c8] ss:$16 sps:$4 sm:$0xff]   ;;  %v9710_v62 = vld [vmem:[#allocation7 + $0x1e4] ss:$16 sps:$4 sm:$0xff]  }
  0xee   :  { %v9712_v63 = vld [vmem:[#allocation7 + $0x1ec] ss:$16 sps:$4 sm:$0xff]   ;;  %v9714_v0 = vld [vmem:[#allocation7 + $0x1e0] ss:$16 sps:$4 sm:$0xff]   ;;  %v9715_v1 = vld [vmem:[#allocation7 + $0x1e8] ss:$16 sps:$4 sm:$0xff]  }
  0xef   :  { %1809 = vmatpush1.bf16.msra.mxu0 %v9654_v22  ;;  %1973 = vmatpush1.bf16.msra.mxu1 %v9655_v23  ;;  %v9720_v2 = vld [vmem:[#allocation7 + $0x204] ss:$16 sps:$4 sm:$0xff]   ;;  %v9723_v3 = vld [vmem:[#allocation7 + $0x20c] ss:$16 sps:$4 sm:$0xff]   ;;  %v9718_v5 = vld [vmem:[#allocation7 + $0x200] ss:$16 sps:$4 sm:$0xff]  }
  0xf0   :  { %1810 = vmatprep.subr.bf16.mxu0 %v9656_v24  ;;  %1974 = vmatprep.subr.bf16.mxu1 %v9658_v25  ;;  %v9721_v6 = vld [vmem:[#allocation7 + $0x208] ss:$16 sps:$4 sm:$0xff]   ;;  %v9726_v7 = vld [vmem:[#allocation7 + $0x224] ss:$16 sps:$4 sm:$0xff]   ;;  %v9729_v8 = vld [vmem:[#allocation7 + $0x22c] ss:$16 sps:$4 sm:$0xff]  }
  0xf1   :  { %v9724_v9 = vld [vmem:[#allocation7 + $0x220] ss:$16 sps:$4 sm:$0xff]   ;;  %v9727_v10 = vld [vmem:[#allocation7 + $0x228] ss:$16 sps:$4 sm:$0xff]   ;;  %v9732_v11 = vld [vmem:[#allocation7 + $0x244] ss:$16 sps:$4 sm:$0xff]  }
  0xf2   :  { %v9735_v12 = vld [vmem:[#allocation7 + $0x24c] ss:$16 sps:$4 sm:$0xff]   ;;  %v9730_v13 = vld [vmem:[#allocation7 + $0x240] ss:$16 sps:$4 sm:$0xff]   ;;  %v9733_v14 = vld [vmem:[#allocation7 + $0x248] ss:$16 sps:$4 sm:$0xff]  }
  0xf3   :  { %1811 = vmatpush1.bf16.msra.mxu0 %v9660_v26  ;;  %1975 = vmatpush1.bf16.msra.mxu1 %v9661_v27  ;;  %v9738_v15 = vld [vmem:[#allocation7 + $0x264] ss:$16 sps:$4 sm:$0xff]   ;;  %v9741_v16 = vld [vmem:[#allocation7 + $0x26c] ss:$16 sps:$4 sm:$0xff]   ;;  %v9736_v17 = vld [vmem:[#allocation7 + $0x260] ss:$16 sps:$4 sm:$0xff]  }
  0xf4   :  { %1812 = vmatprep.subr.bf16.mxu0 %v9662_v28  ;;  %1976 = vmatprep.subr.bf16.mxu1 %v9664_v29  ;;  %v9739_v18 = vld [vmem:[#allocation7 + $0x268] ss:$16 sps:$4 sm:$0xff]   ;;  %v9744_v19 = vld [vmem:[#allocation7 + $0x284] ss:$16 sps:$4 sm:$0xff]   ;;  %v9747_v20 = vld [vmem:[#allocation7 + $0x28c] ss:$16 sps:$4 sm:$0xff]  }
  0xf5   :  { %v9742_v21 = vld [vmem:[#allocation7 + $0x280] ss:$16 sps:$4 sm:$0xff]   ;;  %v9745_v22 = vld [vmem:[#allocation7 + $0x288] ss:$16 sps:$4 sm:$0xff]   ;;  %v9750_v23 = vld [vmem:[#allocation7 + $0x2a4] ss:$16 sps:$4 sm:$0xff]  }
  0xf6   :  { %v9753_v24 = vld [vmem:[#allocation7 + $0x2ac] ss:$16 sps:$4 sm:$0xff]   ;;  %v9748_v25 = vld [vmem:[#allocation7 + $0x2a0] ss:$16 sps:$4 sm:$0xff]   ;;  %v9751_v26 = vld [vmem:[#allocation7 + $0x2a8] ss:$16 sps:$4 sm:$0xff]  }
  0xf7   :  { %1813 = vmatpush1.bf16.msra.mxu0 %v9666_v30  ;;  %1977 = vmatpush1.bf16.msra.mxu1 %v9667_v31  ;;  %v9756_v27 = vld [vmem:[#allocation7 + $0x2c4] ss:$16 sps:$4 sm:$0xff]   ;;  %v9759_v28 = vld [vmem:[#allocation7 + $0x2cc] ss:$16 sps:$4 sm:$0xff]   ;;  %v9754_v31 = vld [vmem:[#allocation7 + $0x2c0] ss:$16 sps:$4 sm:$0xff]  }
  0xf8   :  { %1814 = vmatprep.subr.bf16.mxu0 %v9668_v32  ;;  %1978 = vmatprep.subr.bf16.mxu1 %v9670_v33  ;;  %v11220_v29 = vld [vmem:[#allocation2 + $0x8] sm:$0xff]  ;;  %v9757_v32 = vld [vmem:[#allocation7 + $0x2c8] ss:$16 sps:$4 sm:$0xff]   ;;  %v9783_v46 = vld [vmem:[#allocation7 + $0x34c] ss:$16 sps:$4 sm:$0xff]  }
  0xf9   :  { %v8393_v30 = vcombine.high %v11220_v29, %v11220_v29  ;;  %v9762_v33 = vld [vmem:[#allocation7 + $0x2e4] ss:$16 sps:$4 sm:$0xff]   ;;  %v9781_v48 = vld [vmem:[#allocation7 + $0x348] ss:$16 sps:$4 sm:$0xff]  }
  0xfb   :  { %1815 = vmatpush1.bf16.msra.mxu0 %v9672_v34  ;;  %1979 = vmatpush1.bf16.msra.mxu1 %v9673_v35  ;;  %v9765_v34 = vld [vmem:[#allocation7 + $0x2ec] ss:$16 sps:$4 sm:$0xff]   ;;  %v9760_v35 = vld [vmem:[#allocation7 + $0x2e0] ss:$16 sps:$4 sm:$0xff]  }
  0xfc   :  { %1816 = vmatprep.subr.bf16.mxu0 %v9674_v36  ;;  %1980 = vmatprep.subr.bf16.mxu1 %v9676_v37  ;;  %v9763_v36 = vld [vmem:[#allocation7 + $0x2e8] ss:$16 sps:$4 sm:$0xff]   ;;  %v9768_v37 = vld [vmem:[#allocation7 + $0x304] ss:$16 sps:$4 sm:$0xff]  }
  0xff   :  { %1817 = vmatpush1.bf16.msra.mxu0 %v9678_v38  ;;  %1981 = vmatpush1.bf16.msra.mxu1 %v9679_v39  ;;  %v9771_v38 = vld [vmem:[#allocation7 + $0x30c] ss:$16 sps:$4 sm:$0xff]   ;;  %v9766_v39 = vld [vmem:[#allocation7 + $0x300] ss:$16 sps:$4 sm:$0xff]  }
 0x100   :  { %1818 = vmatprep.subr.bf16.mxu0 %v9680_v40  ;;  %1982 = vmatprep.subr.bf16.mxu1 %v9682_v41  ;;  %v9769_v40 = vld [vmem:[#allocation7 + $0x308] ss:$16 sps:$4 sm:$0xff]   ;;  %v9774_v41 = vld [vmem:[#allocation7 + $0x324] ss:$16 sps:$4 sm:$0xff]  }
 0x103   :  { %1819 = vmatpush1.bf16.msra.mxu0 %v9684_v42  ;;  %1983 = vmatpush1.bf16.msra.mxu1 %v9685_v43  ;;  %v9777_v42 = vld [vmem:[#allocation7 + $0x32c] ss:$16 sps:$4 sm:$0xff]   ;;  %v9772_v43 = vld [vmem:[#allocation7 + $0x320] ss:$16 sps:$4 sm:$0xff]  }
 0x104   :  { %1820 = vmatprep.subr.bf16.mxu0 %v9686_v44  ;;  %1984 = vmatprep.subr.bf16.mxu1 %v9688_v45  ;;  %v9775_v44 = vld [vmem:[#allocation7 + $0x328] ss:$16 sps:$4 sm:$0xff]   ;;  %v9780_v45 = vld [vmem:[#allocation7 + $0x344] ss:$16 sps:$4 sm:$0xff]  }
 0x107   :  { %1821 = vmatpush1.bf16.msra.mxu0 %v9690_v47  ;;  %1985 = vmatpush1.bf16.msra.mxu1 %v9691_v49  ;;  %v9778_v47 = vld [vmem:[#allocation7 + $0x340] ss:$16 sps:$4 sm:$0xff]   ;;  %v9786_v49 = vld [vmem:[#allocation7 + $0x364] ss:$16 sps:$4 sm:$0xff]  }
 0x108   :  { %1822 = vmatprep.subr.bf16.mxu0 %v9692_v50  ;;  %1986 = vmatprep.subr.bf16.mxu1 %v9694_v51  ;;  %v9789_v50 = vld [vmem:[#allocation7 + $0x36c] ss:$16 sps:$4 sm:$0xff]   ;;  %v9784_v51 = vld [vmem:[#allocation7 + $0x360] ss:$16 sps:$4 sm:$0xff]  }
 0x10b   :  { %1823 = vmatpush1.bf16.msra.mxu0 %v9696_v52  ;;  %1987 = vmatpush1.bf16.msra.mxu1 %v9697_v53  ;;  %v9787_v52 = vld [vmem:[#allocation7 + $0x368] ss:$16 sps:$4 sm:$0xff]   ;;  %v9792_v53 = vld [vmem:[#allocation7 + $0x384] ss:$16 sps:$4 sm:$0xff]  }
 0x10c   :  { %1824 = vmatprep.subr.bf16.mxu0 %v9698_v54  ;;  %1988 = vmatprep.subr.bf16.mxu1 %v9700_v55  ;;  %v9795_v54 = vld [vmem:[#allocation7 + $0x38c] ss:$16 sps:$4 sm:$0xff]   ;;  %v9790_v55 = vld [vmem:[#allocation7 + $0x380] ss:$16 sps:$4 sm:$0xff]  }
 0x10f   :  { %1825 = vmatpush1.bf16.msra.mxu0 %v9702_v56  ;;  %1989 = vmatpush1.bf16.msra.mxu1 %v9703_v57  ;;  %v9793_v56 = vld [vmem:[#allocation7 + $0x388] ss:$16 sps:$4 sm:$0xff]   ;;  %v9798_v57 = vld [vmem:[#allocation7 + $0x3a4] ss:$16 sps:$4 sm:$0xff]  }
 0x110   :  { %1826 = vmatprep.subr.bf16.mxu0 %v9704_v58  ;;  %1990 = vmatprep.subr.bf16.mxu1 %v9706_v59  ;;  %v9801_v58 = vld [vmem:[#allocation7 + $0x3ac] ss:$16 sps:$4 sm:$0xff]   ;;  %v9796_v59 = vld [vmem:[#allocation7 + $0x3a0] ss:$16 sps:$4 sm:$0xff]  }
 0x113   :  { %1827 = vmatpush1.bf16.msra.mxu0 %v9708_v60  ;;  %1991 = vmatpush1.bf16.msra.mxu1 %v9709_v61  ;;  %v9799_v60 = vld [vmem:[#allocation7 + $0x3a8] ss:$16 sps:$4 sm:$0xff]   ;;  %v9804_v61 = vld [vmem:[#allocation7 + $0x3c4] ss:$16 sps:$4 sm:$0xff]  }
 0x114   :  { %1828 = vmatprep.subr.bf16.mxu0 %v9710_v62  ;;  %1992 = vmatprep.subr.bf16.mxu1 %v9712_v63  ;;  %v9807_v62 = vld [vmem:[#allocation7 + $0x3cc] ss:$16 sps:$4 sm:$0xff]   ;;  %v9802_v63 = vld [vmem:[#allocation7 + $0x3c0] ss:$16 sps:$4 sm:$0xff]  }
 0x117   :  { %1829 = vmatpush1.bf16.msra.mxu0 %v9714_v0  ;;  %1993 = vmatpush1.bf16.msra.mxu1 %v9715_v1  ;;  %v9805_v0 = vld [vmem:[#allocation7 + $0x3c8] ss:$16 sps:$4 sm:$0xff]   ;;  %v9810_v1 = vld [vmem:[#allocation7 + $0x3e4] ss:$16 sps:$4 sm:$0xff]  }
 0x118   :  { %1839 = vmatprep.subr.bf16.mxu0 %v9720_v2  ;;  %2003 = vmatprep.subr.bf16.mxu1 %v9723_v3  ;;  %v9813_v2 = vld [vmem:[#allocation7 + $0x3ec] ss:$16 sps:$4 sm:$0xff]   ;;  %v9808_v3 = vld [vmem:[#allocation7 + $0x3e0] ss:$16 sps:$4 sm:$0xff]  }
 0x11a   :  { %1831 = vmatmul.mubr.bf16.vlgmr.msra.gmra.mrb[0].mxu0 %v8390_v4  ;;  %1995 = vmatmul.mubr.bf16.vlgmr.msra.gmra.mrb[0].mxu1 %v8390_v4  ;;  %v9811_v4 = vld [vmem:[#allocation7 + $0x3e8] ss:$16 sps:$4 sm:$0xff]  }
 0x11b   :  { %1840 = vmatpush1.bf16.msra.mxu0 %v9718_v5  ;;  %2004 = vmatpush1.bf16.msra.mxu1 %v9721_v6  ;;  %v9818_v5 = vld [vmem:[#allocation7 + $0x404] ss:$16 sps:$4 sm:$0xff]   ;;  %v9821_v6 = vld [vmem:[#allocation7 + $0x40c] ss:$16 sps:$4 sm:$0xff]  }
 0x11c   :  { %1841 = vmatprep.subr.bf16.mxu0 %v9726_v7  ;;  %2005 = vmatprep.subr.bf16.mxu1 %v9729_v8  ;;  %v8392_v7 = vcombine.low %v11220_v29, %v11220_v29  ;;  %v9816_v8 = vld [vmem:[#allocation7 + $0x400] ss:$16 sps:$4 sm:$0xff]   ;;  %v9851_v29 = vld [vmem:[#allocation7 + $0x4ac] ss:$16 sps:$4 sm:$0xff]  }
 0x11d   :  { %1871 = vmatprep.mubr.bf16.mxu0 %v8393_v30  ;;  %2035 = vmatprep.mubr.bf16.mxu1 %v8393_v30  ;;  %v9846_v30 = vld [vmem:[#allocation7 + $0x4a0] ss:$16 sps:$4 sm:$0xff]  }
 0x11f   :  { %1842 = vmatpush1.bf16.msra.mxu0 %v9724_v9  ;;  %2006 = vmatpush1.bf16.msra.mxu1 %v9727_v10  ;;  %v9819_v9 = vld [vmem:[#allocation7 + $0x408] ss:$16 sps:$4 sm:$0xff]   ;;  %v9824_v10 = vld [vmem:[#allocation7 + $0x424] ss:$16 sps:$4 sm:$0xff]  }
 0x120   :  { %1843 = vmatprep.subr.bf16.mxu0 %v9732_v11  ;;  %2007 = vmatprep.subr.bf16.mxu1 %v9735_v12  ;;  %v11226_v11 = vld [vmem:[#allocation2 + $0x10] sm:$0xff] }
 0x121   :  { %v9827_v12 = vld [vmem:[#allocation7 + $0x42c] ss:$16 sps:$4 sm:$0xff]  }
 0x123   :  { %1844 = vmatpush1.bf16.msra.mxu0 %v9730_v13  ;;  %2008 = vmatpush1.bf16.msra.mxu1 %v9733_v14  ;;  %v8395_v13 = vcombine.high %v11226_v11, %v11226_v11  ;;  %v9822_v14 = vld [vmem:[#allocation7 + $0x420] ss:$16 sps:$4 sm:$0xff]  }
 0x124   :  { %1845 = vmatprep.subr.bf16.mxu0 %v9738_v15  ;;  %2009 = vmatprep.subr.bf16.mxu1 %v9741_v16  ;;  %v9825_v15 = vld [vmem:[#allocation7 + $0x428] ss:$16 sps:$4 sm:$0xff]   ;;  %v9830_v16 = vld [vmem:[#allocation7 + $0x444] ss:$16 sps:$4 sm:$0xff]  }
 0x127   :  { %1846 = vmatpush1.bf16.msra.mxu0 %v9736_v17  ;;  %2010 = vmatpush1.bf16.msra.mxu1 %v9739_v18  ;;  %v9833_v17 = vld [vmem:[#allocation7 + $0x44c] ss:$16 sps:$4 sm:$0xff]   ;;  %v9828_v18 = vld [vmem:[#allocation7 + $0x440] ss:$16 sps:$4 sm:$0xff]  }
 0x128   :  { %1847 = vmatprep.subr.bf16.mxu0 %v9744_v19  ;;  %2011 = vmatprep.subr.bf16.mxu1 %v9747_v20  ;;  %v9831_v19 = vld [vmem:[#allocation7 + $0x448] ss:$16 sps:$4 sm:$0xff]   ;;  %v9836_v20 = vld [vmem:[#allocation7 + $0x464] ss:$16 sps:$4 sm:$0xff]  }
 0x12b   :  { %1848 = vmatpush1.bf16.msra.mxu0 %v9742_v21  ;;  %2012 = vmatpush1.bf16.msra.mxu1 %v9745_v22  ;;  %v9839_v21 = vld [vmem:[#allocation7 + $0x46c] ss:$16 sps:$4 sm:$0xff]   ;;  %v9834_v22 = vld [vmem:[#allocation7 + $0x460] ss:$16 sps:$4 sm:$0xff]  }
 0x12c   :  { %1849 = vmatprep.subr.bf16.mxu0 %v9750_v23  ;;  %2013 = vmatprep.subr.bf16.mxu1 %v9753_v24  ;;  %v9837_v23 = vld [vmem:[#allocation7 + $0x468] ss:$16 sps:$4 sm:$0xff]   ;;  %v9842_v24 = vld [vmem:[#allocation7 + $0x484] ss:$16 sps:$4 sm:$0xff]  }
 0x12f   :  { %1850 = vmatpush1.bf16.msra.mxu0 %v9748_v25  ;;  %2014 = vmatpush1.bf16.msra.mxu1 %v9751_v26  ;;  %v9845_v25 = vld [vmem:[#allocation7 + $0x48c] ss:$16 sps:$4 sm:$0xff]   ;;  %v9840_v26 = vld [vmem:[#allocation7 + $0x480] ss:$16 sps:$4 sm:$0xff]  }
 0x130   :  { %1851 = vmatprep.subr.bf16.mxu0 %v9756_v27  ;;  %2015 = vmatprep.subr.bf16.mxu1 %v9759_v28  ;;  %v9843_v27 = vld [vmem:[#allocation7 + $0x488] ss:$16 sps:$4 sm:$0xff]   ;;  %v9848_v28 = vld [vmem:[#allocation7 + $0x4a4] ss:$16 sps:$4 sm:$0xff]  }
 0x133   :  { %1852 = vmatpush1.bf16.msra.mxu0 %v9754_v31  ;;  %2016 = vmatpush1.bf16.msra.mxu1 %v9757_v32  ;;  %v9849_v31 = vld [vmem:[#allocation7 + $0x4a8] ss:$16 sps:$4 sm:$0xff]   ;;  %v9854_v32 = vld [vmem:[#allocation7 + $0x4c4] ss:$16 sps:$4 sm:$0xff]  }
 0x134   :  { %1853 = vmatprep.subr.bf16.mxu0 %v9762_v33  ;;  %2017 = vmatprep.subr.bf16.mxu1 %v9765_v34  ;;  %v9857_v33 = vld [vmem:[#allocation7 + $0x4cc] ss:$16 sps:$4 sm:$0xff]   ;;  %v9852_v34 = vld [vmem:[#allocation7 + $0x4c0] ss:$16 sps:$4 sm:$0xff]  }
 0x137   :  { %1854 = vmatpush1.bf16.msra.mxu0 %v9760_v35  ;;  %2018 = vmatpush1.bf16.msra.mxu1 %v9763_v36  ;;  %v9855_v35 = vld [vmem:[#allocation7 + $0x4c8] ss:$16 sps:$4 sm:$0xff]   ;;  %v9860_v36 = vld [vmem:[#allocation7 + $0x4e4] ss:$16 sps:$4 sm:$0xff]  }
 0x138   :  { %1855 = vmatprep.subr.bf16.mxu0 %v9768_v37  ;;  %2019 = vmatprep.subr.bf16.mxu1 %v9771_v38  ;;  %v9863_v37 = vld [vmem:[#allocation7 + $0x4ec] ss:$16 sps:$4 sm:$0xff]   ;;  %v9858_v38 = vld [vmem:[#allocation7 + $0x4e0] ss:$16 sps:$4 sm:$0xff]  }
 0x13b   :  { %1856 = vmatpush1.bf16.msra.mxu0 %v9766_v39  ;;  %2020 = vmatpush1.bf16.msra.mxu1 %v9769_v40  ;;  %v9861_v39 = vld [vmem:[#allocation7 + $0x4e8] ss:$16 sps:$4 sm:$0xff]   ;;  %v9866_v40 = vld [vmem:[#allocation7 + $0x504] ss:$16 sps:$4 sm:$0xff]  }
 0x13c   :  { %1857 = vmatprep.subr.bf16.mxu0 %v9774_v41  ;;  %2021 = vmatprep.subr.bf16.mxu1 %v9777_v42  ;;  %v9869_v41 = vld [vmem:[#allocation7 + $0x50c] ss:$16 sps:$4 sm:$0xff]   ;;  %v9864_v42 = vld [vmem:[#allocation7 + $0x500] ss:$16 sps:$4 sm:$0xff]  }
 0x13f   :  { %1858 = vmatpush1.bf16.msra.mxu0 %v9772_v43  ;;  %2022 = vmatpush1.bf16.msra.mxu1 %v9775_v44  ;;  %v9867_v43 = vld [vmem:[#allocation7 + $0x508] ss:$16 sps:$4 sm:$0xff]   ;;  %v9872_v44 = vld [vmem:[#allocation7 + $0x524] ss:$16 sps:$4 sm:$0xff]  }
 0x140   :  { %1859 = vmatprep.subr.bf16.mxu0 %v9780_v45  ;;  %2023 = vmatprep.subr.bf16.mxu1 %v9783_v46  ;;  %v9875_v45 = vld [vmem:[#allocation7 + $0x52c] ss:$16 sps:$4 sm:$0xff]   ;;  %v9870_v46 = vld [vmem:[#allocation7 + $0x520] ss:$16 sps:$4 sm:$0xff]  }
 0x143   :  { %1860 = vmatpush1.bf16.msra.mxu0 %v9778_v47  ;;  %2024 = vmatpush1.bf16.msra.mxu1 %v9781_v48  ;;  %v9873_v47 = vld [vmem:[#allocation7 + $0x528] ss:$16 sps:$4 sm:$0xff]   ;;  %v9878_v48 = vld [vmem:[#allocation7 + $0x544] ss:$16 sps:$4 sm:$0xff]  }
 0x144   :  { %1861 = vmatprep.subr.bf16.mxu0 %v9786_v49  ;;  %2025 = vmatprep.subr.bf16.mxu1 %v9789_v50  ;;  %v9881_v49 = vld [vmem:[#allocation7 + $0x54c] ss:$16 sps:$4 sm:$0xff]   ;;  %v9876_v50 = vld [vmem:[#allocation7 + $0x540] ss:$16 sps:$4 sm:$0xff]  }
 0x147   :  { %1862 = vmatpush1.bf16.msra.mxu0 %v9784_v51  ;;  %2026 = vmatpush1.bf16.msra.mxu1 %v9787_v52  ;;  %v9879_v51 = vld [vmem:[#allocation7 + $0x548] ss:$16 sps:$4 sm:$0xff]   ;;  %v9884_v52 = vld [vmem:[#allocation7 + $0x564] ss:$16 sps:$4 sm:$0xff]  }
 0x148   :  { %1863 = vmatprep.subr.bf16.mxu0 %v9792_v53  ;;  %2027 = vmatprep.subr.bf16.mxu1 %v9795_v54  ;;  %v9887_v53 = vld [vmem:[#allocation7 + $0x56c] ss:$16 sps:$4 sm:$0xff]   ;;  %v9882_v54 = vld [vmem:[#allocation7 + $0x560] ss:$16 sps:$4 sm:$0xff]  }
 0x14b   :  { %1864 = vmatpush1.bf16.msra.mxu0 %v9790_v55  ;;  %2028 = vmatpush1.bf16.msra.mxu1 %v9793_v56  ;;  %v9885_v55 = vld [vmem:[#allocation7 + $0x568] ss:$16 sps:$4 sm:$0xff]   ;;  %v9890_v56 = vld [vmem:[#allocation7 + $0x584] ss:$16 sps:$4 sm:$0xff]  }
 0x14c   :  { %1865 = vmatprep.subr.bf16.mxu0 %v9798_v57  ;;  %2029 = vmatprep.subr.bf16.mxu1 %v9801_v58  ;;  %v9893_v57 = vld [vmem:[#allocation7 + $0x58c] ss:$16 sps:$4 sm:$0xff]   ;;  %v9888_v58 = vld [vmem:[#allocation7 + $0x580] ss:$16 sps:$4 sm:$0xff]  }
 0x14f   :  { %1866 = vmatpush1.bf16.msra.mxu0 %v9796_v59  ;;  %2030 = vmatpush1.bf16.msra.mxu1 %v9799_v60  ;;  %v9891_v59 = vld [vmem:[#allocation7 + $0x588] ss:$16 sps:$4 sm:$0xff]   ;;  %v9896_v60 = vld [vmem:[#allocation7 + $0x5a4] ss:$16 sps:$4 sm:$0xff]  }
 0x150   :  { %1867 = vmatprep.subr.bf16.mxu0 %v9804_v61  ;;  %2031 = vmatprep.subr.bf16.mxu1 %v9807_v62  ;;  %v9899_v61 = vld [vmem:[#allocation7 + $0x5ac] ss:$16 sps:$4 sm:$0xff]   ;;  %v9894_v62 = vld [vmem:[#allocation7 + $0x5a0] ss:$16 sps:$4 sm:$0xff]  }
 0x153   :  { %1868 = vmatpush1.bf16.msra.mxu0 %v9802_v63  ;;  %2032 = vmatpush1.bf16.msra.mxu1 %v9805_v0  ;;  %v9897_v63 = vld [vmem:[#allocation7 + $0x5a8] ss:$16 sps:$4 sm:$0xff]   ;;  %v9902_v0 = vld [vmem:[#allocation7 + $0x5c4] ss:$16 sps:$4 sm:$0xff]  }
 0x154   :  { %1869 = vmatprep.subr.bf16.mxu0 %v9810_v1  ;;  %2033 = vmatprep.subr.bf16.mxu1 %v9813_v2  ;;  %v9905_v1 = vld [vmem:[#allocation7 + $0x5cc] ss:$16 sps:$4 sm:$0xff]   ;;  %v9900_v2 = vld [vmem:[#allocation7 + $0x5c0] ss:$16 sps:$4 sm:$0xff]  }
 0x157   :  { %1870 = vmatpush1.bf16.msra.mxu0 %v9808_v3  ;;  %2034 = vmatpush1.bf16.msra.mxu1 %v9811_v4  ;;  %v9903_v3 = vld [vmem:[#allocation7 + $0x5c8] ss:$16 sps:$4 sm:$0xff]   ;;  %v9908_v4 = vld [vmem:[#allocation7 + $0x5e4] ss:$16 sps:$4 sm:$0xff]  }
 0x158   :  { %1880 = vmatprep.subr.bf16.mxu0 %v9818_v5  ;;  %2044 = vmatprep.subr.bf16.mxu1 %v9821_v6  ;;  %v9911_v5 = vld [vmem:[#allocation7 + $0x5ec] ss:$16 sps:$4 sm:$0xff]   ;;  %v9906_v6 = vld [vmem:[#allocation7 + $0x5e0] ss:$16 sps:$4 sm:$0xff]  }
 0x15a   :  { %1872 = vmatmul.mubr.bf16.vlgmr.msra.gmra.mrb[0].mxu0 %v8392_v7  ;;  %2036 = vmatmul.mubr.bf16.vlgmr.msra.gmra.mrb[0].mxu1 %v8392_v7  ;;  %v9909_v7 = vld [vmem:[#allocation7 + $0x5e8] ss:$16 sps:$4 sm:$0xff]  }
 0x15b   :  { %1881 = vmatpush1.bf16.msra.mxu0 %v9816_v8  ;;  %2045 = vmatpush1.bf16.msra.mxu1 %v9819_v9  ;;  %v9916_v8 = vld [vmem:[#allocation7 + $0x604] ss:$16 sps:$4 sm:$0xff]   ;;  %v9919_v9 = vld [vmem:[#allocation7 + $0x60c] ss:$16 sps:$4 sm:$0xff]  }
 0x15c   :  { %1882 = vmatprep.subr.bf16.mxu0 %v9824_v10  ;;  %2046 = vmatprep.subr.bf16.mxu1 %v9827_v12  ;;  %v9914_v10 = vld [vmem:[#allocation7 + $0x600] ss:$16 sps:$4 sm:$0xff]   ;;  %v8394_v12 = vcombine.low %v11226_v11, %v11226_v11  ;;  %v9931_v11 = vld [vmem:[#allocation7 + $0x64c] ss:$16 sps:$4 sm:$0xff]  }
 0x15d   :  { %1912 = vmatprep.mubr.bf16.mxu0 %v8395_v13  ;;  %2076 = vmatprep.mubr.bf16.mxu1 %v8395_v13  ;;  %v9917_v13 = vld [vmem:[#allocation7 + $0x608] ss:$16 sps:$4 sm:$0xff]  }
 0x15f   :  { %1883 = vmatpush1.bf16.msra.mxu0 %v9822_v14  ;;  %2047 = vmatpush1.bf16.msra.mxu1 %v9825_v15  ;;  %v11232_v14 = vld [vmem:[#allocation2 + $0x18] sm:$0xff] }
 0x160   :  { %1884 = vmatprep.subr.bf16.mxu0 %v9830_v16  ;;  %2048 = vmatprep.subr.bf16.mxu1 %v9833_v17  ;;  %v9922_v15 = vld [vmem:[#allocation7 + $0x624] ss:$16 sps:$4 sm:$0xff]   ;;  %v9925_v16 = vld [vmem:[#allocation7 + $0x62c] ss:$16 sps:$4 sm:$0xff]   ;;  %v8397_v17 = vcombine.high %v11232_v14, %v11232_v14 }
 0x163   :  { %1885 = vmatpush1.bf16.msra.mxu0 %v9828_v18  ;;  %2049 = vmatpush1.bf16.msra.mxu1 %v9831_v19  ;;  %v9920_v18 = vld [vmem:[#allocation7 + $0x620] ss:$16 sps:$4 sm:$0xff]   ;;  %v9923_v19 = vld [vmem:[#allocation7 + $0x628] ss:$16 sps:$4 sm:$0xff]  }
 0x164   :  { %1886 = vmatprep.subr.bf16.mxu0 %v9836_v20  ;;  %2050 = vmatprep.subr.bf16.mxu1 %v9839_v21  ;;  %v9928_v20 = vld [vmem:[#allocation7 + $0x644] ss:$16 sps:$4 sm:$0xff]   ;;  %v9926_v21 = vld [vmem:[#allocation7 + $0x640] ss:$16 sps:$4 sm:$0xff]  }
 0x167   :  { %1887 = vmatpush1.bf16.msra.mxu0 %v9834_v22  ;;  %2051 = vmatpush1.bf16.msra.mxu1 %v9837_v23  ;;  %v9929_v22 = vld [vmem:[#allocation7 + $0x648] ss:$16 sps:$4 sm:$0xff]   ;;  %v9934_v23 = vld [vmem:[#allocation7 + $0x664] ss:$16 sps:$4 sm:$0xff]  }
 0x168   :  { %1888 = vmatprep.subr.bf16.mxu0 %v9842_v24  ;;  %2052 = vmatprep.subr.bf16.mxu1 %v9845_v25  ;;  %v9937_v24 = vld [vmem:[#allocation7 + $0x66c] ss:$16 sps:$4 sm:$0xff]   ;;  %v9932_v25 = vld [vmem:[#allocation7 + $0x660] ss:$16 sps:$4 sm:$0xff]  }
 0x16b   :  { %1889 = vmatpush1.bf16.msra.mxu0 %v9840_v26  ;;  %2053 = vmatpush1.bf16.msra.mxu1 %v9843_v27  ;;  %v9935_v26 = vld [vmem:[#allocation7 + $0x668] ss:$16 sps:$4 sm:$0xff]   ;;  %v9940_v27 = vld [vmem:[#allocation7 + $0x684] ss:$16 sps:$4 sm:$0xff]  }
 0x16c   :  { %1890 = vmatprep.subr.bf16.mxu0 %v9848_v28  ;;  %2054 = vmatprep.subr.bf16.mxu1 %v9851_v29  ;;  %v9943_v28 = vld [vmem:[#allocation7 + $0x68c] ss:$16 sps:$4 sm:$0xff]   ;;  %v9938_v29 = vld [vmem:[#allocation7 + $0x680] ss:$16 sps:$4 sm:$0xff]  }
 0x16f   :  { %1891 = vmatpush1.bf16.msra.mxu0 %v9846_v30  ;;  %2055 = vmatpush1.bf16.msra.mxu1 %v9849_v31  ;;  %v9941_v30 = vld [vmem:[#allocation7 + $0x688] ss:$16 sps:$4 sm:$0xff]   ;;  %v9946_v31 = vld [vmem:[#allocation7 + $0x6a4] ss:$16 sps:$4 sm:$0xff]  }
 0x170   :  { %1892 = vmatprep.subr.bf16.mxu0 %v9854_v32  ;;  %2056 = vmatprep.subr.bf16.mxu1 %v9857_v33  ;;  %v9949_v32 = vld [vmem:[#allocation7 + $0x6ac] ss:$16 sps:$4 sm:$0xff]   ;;  %v9944_v33 = vld [vmem:[#allocation7 + $0x6a0] ss:$16 sps:$4 sm:$0xff]  }
 0x173   :  { %1893 = vmatpush1.bf16.msra.mxu0 %v9852_v34  ;;  %2057 = vmatpush1.bf16.msra.mxu1 %v9855_v35  ;;  %v9947_v34 = vld [vmem:[#allocation7 + $0x6a8] ss:$16 sps:$4 sm:$0xff]   ;;  %v9952_v35 = vld [vmem:[#allocation7 + $0x6c4] ss:$16 sps:$4 sm:$0xff]  }
 0x174   :  { %1894 = vmatprep.subr.bf16.mxu0 %v9860_v36  ;;  %2058 = vmatprep.subr.bf16.mxu1 %v9863_v37  ;;  %v9955_v36 = vld [vmem:[#allocation7 + $0x6cc] ss:$16 sps:$4 sm:$0xff]   ;;  %v9950_v37 = vld [vmem:[#allocation7 + $0x6c0] ss:$16 sps:$4 sm:$0xff]  }
 0x177   :  { %1895 = vmatpush1.bf16.msra.mxu0 %v9858_v38  ;;  %2059 = vmatpush1.bf16.msra.mxu1 %v9861_v39  ;;  %v9953_v38 = vld [vmem:[#allocation7 + $0x6c8] ss:$16 sps:$4 sm:$0xff]   ;;  %v9958_v39 = vld [vmem:[#allocation7 + $0x6e4] ss:$16 sps:$4 sm:$0xff]  }
 0x178   :  { %1896 = vmatprep.subr.bf16.mxu0 %v9866_v40  ;;  %2060 = vmatprep.subr.bf16.mxu1 %v9869_v41  ;;  %v9961_v40 = vld [vmem:[#allocation7 + $0x6ec] ss:$16 sps:$4 sm:$0xff]   ;;  %v9956_v41 = vld [vmem:[#allocation7 + $0x6e0] ss:$16 sps:$4 sm:$0xff]  }
 0x17b   :  { %1897 = vmatpush1.bf16.msra.mxu0 %v9864_v42  ;;  %2061 = vmatpush1.bf16.msra.mxu1 %v9867_v43  ;;  %v9959_v42 = vld [vmem:[#allocation7 + $0x6e8] ss:$16 sps:$4 sm:$0xff]   ;;  %v9964_v43 = vld [vmem:[#allocation7 + $0x704] ss:$16 sps:$4 sm:$0xff]  }
 0x17c   :  { %1898 = vmatprep.subr.bf16.mxu0 %v9872_v44  ;;  %2062 = vmatprep.subr.bf16.mxu1 %v9875_v45  ;;  %v9967_v44 = vld [vmem:[#allocation7 + $0x70c] ss:$16 sps:$4 sm:$0xff]   ;;  %v9962_v45 = vld [vmem:[#allocation7 + $0x700] ss:$16 sps:$4 sm:$0xff]  }
 0x17f   :  { %1899 = vmatpush1.bf16.msra.mxu0 %v9870_v46  ;;  %2063 = vmatpush1.bf16.msra.mxu1 %v9873_v47  ;;  %v9965_v46 = vld [vmem:[#allocation7 + $0x708] ss:$16 sps:$4 sm:$0xff]   ;;  %v9970_v47 = vld [vmem:[#allocation7 + $0x724] ss:$16 sps:$4 sm:$0xff]  }
 0x180   :  { %1900 = vmatprep.subr.bf16.mxu0 %v9878_v48  ;;  %2064 = vmatprep.subr.bf16.mxu1 %v9881_v49  ;;  %v9973_v48 = vld [vmem:[#allocation7 + $0x72c] ss:$16 sps:$4 sm:$0xff]   ;;  %v9968_v49 = vld [vmem:[#allocation7 + $0x720] ss:$16 sps:$4 sm:$0xff]  }
 0x183   :  { %1901 = vmatpush1.bf16.msra.mxu0 %v9876_v50  ;;  %2065 = vmatpush1.bf16.msra.mxu1 %v9879_v51  ;;  %v9971_v50 = vld [vmem:[#allocation7 + $0x728] ss:$16 sps:$4 sm:$0xff]   ;;  %v9976_v51 = vld [vmem:[#allocation7 + $0x744] ss:$16 sps:$4 sm:$0xff]  }
 0x184   :  { %1902 = vmatprep.subr.bf16.mxu0 %v9884_v52  ;;  %2066 = vmatprep.subr.bf16.mxu1 %v9887_v53  ;;  %v9979_v52 = vld [vmem:[#allocation7 + $0x74c] ss:$16 sps:$4 sm:$0xff]   ;;  %v9974_v53 = vld [vmem:[#allocation7 + $0x740] ss:$16 sps:$4 sm:$0xff]  }
 0x187   :  { %1903 = vmatpush1.bf16.msra.mxu0 %v9882_v54  ;;  %2067 = vmatpush1.bf16.msra.mxu1 %v9885_v55  ;;  %v9977_v54 = vld [vmem:[#allocation7 + $0x748] ss:$16 sps:$4 sm:$0xff]   ;;  %v9982_v55 = vld [vmem:[#allocation7 + $0x764] ss:$16 sps:$4 sm:$0xff]  }
 0x188   :  { %1904 = vmatprep.subr.bf16.mxu0 %v9890_v56  ;;  %2068 = vmatprep.subr.bf16.mxu1 %v9893_v57  ;;  %v9985_v56 = vld [vmem:[#allocation7 + $0x76c] ss:$16 sps:$4 sm:$0xff]   ;;  %v9980_v57 = vld [vmem:[#allocation7 + $0x760] ss:$16 sps:$4 sm:$0xff]  }
 0x18b   :  { %1905 = vmatpush1.bf16.msra.mxu0 %v9888_v58  ;;  %2069 = vmatpush1.bf16.msra.mxu1 %v9891_v59  ;;  %v9983_v58 = vld [vmem:[#allocation7 + $0x768] ss:$16 sps:$4 sm:$0xff]   ;;  %v9988_v59 = vld [vmem:[#allocation7 + $0x784] ss:$16 sps:$4 sm:$0xff]  }
 0x18c   :  { %1906 = vmatprep.subr.bf16.mxu0 %v9896_v60  ;;  %2070 = vmatprep.subr.bf16.mxu1 %v9899_v61  ;;  %v9991_v60 = vld [vmem:[#allocation7 + $0x78c] ss:$16 sps:$4 sm:$0xff]   ;;  %v9986_v61 = vld [vmem:[#allocation7 + $0x780] ss:$16 sps:$4 sm:$0xff]  }
 0x18f   :  { %1907 = vmatpush1.bf16.msra.mxu0 %v9894_v62  ;;  %2071 = vmatpush1.bf16.msra.mxu1 %v9897_v63  ;;  %v9989_v62 = vld [vmem:[#allocation7 + $0x788] ss:$16 sps:$4 sm:$0xff]   ;;  %v9994_v63 = vld [vmem:[#allocation7 + $0x7a4] ss:$16 sps:$4 sm:$0xff]  }
 0x190   :  { %1908 = vmatprep.subr.bf16.mxu0 %v9902_v0  ;;  %2072 = vmatprep.subr.bf16.mxu1 %v9905_v1  ;;  %v9997_v0 = vld [vmem:[#allocation7 + $0x7ac] ss:$16 sps:$4 sm:$0xff]   ;;  %v9992_v1 = vld [vmem:[#allocation7 + $0x7a0] ss:$16 sps:$4 sm:$0xff]  }
 0x193   :  { %1909 = vmatpush1.bf16.msra.mxu0 %v9900_v2  ;;  %2073 = vmatpush1.bf16.msra.mxu1 %v9903_v3  ;;  %v9995_v2 = vld [vmem:[#allocation7 + $0x7a8] ss:$16 sps:$4 sm:$0xff]   ;;  %v10000_v3 = vld [vmem:[#allocation7 + $0x7c4] ss:$16 sps:$4 sm:$0xff]  }
 0x194   :  { %1910 = vmatprep.subr.bf16.mxu0 %v9908_v4  ;;  %2074 = vmatprep.subr.bf16.mxu1 %v9911_v5  ;;  %v10003_v4 = vld [vmem:[#allocation7 + $0x7cc] ss:$16 sps:$4 sm:$0xff]   ;;  %v9998_v5 = vld [vmem:[#allocation7 + $0x7c0] ss:$16 sps:$4 sm:$0xff]  }
 0x197   :  { %1911 = vmatpush1.bf16.msra.mxu0 %v9906_v6  ;;  %2075 = vmatpush1.bf16.msra.mxu1 %v9909_v7  ;;  %v10001_v6 = vld [vmem:[#allocation7 + $0x7c8] ss:$16 sps:$4 sm:$0xff]   ;;  %v10006_v7 = vld [vmem:[#allocation7 + $0x7e4] ss:$16 sps:$4 sm:$0xff]  }
 0x198   :  { %1921 = vmatprep.subr.bf16.mxu0 %v9916_v8  ;;  %2085 = vmatprep.subr.bf16.mxu1 %v9919_v9  ;;  %v10009_v8 = vld [vmem:[#allocation7 + $0x7ec] ss:$16 sps:$4 sm:$0xff]   ;;  %v10004_v9 = vld [vmem:[#allocation7 + $0x7e0] ss:$16 sps:$4 sm:$0xff]  }
 0x19a   :  { %1913 = vmatmul.mubr.bf16.vlgmr.msra.gmra.mrb[0].mxu0 %v8394_v12  ;;  %2077 = vmatmul.mubr.bf16.vlgmr.msra.gmra.mrb[0].mxu1 %v8394_v12  ;;  %v10014_v12 = vld [vmem:[#allocation8 + $0x4] ss:$16 sps:$4 sm:$0xff]  }
 0x19b   :  { %1922 = vmatpush1.bf16.msra.mxu0 %v9914_v10  ;;  %2086 = vmatpush1.bf16.msra.mxu1 %v9917_v13  ;;  %v10007_v10 = vld [vmem:[#allocation7 + $0x7e8] ss:$16 sps:$4 sm:$0xff]   ;;  %v10017_v13 = vld [vmem:[#allocation8 + $0xc] ss:$16 sps:$4 sm:$0xff]  }
 0x19c   :  { %1923 = vmatprep.subr.bf16.mxu0 %v9922_v15  ;;  %2087 = vmatprep.subr.bf16.mxu1 %v9925_v16  ;;  %v10012_v15 = vld [vmem:[#allocation8] ss:$16 sps:$4 sm:$0xff]   ;;  %v10015_v16 = vld [vmem:[#allocation8 + $0x8] ss:$16 sps:$4 sm:$0xff]  }
 0x19d   :  { %1953 = vmatprep.mubr.bf16.mxu0 %v8397_v17  ;;  %2117 = vmatprep.mubr.bf16.mxu1 %v8397_v17  ;;  %v8396_v17 = vcombine.low %v11232_v14, %v11232_v14  ;;  %v10035_v14 = vld [vmem:[#allocation8 + $0x6c] ss:$16 sps:$4 sm:$0xff]  }
 0x19f   :  { %1924 = vmatpush1.bf16.msra.mxu0 %v9920_v18  ;;  %2088 = vmatpush1.bf16.msra.mxu1 %v9923_v19  ;;  %v10020_v18 = vld [vmem:[#allocation8 + $0x24] ss:$16 sps:$4 sm:$0xff]   ;;  %v10023_v19 = vld [vmem:[#allocation8 + $0x2c] ss:$16 sps:$4 sm:$0xff]  }
 0x1a0   :  { %1925 = vmatprep.subr.bf16.mxu0 %v9928_v20  ;;  %2089 = vmatprep.subr.bf16.mxu1 %v9931_v11  ;;  %v10018_v20 = vld [vmem:[#allocation8 + $0x20] ss:$16 sps:$4 sm:$0xff]   ;;  %v10021_v11 = vld [vmem:[#allocation8 + $0x28] ss:$16 sps:$4 sm:$0xff]  }
 0x1a3   :  { %1926 = vmatpush1.bf16.msra.mxu0 %v9926_v21  ;;  %2090 = vmatpush1.bf16.msra.mxu1 %v9929_v22  ;;  %v10026_v21 = vld [vmem:[#allocation8 + $0x44] ss:$16 sps:$4 sm:$0xff]   ;;  %v10029_v22 = vld [vmem:[#allocation8 + $0x4c] ss:$16 sps:$4 sm:$0xff]  }
 0x1a4   :  { %1927 = vmatprep.subr.bf16.mxu0 %v9934_v23  ;;  %2091 = vmatprep.subr.bf16.mxu1 %v9937_v24  ;;  %v10024_v23 = vld [vmem:[#allocation8 + $0x40] ss:$16 sps:$4 sm:$0xff]   ;;  %v10027_v24 = vld [vmem:[#allocation8 + $0x48] ss:$16 sps:$4 sm:$0xff]  }
 0x1a7   :  { %1928 = vmatpush1.bf16.msra.mxu0 %v9932_v25  ;;  %2092 = vmatpush1.bf16.msra.mxu1 %v9935_v26  ;;  %v10032_v25 = vld [vmem:[#allocation8 + $0x64] ss:$16 sps:$4 sm:$0xff]   ;;  %v10030_v26 = vld [vmem:[#allocation8 + $0x60] ss:$16 sps:$4 sm:$0xff]  }
 0x1a8   :  { %1929 = vmatprep.subr.bf16.mxu0 %v9940_v27  ;;  %2093 = vmatprep.subr.bf16.mxu1 %v9943_v28  ;;  %v10033_v27 = vld [vmem:[#allocation8 + $0x68] ss:$16 sps:$4 sm:$0xff]   ;;  %v10038_v28 = vld [vmem:[#allocation8 + $0x84] ss:$16 sps:$4 sm:$0xff]  }
 0x1ab   :  { %1930 = vmatpush1.bf16.msra.mxu0 %v9938_v29  ;;  %2094 = vmatpush1.bf16.msra.mxu1 %v9941_v30  ;;  %v10041_v29 = vld [vmem:[#allocation8 + $0x8c] ss:$16 sps:$4 sm:$0xff]   ;;  %v10036_v30 = vld [vmem:[#allocation8 + $0x80] ss:$16 sps:$4 sm:$0xff]  }
 0x1ac   :  { %1931 = vmatprep.subr.bf16.mxu0 %v9946_v31  ;;  %2095 = vmatprep.subr.bf16.mxu1 %v9949_v32  ;;  %v10039_v31 = vld [vmem:[#allocation8 + $0x88] ss:$16 sps:$4 sm:$0xff]   ;;  %v10044_v32 = vld [vmem:[#allocation8 + $0xa4] ss:$16 sps:$4 sm:$0xff]  }
 0x1af   :  { %1932 = vmatpush1.bf16.msra.mxu0 %v9944_v33  ;;  %2096 = vmatpush1.bf16.msra.mxu1 %v9947_v34  ;;  %v10047_v33 = vld [vmem:[#allocation8 + $0xac] ss:$16 sps:$4 sm:$0xff]   ;;  %v10042_v34 = vld [vmem:[#allocation8 + $0xa0] ss:$16 sps:$4 sm:$0xff]  }
 0x1b0   :  { %1933 = vmatprep.subr.bf16.mxu0 %v9952_v35  ;;  %2097 = vmatprep.subr.bf16.mxu1 %v9955_v36  ;;  %v10045_v35 = vld [vmem:[#allocation8 + $0xa8] ss:$16 sps:$4 sm:$0xff]   ;;  %v10050_v36 = vld [vmem:[#allocation8 + $0xc4] ss:$16 sps:$4 sm:$0xff]  }
 0x1b3   :  { %1934 = vmatpush1.bf16.msra.mxu0 %v9950_v37  ;;  %2098 = vmatpush1.bf16.msra.mxu1 %v9953_v38  ;;  %v10053_v37 = vld [vmem:[#allocation8 + $0xcc] ss:$16 sps:$4 sm:$0xff]   ;;  %v10048_v38 = vld [vmem:[#allocation8 + $0xc0] ss:$16 sps:$4 sm:$0xff]  }
 0x1b4   :  { %1935 = vmatprep.subr.bf16.mxu0 %v9958_v39  ;;  %2099 = vmatprep.subr.bf16.mxu1 %v9961_v40  ;;  %v10051_v39 = vld [vmem:[#allocation8 + $0xc8] ss:$16 sps:$4 sm:$0xff]   ;;  %v10056_v40 = vld [vmem:[#allocation8 + $0xe4] ss:$16 sps:$4 sm:$0xff]  }
 0x1b7   :  { %1936 = vmatpush1.bf16.msra.mxu0 %v9956_v41  ;;  %2100 = vmatpush1.bf16.msra.mxu1 %v9959_v42  ;;  %v10059_v41 = vld [vmem:[#allocation8 + $0xec] ss:$16 sps:$4 sm:$0xff]   ;;  %v10054_v42 = vld [vmem:[#allocation8 + $0xe0] ss:$16 sps:$4 sm:$0xff]  }
 0x1b8   :  { %1937 = vmatprep.subr.bf16.mxu0 %v9964_v43  ;;  %2101 = vmatprep.subr.bf16.mxu1 %v9967_v44  ;;  %v10057_v43 = vld [vmem:[#allocation8 + $0xe8] ss:$16 sps:$4 sm:$0xff]   ;;  %v10062_v44 = vld [vmem:[#allocation8 + $0x104] ss:$16 sps:$4 sm:$0xff]  }
 0x1bb   :  { %1938 = vmatpush1.bf16.msra.mxu0 %v9962_v45  ;;  %2102 = vmatpush1.bf16.msra.mxu1 %v9965_v46  ;;  %v10065_v45 = vld [vmem:[#allocation8 + $0x10c] ss:$16 sps:$4 sm:$0xff]   ;;  %v10060_v46 = vld [vmem:[#allocation8 + $0x100] ss:$16 sps:$4 sm:$0xff]  }
 0x1bc   :  { %1939 = vmatprep.subr.bf16.mxu0 %v9970_v47  ;;  %2103 = vmatprep.subr.bf16.mxu1 %v9973_v48  ;;  %v10063_v47 = vld [vmem:[#allocation8 + $0x108] ss:$16 sps:$4 sm:$0xff]   ;;  %v10068_v48 = vld [vmem:[#allocation8 + $0x124] ss:$16 sps:$4 sm:$0xff]  }
 0x1bf   :  { %1940 = vmatpush1.bf16.msra.mxu0 %v9968_v49  ;;  %2104 = vmatpush1.bf16.msra.mxu1 %v9971_v50  ;;  %v10071_v49 = vld [vmem:[#allocation8 + $0x12c] ss:$16 sps:$4 sm:$0xff]   ;;  %v10066_v50 = vld [vmem:[#allocation8 + $0x120] ss:$16 sps:$4 sm:$0xff]  }
 0x1c0   :  { %1941 = vmatprep.subr.bf16.mxu0 %v9976_v51  ;;  %2105 = vmatprep.subr.bf16.mxu1 %v9979_v52  ;;  %v10069_v51 = vld [vmem:[#allocation8 + $0x128] ss:$16 sps:$4 sm:$0xff]   ;;  %v10074_v52 = vld [vmem:[#allocation8 + $0x144] ss:$16 sps:$4 sm:$0xff]  }
 0x1c3   :  { %1942 = vmatpush1.bf16.msra.mxu0 %v9974_v53  ;;  %2106 = vmatpush1.bf16.msra.mxu1 %v9977_v54  ;;  %v10077_v53 = vld [vmem:[#allocation8 + $0x14c] ss:$16 sps:$4 sm:$0xff]   ;;  %v10072_v54 = vld [vmem:[#allocation8 + $0x140] ss:$16 sps:$4 sm:$0xff]  }
 0x1c4   :  { %1943 = vmatprep.subr.bf16.mxu0 %v9982_v55  ;;  %2107 = vmatprep.subr.bf16.mxu1 %v9985_v56  ;;  %v10075_v55 = vld [vmem:[#allocation8 + $0x148] ss:$16 sps:$4 sm:$0xff]   ;;  %v10080_v56 = vld [vmem:[#allocation8 + $0x164] ss:$16 sps:$4 sm:$0xff]  }
 0x1c7   :  { %1944 = vmatpush1.bf16.msra.mxu0 %v9980_v57  ;;  %2108 = vmatpush1.bf16.msra.mxu1 %v9983_v58  ;;  %v10083_v57 = vld [vmem:[#allocation8 + $0x16c] ss:$16 sps:$4 sm:$0xff]   ;;  %v10078_v58 = vld [vmem:[#allocation8 + $0x160] ss:$16 sps:$4 sm:$0xff]  }
 0x1c8   :  { %1945 = vmatprep.subr.bf16.mxu0 %v9988_v59  ;;  %2109 = vmatprep.subr.bf16.mxu1 %v9991_v60  ;;  %v10081_v59 = vld [vmem:[#allocation8 + $0x168] ss:$16 sps:$4 sm:$0xff]   ;;  %v10086_v60 = vld [vmem:[#allocation8 + $0x184] ss:$16 sps:$4 sm:$0xff]  }
 0x1cb   :  { %1946 = vmatpush1.bf16.msra.mxu0 %v9986_v61  ;;  %2110 = vmatpush1.bf16.msra.mxu1 %v9989_v62  ;;  %v10089_v61 = vld [vmem:[#allocation8 + $0x18c] ss:$16 sps:$4 sm:$0xff]   ;;  %v10084_v62 = vld [vmem:[#allocation8 + $0x180] ss:$16 sps:$4 sm:$0xff]  }
 0x1cc   :  { %1947 = vmatprep.subr.bf16.mxu0 %v9994_v63  ;;  %2111 = vmatprep.subr.bf16.mxu1 %v9997_v0  ;;  %v10087_v63 = vld [vmem:[#allocation8 + $0x188] ss:$16 sps:$4 sm:$0xff]   ;;  %v10092_v0 = vld [vmem:[#allocation8 + $0x1a4] ss:$16 sps:$4 sm:$0xff]  }
 0x1cf   :  { %1948 = vmatpush1.bf16.msra.mxu0 %v9992_v1  ;;  %2112 = vmatpush1.bf16.msra.mxu1 %v9995_v2  ;;  %v10095_v1 = vld [vmem:[#allocation8 + $0x1ac] ss:$16 sps:$4 sm:$0xff]   ;;  %v10090_v2 = vld [vmem:[#allocation8 + $0x1a0] ss:$16 sps:$4 sm:$0xff]  }
 0x1d0   :  { %1949 = vmatprep.subr.bf16.mxu0 %v10000_v3  ;;  %2113 = vmatprep.subr.bf16.mxu1 %v10003_v4  ;;  %v10093_v3 = vld [vmem:[#allocation8 + $0x1a8] ss:$16 sps:$4 sm:$0xff]   ;;  %v10098_v4 = vld [vmem:[#allocation8 + $0x1c4] ss:$16 sps:$4 sm:$0xff]  }
 0x1d3   :  { %1950 = vmatpush1.bf16.msra.mxu0 %v9998_v5  ;;  %2114 = vmatpush1.bf16.msra.mxu1 %v10001_v6  ;;  %v10101_v5 = vld [vmem:[#allocation8 + $0x1cc] ss:$16 sps:$4 sm:$0xff]   ;;  %v10096_v6 = vld [vmem:[#allocation8 + $0x1c0] ss:$16 sps:$4 sm:$0xff]  }
 0x1d4   :  { %1951 = vmatprep.subr.bf16.mxu0 %v10006_v7  ;;  %2115 = vmatprep.subr.bf16.mxu1 %v10009_v8  ;;  %v10099_v7 = vld [vmem:[#allocation8 + $0x1c8] ss:$16 sps:$4 sm:$0xff]   ;;  %v10104_v8 = vld [vmem:[#allocation8 + $0x1e4] ss:$16 sps:$4 sm:$0xff]  }
 0x1d7   :  { %1952 = vmatpush1.bf16.msra.mxu0 %v10004_v9  ;;  %2116 = vmatpush1.bf16.msra.mxu1 %v10007_v10  ;;  %v10107_v9 = vld [vmem:[#allocation8 + $0x1ec] ss:$16 sps:$4 sm:$0xff]   ;;  %v10102_v10 = vld [vmem:[#allocation8 + $0x1e0] ss:$16 sps:$4 sm:$0xff]  }
 0x1d8   :  { %2920 = vmatprep.subr.bf16.mxu0 %v10014_v12  ;;  %3002 = vmatprep.subr.bf16.mxu1 %v10017_v13  ;;  %v10105_v12 = vld [vmem:[#allocation8 + $0x1e8] ss:$16 sps:$4 sm:$0xff]   ;;  %v10110_v13 = vld [vmem:[#allocation8 + $0x204] ss:$16 sps:$4 sm:$0xff]  }
 0x1da   :  { %1954 = vmatmul.mubr.bf16.vlgmr.msra.gmra.mrb[0].mxu0 %v8396_v17  ;;  %2118 = vmatmul.mubr.bf16.vlgmr.msra.gmra.mrb[0].mxu1 %v8396_v17 }
 0x1db   :  { %2921 = vmatpush1.bf16.msra.mxu0 %v10012_v15  ;;  %3003 = vmatpush1.bf16.msra.mxu1 %v10015_v16  ;;  %v10113_v15 = vld [vmem:[#allocation8 + $0x20c] ss:$16 sps:$4 sm:$0xff]   ;;  %v470_v16 = vlaneseq }
 0x1dc   :  { %2922 = vmatprep.subr.bf16.mxu0 %v10020_v18  ;;  %3004 = vmatprep.subr.bf16.mxu1 %v10023_v19  ;;  %v11246_v19 = vld [vmem:[%s11461_s12] sm:$0xf] }
 0x1dd   :  { %v11238_v17 = vshrl.u32 %v470_v16, 7  ;;  %v10171_v16 = vld [vmem:[#allocation8 + $0x348] ss:$16 sps:$4 sm:$0xff]  }
 0x1df   :  { %2923 = vmatpush1.bf16.msra.mxu0 %v10018_v20  ;;  %3005 = vmatpush1.bf16.msra.mxu1 %v10021_v11  ;;  %v11241_v18 = vsub.s32 0, %v11238_v17  ;;  %v11249_v20 = vsub.s32 1, %v11238_v17  ;;  %v11252_v11 = vsub.s32 3, %v11238_v17 }
 0x1e0   :  { %2924 = vmatprep.subr.bf16.mxu0 %v10026_v21  ;;  %3006 = vmatprep.subr.bf16.mxu1 %v10029_v22 }
 0x1e1   :  { %v473_v21 = vrot.slane %v11246_v19, %v11241_v18  ;;  %v477_v22 = vrot.slane %v11246_v19, %v11249_v20 }
 0x1e3   :  { %2925 = vmatpush1.bf16.msra.mxu0 %v10024_v23  ;;  %3007 = vmatpush1.bf16.msra.mxu1 %v10027_v24  ;;  %v485_v23 = vrot.slane %v11246_v19, %v11252_v11 }
 0x1e4   :  { %2926 = vmatprep.subr.bf16.mxu0 %v10032_v25  ;;  %3008 = vmatprep.subr.bf16.mxu1 %v10035_v14 }
 0x1e7   :  { %2927 = vmatpush1.bf16.msra.mxu0 %v10030_v26  ;;  %3009 = vmatpush1.bf16.msra.mxu1 %v10033_v27 }
 0x1e8   :  { %2928 = vmatprep.subr.bf16.mxu0 %v10038_v28  ;;  %3010 = vmatprep.subr.bf16.mxu1 %v10041_v29 }
 0x1eb   :  { %2929 = vmatpush1.bf16.msra.mxu0 %v10036_v30  ;;  %3011 = vmatpush1.bf16.msra.mxu1 %v10039_v31 }
 0x1ec   :  { %2930 = vmatprep.subr.bf16.mxu0 %v10044_v32  ;;  %3012 = vmatprep.subr.bf16.mxu1 %v10047_v33 }
 0x1ef   :  { %2931 = vmatpush1.bf16.msra.mxu0 %v10042_v34  ;;  %3013 = vmatpush1.bf16.msra.mxu1 %v10045_v35  ;;  %v10108_v35 = vld [vmem:[#allocation8 + $0x200] ss:$16 sps:$4 sm:$0xff]  }
 0x1f0   :  { %2932 = vmatprep.subr.bf16.mxu0 %v10050_v36  ;;  %3014 = vmatprep.subr.bf16.mxu1 %v10053_v37  ;;  %v10111_v36 = vld [vmem:[#allocation8 + $0x208] ss:$16 sps:$4 sm:$0xff]  }
 0x1f3   :  { %2933 = vmatpush1.bf16.msra.mxu0 %v10048_v38  ;;  %3015 = vmatpush1.bf16.msra.mxu1 %v10051_v39  ;;  %v10116_v38 = vld [vmem:[#allocation8 + $0x224] ss:$16 sps:$4 sm:$0xff]   ;;  %v10119_v39 = vld [vmem:[#allocation8 + $0x22c] ss:$16 sps:$4 sm:$0xff]  }
 0x1f4   :  { %2934 = vmatprep.subr.bf16.mxu0 %v10056_v40  ;;  %3016 = vmatprep.subr.bf16.mxu1 %v10059_v41  ;;  %v10114_v41 = vld [vmem:[#allocation8 + $0x220] ss:$16 sps:$4 sm:$0xff]  }
 0x1f7   :  { %2935 = vmatpush1.bf16.msra.mxu0 %v10054_v42  ;;  %3017 = vmatpush1.bf16.msra.mxu1 %v10057_v43  ;;  %v10117_v42 = vld [vmem:[#allocation8 + $0x228] ss:$16 sps:$4 sm:$0xff]   ;;  %v10122_v43 = vld [vmem:[#allocation8 + $0x244] ss:$16 sps:$4 sm:$0xff]  }
 0x1f8   :  { %2936 = vmatprep.subr.bf16.mxu0 %v10062_v44  ;;  %3018 = vmatprep.subr.bf16.mxu1 %v10065_v45  ;;  %v10125_v44 = vld [vmem:[#allocation8 + $0x24c] ss:$16 sps:$4 sm:$0xff]   ;;  %v10120_v45 = vld [vmem:[#allocation8 + $0x240] ss:$16 sps:$4 sm:$0xff]  }
 0x1fb   :  { %2937 = vmatpush1.bf16.msra.mxu0 %v10060_v46  ;;  %3019 = vmatpush1.bf16.msra.mxu1 %v10063_v47  ;;  %v10123_v46 = vld [vmem:[#allocation8 + $0x248] ss:$16 sps:$4 sm:$0xff]   ;;  %v10128_v47 = vld [vmem:[#allocation8 + $0x264] ss:$16 sps:$4 sm:$0xff]  }
 0x1fc   :  { %2938 = vmatprep.subr.bf16.mxu0 %v10068_v48  ;;  %3020 = vmatprep.subr.bf16.mxu1 %v10071_v49  ;;  %v10131_v48 = vld [vmem:[#allocation8 + $0x26c] ss:$16 sps:$4 sm:$0xff]   ;;  %v10126_v49 = vld [vmem:[#allocation8 + $0x260] ss:$16 sps:$4 sm:$0xff]  }
 0x1ff   :  { %2939 = vmatpush1.bf16.msra.mxu0 %v10066_v50  ;;  %3021 = vmatpush1.bf16.msra.mxu1 %v10069_v51  ;;  %v10129_v50 = vld [vmem:[#allocation8 + $0x268] ss:$16 sps:$4 sm:$0xff]   ;;  %v10134_v51 = vld [vmem:[#allocation8 + $0x284] ss:$16 sps:$4 sm:$0xff]  }
 0x200   :  { %2940 = vmatprep.subr.bf16.mxu0 %v10074_v52  ;;  %3022 = vmatprep.subr.bf16.mxu1 %v10077_v53  ;;  %v10137_v52 = vld [vmem:[#allocation8 + $0x28c] ss:$16 sps:$4 sm:$0xff]   ;;  %v10132_v53 = vld [vmem:[#allocation8 + $0x280] ss:$16 sps:$4 sm:$0xff]  }
 0x203   :  { %2941 = vmatpush1.bf16.msra.mxu0 %v10072_v54  ;;  %3023 = vmatpush1.bf16.msra.mxu1 %v10075_v55  ;;  %v10135_v54 = vld [vmem:[#allocation8 + $0x288] ss:$16 sps:$4 sm:$0xff]   ;;  %v10140_v55 = vld [vmem:[#allocation8 + $0x2a4] ss:$16 sps:$4 sm:$0xff]  }
 0x204   :  { %2942 = vmatprep.subr.bf16.mxu0 %v10080_v56  ;;  %3024 = vmatprep.subr.bf16.mxu1 %v10083_v57  ;;  %v10143_v56 = vld [vmem:[#allocation8 + $0x2ac] ss:$16 sps:$4 sm:$0xff]   ;;  %v10138_v57 = vld [vmem:[#allocation8 + $0x2a0] ss:$16 sps:$4 sm:$0xff]  }
 0x207   :  { %2943 = vmatpush1.bf16.msra.mxu0 %v10078_v58  ;;  %3025 = vmatpush1.bf16.msra.mxu1 %v10081_v59  ;;  %v10141_v58 = vld [vmem:[#allocation8 + $0x2a8] ss:$16 sps:$4 sm:$0xff]   ;;  %v10146_v59 = vld [vmem:[#allocation8 + $0x2c4] ss:$16 sps:$4 sm:$0xff]  }
 0x208   :  { %2944 = vmatprep.subr.bf16.mxu0 %v10086_v60  ;;  %3026 = vmatprep.subr.bf16.mxu1 %v10089_v61  ;;  %v10149_v60 = vld [vmem:[#allocation8 + $0x2cc] ss:$16 sps:$4 sm:$0xff]   ;;  %v10144_v61 = vld [vmem:[#allocation8 + $0x2c0] ss:$16 sps:$4 sm:$0xff]  }
 0x20b   :  { %2945 = vmatpush1.bf16.msra.mxu0 %v10084_v62  ;;  %3027 = vmatpush1.bf16.msra.mxu1 %v10087_v63  ;;  %v10147_v62 = vld [vmem:[#allocation8 + $0x2c8] ss:$16 sps:$4 sm:$0xff]   ;;  %v10152_v63 = vld [vmem:[#allocation8 + $0x2e4] ss:$16 sps:$4 sm:$0xff]  }
 0x20c   :  { %2946 = vmatprep.subr.bf16.mxu0 %v10092_v0  ;;  %3028 = vmatprep.subr.bf16.mxu1 %v10095_v1  ;;  %v10155_v0 = vld [vmem:[#allocation8 + $0x2ec] ss:$16 sps:$4 sm:$0xff]   ;;  %v10150_v1 = vld [vmem:[#allocation8 + $0x2e0] ss:$16 sps:$4 sm:$0xff]  }
 0x20f   :  { %2947 = vmatpush1.bf16.msra.mxu0 %v10090_v2  ;;  %3029 = vmatpush1.bf16.msra.mxu1 %v10093_v3  ;;  %v10153_v2 = vld [vmem:[#allocation8 + $0x2e8] ss:$16 sps:$4 sm:$0xff]   ;;  %v10158_v3 = vld [vmem:[#allocation8 + $0x304] ss:$16 sps:$4 sm:$0xff]  }
 0x210   :  { %2948 = vmatprep.subr.bf16.mxu0 %v10098_v4  ;;  %3030 = vmatprep.subr.bf16.mxu1 %v10101_v5  ;;  %v10161_v4 = vld [vmem:[#allocation8 + $0x30c] ss:$16 sps:$4 sm:$0xff]   ;;  %v10156_v5 = vld [vmem:[#allocation8 + $0x300] ss:$16 sps:$4 sm:$0xff]  }
 0x213   :  { %2949 = vmatpush1.bf16.msra.mxu0 %v10096_v6  ;;  %3031 = vmatpush1.bf16.msra.mxu1 %v10099_v7  ;;  %v10159_v6 = vld [vmem:[#allocation8 + $0x308] ss:$16 sps:$4 sm:$0xff]   ;;  %v10164_v7 = vld [vmem:[#allocation8 + $0x324] ss:$16 sps:$4 sm:$0xff]  }
 0x214   :  { %2950 = vmatprep.subr.bf16.mxu0 %v10104_v8  ;;  %3032 = vmatprep.subr.bf16.mxu1 %v10107_v9  ;;  %v10167_v8 = vld [vmem:[#allocation8 + $0x32c] ss:$16 sps:$4 sm:$0xff]   ;;  %v10162_v9 = vld [vmem:[#allocation8 + $0x320] ss:$16 sps:$4 sm:$0xff]  }
 0x217   :  { %2951 = vmatpush1.bf16.msra.mxu0 %v10102_v10  ;;  %3033 = vmatpush1.bf16.msra.mxu1 %v10105_v12  ;;  %v10165_v10 = vld [vmem:[#allocation8 + $0x328] ss:$16 sps:$4 sm:$0xff]   ;;  %v10170_v12 = vld [vmem:[#allocation8 + $0x344] ss:$16 sps:$4 sm:$0xff]  }
 0x218   :  { %2961 = vmatprep.subr.bf16.mxu0 %v10110_v13  ;;  %3043 = vmatprep.subr.bf16.mxu1 %v10113_v15  ;;  %v10173_v13 = vld [vmem:[#allocation8 + $0x34c] ss:$16 sps:$4 sm:$0xff]   ;;  %v10168_v15 = vld [vmem:[#allocation8 + $0x340] ss:$16 sps:$4 sm:$0xff]  }
 0x2ad   :  { %v1955_v24 = vpop.f32.mrb[0].mxu0  ;;  %v11260_v25 = vpop.f32.mrb[0].mxu1 }
 0x2ae   :  { %v9546_v14 = vadd.f32 %v1955_v24, %v473_v21  ;;  %v1957_v26 = vpop.f32.mrb[1].mxu0  ;;  %v2121_v27 = vpop.f32.mrb[1].mxu1  ;;  %v10176_v21 = vld [vmem:[#allocation8 + $0x364] ss:$16 sps:$4 sm:$0xff]   ;;  %v10177_v24 = vld [vmem:[#allocation8 + $0x368] ss:$16 sps:$4 sm:$0xff]  }
 0x2af   :  { %v9547_v28 = vadd.f32 %v1957_v26, %v477_v22  ;;  %v1959_v29 = vpop.f32.mrb[2].mxu0  ;;  %v2123_v30 = vpop.f32.mrb[2].mxu1  ;;  %v9549_v31 = vadd.f32 %v2121_v27, %v485_v23  ;;  %v10179_v22 = vld [vmem:[#allocation8 + $0x36c] ss:$16 sps:$4 sm:$0xff]   ;;  %v10174_v23 = vld [vmem:[#allocation8 + $0x360] ss:$16 sps:$4 sm:$0xff]  }
 0x2b0   :  { %v1960_v32 = vpop.f32.mrb[3].mxu0  ;;  %v2124_v33 = vpop.f32.mrb[3].mxu1  ;;  %v2126_v37 = vpack.c.bf16 %v9546_v14, %v9546_v14  ;;  %v10182_v14 = vld [vmem:[#allocation8 + $0x384] ss:$16 sps:$4 sm:$0xff]   ;;  %v10185_v26 = vld [vmem:[#allocation8 + $0x38c] ss:$16 sps:$4 sm:$0xff]  }
 0x2b1   :  { %v2127_v34 = vpack.c.bf16 %v9547_v28, %v9547_v28  ;;  %v2129_v40 = vpack.c.bf16 %v9549_v31, %v9549_v31  ;;  %v10180_v27 = vld [vmem:[#allocation8 + $0x380] ss:$16 sps:$4 sm:$0xff]   ;;  %v10183_v28 = vld [vmem:[#allocation8 + $0x388] ss:$16 sps:$4 sm:$0xff]   ;;  %v10188_v29 = vld [vmem:[#allocation8 + $0x3a4] ss:$16 sps:$4 sm:$0xff]  }
 0x2b2   :  { %v10191_v30 = vld [vmem:[#allocation8 + $0x3ac] ss:$16 sps:$4 sm:$0xff]   ;;  %v10186_v31 = vld [vmem:[#allocation8 + $0x3a0] ss:$16 sps:$4 sm:$0xff]   ;;  %v10189_v32 = vld [vmem:[#allocation8 + $0x3a8] ss:$16 sps:$4 sm:$0xff]  }
 0x2b3   :  { %2952 = vmatprep.mubr.bf16.mxu0 %v2127_v34  ;;  %3034 = vmatprep.mubr.bf16.mxu1 %v2127_v34  ;;  %v11263_v33 = vsub.s32 2, %v11238_v17  ;;  %v10194_v34 = vld [vmem:[#allocation8 + $0x3c4] ss:$16 sps:$4 sm:$0xff]  }
 0x2b4   :  { %2953 = vmatmul.mubr.bf16.vlgmr.msra.gmra.mrb[4].mxu0 %v2126_v37  ;;  %3035 = vmatmul.mubr.bf16.vlgmr.msra.gmra.mrb[4].mxu1 %v2126_v37  ;;  %v10195_v37 = vld [vmem:[#allocation8 + $0x3c8] ss:$16 sps:$4 sm:$0xff]  }
 0x2b5   :  { %2962 = vmatpush1.bf16.msra.mxu0 %v10108_v35  ;;  %3044 = vmatpush1.bf16.msra.mxu1 %v10111_v36  ;;  %v10197_v35 = vld [vmem:[#allocation8 + $0x3cc] ss:$16 sps:$4 sm:$0xff]   ;;  %v10192_v36 = vld [vmem:[#allocation8 + $0x3c0] ss:$16 sps:$4 sm:$0xff]  }
 0x2b6   :  { %2993 = vmatprep.mubr.bf16.mxu0 %v2129_v40  ;;  %3075 = vmatprep.mubr.bf16.mxu1 %v2129_v40  ;;  %v10203_v40 = vld [vmem:[#allocation8 + $0x3ec] ss:$16 sps:$4 sm:$0xff]  }
 0x2b7   :  { %2963 = vmatprep.subr.bf16.mxu0 %v10116_v38  ;;  %3045 = vmatprep.subr.bf16.mxu1 %v10119_v39  ;;  %v481_v38 = vrot.slane %v11246_v19, %v11263_v33  ;;  %v10200_v39 = vld [vmem:[#allocation8 + $0x3e4] ss:$16 sps:$4 sm:$0xff]  }
 0x2b8   :  { %v10212_v19 = vld [vmem:[#allocation10 + $0x24] ss:$16 sps:$4 sm:$0xff]  }
 0x2b9   :  { %2964 = vmatpush1.bf16.msra.mxu0 %v10114_v41  ;;  %3046 = vmatpush1.bf16.msra.mxu1 %v10117_v42  ;;  %v10198_v41 = vld [vmem:[#allocation8 + $0x3e0] ss:$16 sps:$4 sm:$0xff]   ;;  %v10201_v42 = vld [vmem:[#allocation8 + $0x3e8] ss:$16 sps:$4 sm:$0xff]  }
 0x2ba   :  { %2965 = vmatprep.subr.bf16.mxu0 %v10122_v43  ;;  %3047 = vmatprep.subr.bf16.mxu1 %v10125_v44  ;;  %v9548_v43 = vadd.f32 %v11260_v25, %v481_v38  ;;  %v10206_v44 = vld [vmem:[#allocation10 + $0x4] ss:$16 sps:$4 sm:$0xff]  }
 0x2bb   :  { %v10218_v25 = vld [vmem:[#allocation10 + $0x44] ss:$16 sps:$4 sm:$0xff]  }
 0x2bc   :  { %v10284_v38 = vld [vmem:[#allocation10 + $0x1a4] ss:$16 sps:$4 sm:$0xff]  }
 0x2bd   :  { %2966 = vmatpush1.bf16.msra.mxu0 %v10120_v45  ;;  %3048 = vmatpush1.bf16.msra.mxu1 %v10123_v46  ;;  %v10209_v45 = vld [vmem:[#allocation10 + $0xc] ss:$16 sps:$4 sm:$0xff]   ;;  %v10204_v46 = vld [vmem:[#allocation10] ss:$16 sps:$4 sm:$0xff]  }
 0x2be   :  { %2967 = vmatprep.subr.bf16.mxu0 %v10128_v47  ;;  %3049 = vmatprep.subr.bf16.mxu1 %v10131_v48  ;;  %v10207_v47 = vld [vmem:[#allocation10 + $0x8] ss:$16 sps:$4 sm:$0xff]   ;;  %v2128_v48 = vpack.c.bf16 %v9548_v43, %v9548_v43  ;;  %v10293_v43 = vld [vmem:[#allocation10 + $0x1cc] ss:$16 sps:$4 sm:$0xff]  }
 0x2c1   :  { %2968 = vmatpush1.bf16.msra.mxu0 %v10126_v49  ;;  %3050 = vmatpush1.bf16.msra.mxu1 %v10129_v50  ;;  %v10215_v49 = vld [vmem:[#allocation10 + $0x2c] ss:$16 sps:$4 sm:$0xff]   ;;  %v10210_v50 = vld [vmem:[#allocation10 + $0x20] ss:$16 sps:$4 sm:$0xff]  }
 0x2c2   :  { %2969 = vmatprep.subr.bf16.mxu0 %v10134_v51  ;;  %3051 = vmatprep.subr.bf16.mxu1 %v10137_v52  ;;  %v10213_v51 = vld [vmem:[#allocation10 + $0x28] ss:$16 sps:$4 sm:$0xff]   ;;  %v10221_v52 = vld [vmem:[#allocation10 + $0x4c] ss:$16 sps:$4 sm:$0xff]  }
 0x2c5   :  { %2970 = vmatpush1.bf16.msra.mxu0 %v10132_v53  ;;  %3052 = vmatpush1.bf16.msra.mxu1 %v10135_v54  ;;  %v10216_v53 = vld [vmem:[#allocation10 + $0x40] ss:$16 sps:$4 sm:$0xff]   ;;  %v10219_v54 = vld [vmem:[#allocation10 + $0x48] ss:$16 sps:$4 sm:$0xff]  }
 0x2c6   :  { %2971 = vmatprep.subr.bf16.mxu0 %v10140_v55  ;;  %3053 = vmatprep.subr.bf16.mxu1 %v10143_v56  ;;  %v10224_v55 = vld [vmem:[#allocation10 + $0x64] ss:$16 sps:$4 sm:$0xff]   ;;  %v10227_v56 = vld [vmem:[#allocation10 + $0x6c] ss:$16 sps:$4 sm:$0xff]  }
 0x2c9   :  { %2972 = vmatpush1.bf16.msra.mxu0 %v10138_v57  ;;  %3054 = vmatpush1.bf16.msra.mxu1 %v10141_v58  ;;  %v10222_v57 = vld [vmem:[#allocation10 + $0x60] ss:$16 sps:$4 sm:$0xff]   ;;  %v10225_v58 = vld [vmem:[#allocation10 + $0x68] ss:$16 sps:$4 sm:$0xff]  }
 0x2ca   :  { %2973 = vmatprep.subr.bf16.mxu0 %v10146_v59  ;;  %3055 = vmatprep.subr.bf16.mxu1 %v10149_v60  ;;  %v10230_v59 = vld [vmem:[#allocation10 + $0x84] ss:$16 sps:$4 sm:$0xff]   ;;  %v10233_v60 = vld [vmem:[#allocation10 + $0x8c] ss:$16 sps:$4 sm:$0xff]  }
 0x2cd   :  { %2974 = vmatpush1.bf16.msra.mxu0 %v10144_v61  ;;  %3056 = vmatpush1.bf16.msra.mxu1 %v10147_v62  ;;  %v10228_v61 = vld [vmem:[#allocation10 + $0x80] ss:$16 sps:$4 sm:$0xff]   ;;  %v10231_v62 = vld [vmem:[#allocation10 + $0x88] ss:$16 sps:$4 sm:$0xff]  }
 0x2ce   :  { %2975 = vmatprep.subr.bf16.mxu0 %v10152_v63  ;;  %3057 = vmatprep.subr.bf16.mxu1 %v10155_v0  ;;  %v10236_v63 = vld [vmem:[#allocation10 + $0xa4] ss:$16 sps:$4 sm:$0xff]   ;;  %v10239_v0 = vld [vmem:[#allocation10 + $0xac] ss:$16 sps:$4 sm:$0xff]  }
 0x2d1   :  { %2976 = vmatpush1.bf16.msra.mxu0 %v10150_v1  ;;  %3058 = vmatpush1.bf16.msra.mxu1 %v10153_v2  ;;  %v10234_v1 = vld [vmem:[#allocation10 + $0xa0] ss:$16 sps:$4 sm:$0xff]   ;;  %v10237_v2 = vld [vmem:[#allocation10 + $0xa8] ss:$16 sps:$4 sm:$0xff]  }
 0x2d2   :  { %2977 = vmatprep.subr.bf16.mxu0 %v10158_v3  ;;  %3059 = vmatprep.subr.bf16.mxu1 %v10161_v4  ;;  %v10242_v3 = vld [vmem:[#allocation10 + $0xc4] ss:$16 sps:$4 sm:$0xff]   ;;  %v10245_v4 = vld [vmem:[#allocation10 + $0xcc] ss:$16 sps:$4 sm:$0xff]  }
 0x2d5   :  { %2978 = vmatpush1.bf16.msra.mxu0 %v10156_v5  ;;  %3060 = vmatpush1.bf16.msra.mxu1 %v10159_v6  ;;  %v10240_v5 = vld [vmem:[#allocation10 + $0xc0] ss:$16 sps:$4 sm:$0xff]   ;;  %v10243_v6 = vld [vmem:[#allocation10 + $0xc8] ss:$16 sps:$4 sm:$0xff]  }
 0x2d6   :  { %2979 = vmatprep.subr.bf16.mxu0 %v10164_v7  ;;  %3061 = vmatprep.subr.bf16.mxu1 %v10167_v8  ;;  %v10248_v7 = vld [vmem:[#allocation10 + $0xe4] ss:$16 sps:$4 sm:$0xff]   ;;  %v10251_v8 = vld [vmem:[#allocation10 + $0xec] ss:$16 sps:$4 sm:$0xff]  }
 0x2d9   :  { %2980 = vmatpush1.bf16.msra.mxu0 %v10162_v9  ;;  %3062 = vmatpush1.bf16.msra.mxu1 %v10165_v10  ;;  %v10246_v9 = vld [vmem:[#allocation10 + $0xe0] ss:$16 sps:$4 sm:$0xff]   ;;  %v10249_v10 = vld [vmem:[#allocation10 + $0xe8] ss:$16 sps:$4 sm:$0xff]  }
 0x2da   :  { %2981 = vmatprep.subr.bf16.mxu0 %v10170_v12  ;;  %3063 = vmatprep.subr.bf16.mxu1 %v10173_v13  ;;  %v10254_v12 = vld [vmem:[#allocation10 + $0x104] ss:$16 sps:$4 sm:$0xff]   ;;  %v10257_v13 = vld [vmem:[#allocation10 + $0x10c] ss:$16 sps:$4 sm:$0xff]  }
 0x2dd   :  { %2982 = vmatpush1.bf16.msra.mxu0 %v10168_v15  ;;  %3064 = vmatpush1.bf16.msra.mxu1 %v10171_v16  ;;  %v10252_v15 = vld [vmem:[#allocation10 + $0x100] ss:$16 sps:$4 sm:$0xff]   ;;  %v10255_v16 = vld [vmem:[#allocation10 + $0x108] ss:$16 sps:$4 sm:$0xff]  }
 0x2de   :  { %2983 = vmatprep.subr.bf16.mxu0 %v10176_v21  ;;  %3065 = vmatprep.subr.bf16.mxu1 %v10179_v22  ;;  %v10260_v21 = vld [vmem:[#allocation10 + $0x124] ss:$16 sps:$4 sm:$0xff]   ;;  %v10263_v22 = vld [vmem:[#allocation10 + $0x12c] ss:$16 sps:$4 sm:$0xff]  }
 0x2e1   :  { %2984 = vmatpush1.bf16.msra.mxu0 %v10174_v23  ;;  %3066 = vmatpush1.bf16.msra.mxu1 %v10177_v24  ;;  %v10258_v23 = vld [vmem:[#allocation10 + $0x120] ss:$16 sps:$4 sm:$0xff]   ;;  %v10261_v24 = vld [vmem:[#allocation10 + $0x128] ss:$16 sps:$4 sm:$0xff]  }
 0x2e2   :  { %2985 = vmatprep.subr.bf16.mxu0 %v10182_v14  ;;  %3067 = vmatprep.subr.bf16.mxu1 %v10185_v26  ;;  %v10266_v14 = vld [vmem:[#allocation10 + $0x144] ss:$16 sps:$4 sm:$0xff]   ;;  %v10269_v26 = vld [vmem:[#allocation10 + $0x14c] ss:$16 sps:$4 sm:$0xff]  }
 0x2e5   :  { %2986 = vmatpush1.bf16.msra.mxu0 %v10180_v27  ;;  %3068 = vmatpush1.bf16.msra.mxu1 %v10183_v28  ;;  %v10264_v27 = vld [vmem:[#allocation10 + $0x140] ss:$16 sps:$4 sm:$0xff]   ;;  %v10267_v28 = vld [vmem:[#allocation10 + $0x148] ss:$16 sps:$4 sm:$0xff]  }
 0x2e6   :  { %2987 = vmatprep.subr.bf16.mxu0 %v10188_v29  ;;  %3069 = vmatprep.subr.bf16.mxu1 %v10191_v30  ;;  %v10272_v29 = vld [vmem:[#allocation10 + $0x164] ss:$16 sps:$4 sm:$0xff]   ;;  %v10275_v30 = vld [vmem:[#allocation10 + $0x16c] ss:$16 sps:$4 sm:$0xff]  }
 0x2e9   :  { %2988 = vmatpush1.bf16.msra.mxu0 %v10186_v31  ;;  %3070 = vmatpush1.bf16.msra.mxu1 %v10189_v32  ;;  %v10270_v31 = vld [vmem:[#allocation10 + $0x160] ss:$16 sps:$4 sm:$0xff]   ;;  %v10273_v32 = vld [vmem:[#allocation10 + $0x168] ss:$16 sps:$4 sm:$0xff]  }
 0x2ea   :  { %2989 = vmatprep.subr.bf16.mxu0 %v10194_v34  ;;  %3071 = vmatprep.subr.bf16.mxu1 %v10197_v35  ;;  %v10278_v34 = vld [vmem:[#allocation10 + $0x184] ss:$16 sps:$4 sm:$0xff]   ;;  %v10281_v35 = vld [vmem:[#allocation10 + $0x18c] ss:$16 sps:$4 sm:$0xff]  }
 0x2ed   :  { %2990 = vmatpush1.bf16.msra.mxu0 %v10192_v36  ;;  %3072 = vmatpush1.bf16.msra.mxu1 %v10195_v37  ;;  %v10276_v36 = vld [vmem:[#allocation10 + $0x180] ss:$16 sps:$4 sm:$0xff]   ;;  %v10279_v37 = vld [vmem:[#allocation10 + $0x188] ss:$16 sps:$4 sm:$0xff]  }
 0x2ee   :  { %2991 = vmatprep.subr.bf16.mxu0 %v10200_v39  ;;  %3073 = vmatprep.subr.bf16.mxu1 %v10203_v40  ;;  %v10287_v39 = vld [vmem:[#allocation10 + $0x1ac] ss:$16 sps:$4 sm:$0xff]   ;;  %v10282_v40 = vld [vmem:[#allocation10 + $0x1a0] ss:$16 sps:$4 sm:$0xff]  }
 0x2f1   :  { %2992 = vmatpush1.bf16.msra.mxu0 %v10198_v41  ;;  %3074 = vmatpush1.bf16.msra.mxu1 %v10201_v42  ;;  %v10285_v41 = vld [vmem:[#allocation10 + $0x1a8] ss:$16 sps:$4 sm:$0xff]   ;;  %v10290_v42 = vld [vmem:[#allocation10 + $0x1c4] ss:$16 sps:$4 sm:$0xff]  }
 0x2f2   :  { %3878 = vmatprep.subr.bf16.mxu0 %v10206_v44  ;;  %3960 = vmatprep.subr.bf16.mxu1 %v10209_v45  ;;  %v10288_v44 = vld [vmem:[#allocation10 + $0x1c0] ss:$16 sps:$4 sm:$0xff]   ;;  %v10291_v45 = vld [vmem:[#allocation10 + $0x1c8] ss:$16 sps:$4 sm:$0xff]  }
 0x2f4   :  { %2994 = vmatmul.mubr.bf16.vlgmr.msra.gmra.mrb[4].mxu0 %v2128_v48  ;;  %3076 = vmatmul.mubr.bf16.vlgmr.msra.gmra.mrb[4].mxu1 %v2128_v48  ;;  %v10294_v48 = vld [vmem:[#allocation10 + $0x1e0] ss:$16 sps:$4 sm:$0xff]  }
 0x2f5   :  { %3879 = vmatpush1.bf16.msra.mxu0 %v10204_v46  ;;  %3961 = vmatpush1.bf16.msra.mxu1 %v10207_v47  ;;  %v10296_v46 = vld [vmem:[#allocation10 + $0x1e4] ss:$16 sps:$4 sm:$0xff]   ;;  %v10299_v47 = vld [vmem:[#allocation10 + $0x1ec] ss:$16 sps:$4 sm:$0xff]  }
 0x2f6   :  { %3880 = vmatprep.subr.bf16.mxu0 %v10212_v19  ;;  %3962 = vmatprep.subr.bf16.mxu1 %v10215_v49  ;;  %v10297_v19 = vld [vmem:[#allocation10 + $0x1e8] ss:$16 sps:$4 sm:$0xff]   ;;  %v10302_v49 = vld [vmem:[#allocation10 + $0x204] ss:$16 sps:$4 sm:$0xff]  }
 0x2f9   :  { %3881 = vmatpush1.bf16.msra.mxu0 %v10210_v50  ;;  %3963 = vmatpush1.bf16.msra.mxu1 %v10213_v51  ;;  %v10305_v50 = vld [vmem:[#allocation10 + $0x20c] ss:$16 sps:$4 sm:$0xff]  }
 0x2fa   :  { %3882 = vmatprep.subr.bf16.mxu0 %v10218_v25  ;;  %3964 = vmatprep.subr.bf16.mxu1 %v10221_v52  ;;  %v11271_v51 = vld [vmem:[%s11461_s12 + $0x4] sm:$0xf] }
 0x2fb   :  { %v2263_v25 = vrot.slane %v11271_v51, %v11241_v18  ;;  %v2267_v52 = vrot.slane %v11271_v51, %v11249_v20 }
 0x2fd   :  { %3883 = vmatpush1.bf16.msra.mxu0 %v10216_v53  ;;  %3965 = vmatpush1.bf16.msra.mxu1 %v10219_v54  ;;  %v2275_v53 = vrot.slane %v11271_v51, %v11252_v11 }
 0x2fe   :  { %3884 = vmatprep.subr.bf16.mxu0 %v10224_v55  ;;  %3966 = vmatprep.subr.bf16.mxu1 %v10227_v56 }
 0x301   :  { %3885 = vmatpush1.bf16.msra.mxu0 %v10222_v57  ;;  %3967 = vmatpush1.bf16.msra.mxu1 %v10225_v58 }
 0x302   :  { %3886 = vmatprep.subr.bf16.mxu0 %v10230_v59  ;;  %3968 = vmatprep.subr.bf16.mxu1 %v10233_v60 }
 0x305   :  { %3887 = vmatpush1.bf16.msra.mxu0 %v10228_v61  ;;  %3969 = vmatpush1.bf16.msra.mxu1 %v10231_v62 }
 0x306   :  { %3888 = vmatprep.subr.bf16.mxu0 %v10236_v63  ;;  %3970 = vmatprep.subr.bf16.mxu1 %v10239_v0 }
 0x309   :  { %3889 = vmatpush1.bf16.msra.mxu0 %v10234_v1  ;;  %3971 = vmatpush1.bf16.msra.mxu1 %v10237_v2  ;;  %v10300_v2 = vld [vmem:[#allocation10 + $0x200] ss:$16 sps:$4 sm:$0xff]  }
 0x30a   :  { %3890 = vmatprep.subr.bf16.mxu0 %v10242_v3  ;;  %3972 = vmatprep.subr.bf16.mxu1 %v10245_v4  ;;  %v10303_v3 = vld [vmem:[#allocation10 + $0x208] ss:$16 sps:$4 sm:$0xff]  }
 0x30d   :  { %3891 = vmatpush1.bf16.msra.mxu0 %v10240_v5  ;;  %3973 = vmatpush1.bf16.msra.mxu1 %v10243_v6  ;;  %v10308_v5 = vld [vmem:[#allocation10 + $0x224] ss:$16 sps:$4 sm:$0xff]   ;;  %v10311_v6 = vld [vmem:[#allocation10 + $0x22c] ss:$16 sps:$4 sm:$0xff]  }
 0x30e   :  { %3892 = vmatprep.subr.bf16.mxu0 %v10248_v7  ;;  %3974 = vmatprep.subr.bf16.mxu1 %v10251_v8  ;;  %v10306_v8 = vld [vmem:[#allocation10 + $0x220] ss:$16 sps:$4 sm:$0xff]  }
 0x311   :  { %3893 = vmatpush1.bf16.msra.mxu0 %v10246_v9  ;;  %3975 = vmatpush1.bf16.msra.mxu1 %v10249_v10  ;;  %v10309_v9 = vld [vmem:[#allocation10 + $0x228] ss:$16 sps:$4 sm:$0xff]   ;;  %v10314_v10 = vld [vmem:[#allocation10 + $0x244] ss:$16 sps:$4 sm:$0xff]  }
 0x312   :  { %3894 = vmatprep.subr.bf16.mxu0 %v10254_v12  ;;  %3976 = vmatprep.subr.bf16.mxu1 %v10257_v13  ;;  %v10317_v12 = vld [vmem:[#allocation10 + $0x24c] ss:$16 sps:$4 sm:$0xff]   ;;  %v10312_v13 = vld [vmem:[#allocation10 + $0x240] ss:$16 sps:$4 sm:$0xff]  }
 0x315   :  { %3895 = vmatpush1.bf16.msra.mxu0 %v10252_v15  ;;  %3977 = vmatpush1.bf16.msra.mxu1 %v10255_v16  ;;  %v10315_v15 = vld [vmem:[#allocation10 + $0x248] ss:$16 sps:$4 sm:$0xff]   ;;  %v10320_v16 = vld [vmem:[#allocation10 + $0x264] ss:$16 sps:$4 sm:$0xff]  }
 0x316   :  { %3896 = vmatprep.subr.bf16.mxu0 %v10260_v21  ;;  %3978 = vmatprep.subr.bf16.mxu1 %v10263_v22  ;;  %v10323_v21 = vld [vmem:[#allocation10 + $0x26c] ss:$16 sps:$4 sm:$0xff]   ;;  %v10318_v22 = vld [vmem:[#allocation10 + $0x260] ss:$16 sps:$4 sm:$0xff]  }
 0x319   :  { %3897 = vmatpush1.bf16.msra.mxu0 %v10258_v23  ;;  %3979 = vmatpush1.bf16.msra.mxu1 %v10261_v24  ;;  %v10321_v23 = vld [vmem:[#allocation10 + $0x268] ss:$16 sps:$4 sm:$0xff]   ;;  %v10326_v24 = vld [vmem:[#allocation10 + $0x284] ss:$16 sps:$4 sm:$0xff]  }
 0x31a   :  { %3898 = vmatprep.subr.bf16.mxu0 %v10266_v14  ;;  %3980 = vmatprep.subr.bf16.mxu1 %v10269_v26  ;;  %v10329_v14 = vld [vmem:[#allocation10 + $0x28c] ss:$16 sps:$4 sm:$0xff]   ;;  %v10324_v26 = vld [vmem:[#allocation10 + $0x280] ss:$16 sps:$4 sm:$0xff]  }
 0x31d   :  { %3899 = vmatpush1.bf16.msra.mxu0 %v10264_v27  ;;  %3981 = vmatpush1.bf16.msra.mxu1 %v10267_v28  ;;  %v10327_v27 = vld [vmem:[#allocation10 + $0x288] ss:$16 sps:$4 sm:$0xff]   ;;  %v10332_v28 = vld [vmem:[#allocation10 + $0x2a4] ss:$16 sps:$4 sm:$0xff]  }
 0x31e   :  { %3900 = vmatprep.subr.bf16.mxu0 %v10272_v29  ;;  %3982 = vmatprep.subr.bf16.mxu1 %v10275_v30  ;;  %v10335_v29 = vld [vmem:[#allocation10 + $0x2ac] ss:$16 sps:$4 sm:$0xff]   ;;  %v10330_v30 = vld [vmem:[#allocation10 + $0x2a0] ss:$16 sps:$4 sm:$0xff]  }
 0x321   :  { %3901 = vmatpush1.bf16.msra.mxu0 %v10270_v31  ;;  %3983 = vmatpush1.bf16.msra.mxu1 %v10273_v32  ;;  %v10333_v31 = vld [vmem:[#allocation10 + $0x2a8] ss:$16 sps:$4 sm:$0xff]   ;;  %v10338_v32 = vld [vmem:[#allocation10 + $0x2c4] ss:$16 sps:$4 sm:$0xff]  }
 0x322   :  { %3902 = vmatprep.subr.bf16.mxu0 %v10278_v34  ;;  %3984 = vmatprep.subr.bf16.mxu1 %v10281_v35  ;;  %v10341_v34 = vld [vmem:[#allocation10 + $0x2cc] ss:$16 sps:$4 sm:$0xff]   ;;  %v10336_v35 = vld [vmem:[#allocation10 + $0x2c0] ss:$16 sps:$4 sm:$0xff]  }
 0x325   :  { %3903 = vmatpush1.bf16.msra.mxu0 %v10276_v36  ;;  %3985 = vmatpush1.bf16.msra.mxu1 %v10279_v37  ;;  %v10339_v36 = vld [vmem:[#allocation10 + $0x2c8] ss:$16 sps:$4 sm:$0xff]   ;;  %v10344_v37 = vld [vmem:[#allocation10 + $0x2e4] ss:$16 sps:$4 sm:$0xff]  }
 0x326   :  { %3904 = vmatprep.subr.bf16.mxu0 %v10284_v38  ;;  %3986 = vmatprep.subr.bf16.mxu1 %v10287_v39  ;;  %v10347_v38 = vld [vmem:[#allocation10 + $0x2ec] ss:$16 sps:$4 sm:$0xff]   ;;  %v10342_v39 = vld [vmem:[#allocation10 + $0x2e0] ss:$16 sps:$4 sm:$0xff]  }
 0x329   :  { %3905 = vmatpush1.bf16.msra.mxu0 %v10282_v40  ;;  %3987 = vmatpush1.bf16.msra.mxu1 %v10285_v41  ;;  %v10345_v40 = vld [vmem:[#allocation10 + $0x2e8] ss:$16 sps:$4 sm:$0xff]   ;;  %v10350_v41 = vld [vmem:[#allocation10 + $0x304] ss:$16 sps:$4 sm:$0xff]  }
 0x32a   :  { %3906 = vmatprep.subr.bf16.mxu0 %v10290_v42  ;;  %3988 = vmatprep.subr.bf16.mxu1 %v10293_v43  ;;  %v10353_v42 = vld [vmem:[#allocation10 + $0x30c] ss:$16 sps:$4 sm:$0xff]   ;;  %v10348_v43 = vld [vmem:[#allocation10 + $0x300] ss:$16 sps:$4 sm:$0xff]  }
 0x32d   :  { %3907 = vmatpush1.bf16.msra.mxu0 %v10288_v44  ;;  %3989 = vmatpush1.bf16.msra.mxu1 %v10291_v45  ;;  %v10351_v44 = vld [vmem:[#allocation10 + $0x308] ss:$16 sps:$4 sm:$0xff]   ;;  %v10356_v45 = vld [vmem:[#allocation10 + $0x324] ss:$16 sps:$4 sm:$0xff]  }
 0x32e   :  { %3908 = vmatprep.subr.bf16.mxu0 %v10296_v46  ;;  %3990 = vmatprep.subr.bf16.mxu1 %v10299_v47  ;;  %v10359_v46 = vld [vmem:[#allocation10 + $0x32c] ss:$16 sps:$4 sm:$0xff]   ;;  %v10354_v47 = vld [vmem:[#allocation10 + $0x320] ss:$16 sps:$4 sm:$0xff]  }
 0x331   :  { %3909 = vmatpush1.bf16.msra.mxu0 %v10294_v48  ;;  %3991 = vmatpush1.bf16.msra.mxu1 %v10297_v19  ;;  %v10357_v48 = vld [vmem:[#allocation10 + $0x328] ss:$16 sps:$4 sm:$0xff]   ;;  %v10362_v19 = vld [vmem:[#allocation10 + $0x344] ss:$16 sps:$4 sm:$0xff]  }
 0x332   :  { %3919 = vmatprep.subr.bf16.mxu0 %v10302_v49  ;;  %4001 = vmatprep.subr.bf16.mxu1 %v10305_v50  ;;  %v10365_v49 = vld [vmem:[#allocation10 + $0x34c] ss:$16 sps:$4 sm:$0xff]   ;;  %v10360_v50 = vld [vmem:[#allocation10 + $0x340] ss:$16 sps:$4 sm:$0xff]  }
 0x3c7   :  { %v2995_v54 = vpop.f32.mrb[4].mxu0  ;;  %v11279_v55 = vpop.f32.mrb[4].mxu1 }
 0x3c8   :  { %v9550_v56 = vadd.f32 %v2995_v54, %v2263_v25  ;;  %v2997_v57 = vpop.f32.mrb[5].mxu0  ;;  %v3079_v58 = vpop.f32.mrb[5].mxu1  ;;  %v10363_v25 = vld [vmem:[#allocation10 + $0x348] ss:$16 sps:$4 sm:$0xff]   ;;  %v10366_v54 = vld [vmem:[#allocation10 + $0x360] ss:$16 sps:$4 sm:$0xff]  }
 0x3c9   :  { %v9551_v59 = vadd.f32 %v2997_v57, %v2267_v52  ;;  %v2999_v60 = vpop.f32.mrb[6].mxu0  ;;  %v3081_v61 = vpop.f32.mrb[6].mxu1  ;;  %v9553_v62 = vadd.f32 %v3079_v58, %v2275_v53  ;;  %v10368_v52 = vld [vmem:[#allocation10 + $0x364] ss:$16 sps:$4 sm:$0xff]   ;;  %v10371_v53 = vld [vmem:[#allocation10 + $0x36c] ss:$16 sps:$4 sm:$0xff]  }
 0x3ca   :  { %v3000_v63 = vpop.f32.mrb[7].mxu0  ;;  %v3082_v0 = vpop.f32.mrb[7].mxu1  ;;  %v3084_v4 = vpack.c.bf16 %v9550_v56, %v9550_v56  ;;  %v10369_v56 = vld [vmem:[#allocation10 + $0x368] ss:$16 sps:$4 sm:$0xff]   ;;  %v10374_v57 = vld [vmem:[#allocation10 + $0x384] ss:$16 sps:$4 sm:$0xff]  }
 0x3cb   :  { %v3085_v1 = vpack.c.bf16 %v9551_v59, %v9551_v59  ;;  %v3087_v7 = vpack.c.bf16 %v9553_v62, %v9553_v62  ;;  %v10377_v58 = vld [vmem:[#allocation10 + $0x38c] ss:$16 sps:$4 sm:$0xff]   ;;  %v10372_v59 = vld [vmem:[#allocation10 + $0x380] ss:$16 sps:$4 sm:$0xff]   ;;  %v10375_v60 = vld [vmem:[#allocation10 + $0x388] ss:$16 sps:$4 sm:$0xff]  }
 0x3cc   :  { %v10380_v61 = vld [vmem:[#allocation10 + $0x3a4] ss:$16 sps:$4 sm:$0xff]   ;;  %v10383_v62 = vld [vmem:[#allocation10 + $0x3ac] ss:$16 sps:$4 sm:$0xff]   ;;  %v10378_v63 = vld [vmem:[#allocation10 + $0x3a0] ss:$16 sps:$4 sm:$0xff]  }
 0x3cd   :  { %3910 = vmatprep.mubr.bf16.mxu0 %v3085_v1  ;;  %3992 = vmatprep.mubr.bf16.mxu1 %v3085_v1  ;;  %v10381_v0 = vld [vmem:[#allocation10 + $0x3a8] ss:$16 sps:$4 sm:$0xff]   ;;  %v10386_v1 = vld [vmem:[#allocation10 + $0x3c4] ss:$16 sps:$4 sm:$0xff]  }
 0x3ce   :  { %3911 = vmatmul.mubr.bf16.vlgmr.msra.gmra.mrb[8].mxu0 %v3084_v4  ;;  %3993 = vmatmul.mubr.bf16.vlgmr.msra.gmra.mrb[8].mxu1 %v3084_v4  ;;  %v10387_v4 = vld [vmem:[#allocation10 + $0x3c8] ss:$16 sps:$4 sm:$0xff]  }
 0x3cf   :  { %3920 = vmatpush1.bf16.msra.mxu0 %v10300_v2  ;;  %4002 = vmatpush1.bf16.msra.mxu1 %v10303_v3  ;;  %v10389_v2 = vld [vmem:[#allocation10 + $0x3cc] ss:$16 sps:$4 sm:$0xff]   ;;  %v10384_v3 = vld [vmem:[#allocation10 + $0x3c0] ss:$16 sps:$4 sm:$0xff]  }
 0x3d0   :  { %3951 = vmatprep.mubr.bf16.mxu0 %v3087_v7  ;;  %4033 = vmatprep.mubr.bf16.mxu1 %v3087_v7  ;;  %v10395_v7 = vld [vmem:[#allocation10 + $0x3ec] ss:$16 sps:$4 sm:$0xff]  }
 0x3d1   :  { %3921 = vmatprep.subr.bf16.mxu0 %v10308_v5  ;;  %4003 = vmatprep.subr.bf16.mxu1 %v10311_v6  ;;  %v2271_v5 = vrot.slane %v11271_v51, %v11263_v33  ;;  %v10392_v6 = vld [vmem:[#allocation10 + $0x3e4] ss:$16 sps:$4 sm:$0xff]  }
 0x3d3   :  { %3922 = vmatpush1.bf16.msra.mxu0 %v10306_v8  ;;  %4004 = vmatpush1.bf16.msra.mxu1 %v10309_v9  ;;  %v10390_v8 = vld [vmem:[#allocation10 + $0x3e0] ss:$16 sps:$4 sm:$0xff]   ;;  %v10393_v9 = vld [vmem:[#allocation10 + $0x3e8] ss:$16 sps:$4 sm:$0xff]  }
 0x3d4   :  { %3923 = vmatprep.subr.bf16.mxu0 %v10314_v10  ;;  %4005 = vmatprep.subr.bf16.mxu1 %v10317_v12  ;;  %v9552_v10 = vadd.f32 %v11279_v55, %v2271_v5  ;;  %v10398_v12 = vld [vmem:[#allocation11 + $0x4] ss:$8 sps:$4 sm:$0xff]   ;;  %v10470_v5 = vld [vmem:[#allocation13 + $0x80] ss:$8 sps:$4 sm:$0xff]  }
 0x3d5   :  { %v10404_v55 = vld [vmem:[#allocation11 + $0x24] ss:$8 sps:$4 sm:$0xff]  }
 0x3d7   :  { %3924 = vmatpush1.bf16.msra.mxu0 %v10312_v13  ;;  %4006 = vmatpush1.bf16.msra.mxu1 %v10315_v15  ;;  %v11284_v13 = vld [vmem:[#allocation5] sm:$0xff]  ;;  %v10396_v15 = vld [vmem:[#allocation11] ss:$8 sps:$4 sm:$0xff]  }
 0x3d8   :  { %3925 = vmatprep.subr.bf16.mxu0 %v10320_v16  ;;  %4007 = vmatprep.subr.bf16.mxu1 %v10323_v21  ;;  %v8911_v51 = vcombine.high %v11284_v13, %v11284_v13  ;;  %v3086_v16 = vpack.c.bf16 %v9552_v10, %v9552_v10  ;;  %v10401_v21 = vld [vmem:[#allocation11 + $0x14] ss:$8 sps:$4 sm:$0xff]  }
 0x3d9   :  { %v10481_v10 = vld [vmem:[#allocation13 + $0xb4] ss:$8 sps:$4 sm:$0xff]  }
 0x3db   :  { %3926 = vmatpush1.bf16.msra.mxu0 %v10318_v22  ;;  %4008 = vmatpush1.bf16.msra.mxu1 %v10321_v23  ;;  %v10399_v22 = vld [vmem:[#allocation11 + $0x10] ss:$8 sps:$4 sm:$0xff]   ;;  %v10402_v23 = vld [vmem:[#allocation11 + $0x20] ss:$8 sps:$4 sm:$0xff]  }
 0x3dc   :  { %3927 = vmatprep.subr.bf16.mxu0 %v10326_v24  ;;  %4009 = vmatprep.subr.bf16.mxu1 %v10329_v14  ;;  %v10407_v24 = vld [vmem:[#allocation11 + $0x34] ss:$8 sps:$4 sm:$0xff]   ;;  %v10405_v14 = vld [vmem:[#allocation11 + $0x30] ss:$8 sps:$4 sm:$0xff]  }
 0x3df   :  { %3928 = vmatpush1.bf16.msra.mxu0 %v10324_v26  ;;  %4010 = vmatpush1.bf16.msra.mxu1 %v10327_v27  ;;  %v10410_v26 = vld [vmem:[#allocation11 + $0x44] ss:$8 sps:$4 sm:$0xff]   ;;  %v10408_v27 = vld [vmem:[#allocation11 + $0x40] ss:$8 sps:$4 sm:$0xff]  }
 0x3e0   :  { %3929 = vmatprep.subr.bf16.mxu0 %v10332_v28  ;;  %4011 = vmatprep.subr.bf16.mxu1 %v10335_v29  ;;  %v10413_v28 = vld [vmem:[#allocation11 + $0x54] ss:$8 sps:$4 sm:$0xff]   ;;  %v10411_v29 = vld [vmem:[#allocation11 + $0x50] ss:$8 sps:$4 sm:$0xff]  }
 0x3e3   :  { %3930 = vmatpush1.bf16.msra.mxu0 %v10330_v30  ;;  %4012 = vmatpush1.bf16.msra.mxu1 %v10333_v31  ;;  %v10416_v30 = vld [vmem:[#allocation11 + $0x64] ss:$8 sps:$4 sm:$0xff]   ;;  %v10414_v31 = vld [vmem:[#allocation11 + $0x60] ss:$8 sps:$4 sm:$0xff]  }
 0x3e4   :  { %3931 = vmatprep.subr.bf16.mxu0 %v10338_v32  ;;  %4013 = vmatprep.subr.bf16.mxu1 %v10341_v34  ;;  %v10419_v32 = vld [vmem:[#allocation11 + $0x74] ss:$8 sps:$4 sm:$0xff]   ;;  %v10417_v34 = vld [vmem:[#allocation11 + $0x70] ss:$8 sps:$4 sm:$0xff]  }
 0x3e7   :  { %3932 = vmatpush1.bf16.msra.mxu0 %v10336_v35  ;;  %4014 = vmatpush1.bf16.msra.mxu1 %v10339_v36  ;;  %v10422_v35 = vld [vmem:[#allocation11 + $0x84] ss:$8 sps:$4 sm:$0xff]   ;;  %v10420_v36 = vld [vmem:[#allocation11 + $0x80] ss:$8 sps:$4 sm:$0xff]  }
 0x3e8   :  { %3933 = vmatprep.subr.bf16.mxu0 %v10344_v37  ;;  %4015 = vmatprep.subr.bf16.mxu1 %v10347_v38  ;;  %v10425_v37 = vld [vmem:[#allocation11 + $0x94] ss:$8 sps:$4 sm:$0xff]   ;;  %v10423_v38 = vld [vmem:[#allocation11 + $0x90] ss:$8 sps:$4 sm:$0xff]  }
 0x3eb   :  { %3934 = vmatpush1.bf16.msra.mxu0 %v10342_v39  ;;  %4016 = vmatpush1.bf16.msra.mxu1 %v10345_v40  ;;  %v10428_v39 = vld [vmem:[#allocation11 + $0xa4] ss:$8 sps:$4 sm:$0xff]   ;;  %v10426_v40 = vld [vmem:[#allocation11 + $0xa0] ss:$8 sps:$4 sm:$0xff]  }
 0x3ec   :  { %3935 = vmatprep.subr.bf16.mxu0 %v10350_v41  ;;  %4017 = vmatprep.subr.bf16.mxu1 %v10353_v42  ;;  %v10431_v41 = vld [vmem:[#allocation11 + $0xb4] ss:$8 sps:$4 sm:$0xff]   ;;  %v10429_v42 = vld [vmem:[#allocation11 + $0xb0] ss:$8 sps:$4 sm:$0xff]  }
 0x3ef   :  { %3936 = vmatpush1.bf16.msra.mxu0 %v10348_v43  ;;  %4018 = vmatpush1.bf16.msra.mxu1 %v10351_v44  ;;  %v10434_v43 = vld [vmem:[#allocation11 + $0xc4] ss:$8 sps:$4 sm:$0xff]   ;;  %v10432_v44 = vld [vmem:[#allocation11 + $0xc0] ss:$8 sps:$4 sm:$0xff]  }
 0x3f0   :  { %3937 = vmatprep.subr.bf16.mxu0 %v10356_v45  ;;  %4019 = vmatprep.subr.bf16.mxu1 %v10359_v46  ;;  %v10437_v45 = vld [vmem:[#allocation11 + $0xd4] ss:$8 sps:$4 sm:$0xff]   ;;  %v10435_v46 = vld [vmem:[#allocation11 + $0xd0] ss:$8 sps:$4 sm:$0xff]  }
 0x3f3   :  { %3938 = vmatpush1.bf16.msra.mxu0 %v10354_v47  ;;  %4020 = vmatpush1.bf16.msra.mxu1 %v10357_v48  ;;  %v10440_v47 = vld [vmem:[#allocation11 + $0xe4] ss:$8 sps:$4 sm:$0xff]   ;;  %v10438_v48 = vld [vmem:[#allocation11 + $0xe0] ss:$8 sps:$4 sm:$0xff]  }
 0x3f4   :  { %3939 = vmatprep.subr.bf16.mxu0 %v10362_v19  ;;  %4021 = vmatprep.subr.bf16.mxu1 %v10365_v49  ;;  %v10443_v19 = vld [vmem:[#allocation11 + $0xf4] ss:$8 sps:$4 sm:$0xff]   ;;  %v10441_v49 = vld [vmem:[#allocation11 + $0xf0] ss:$8 sps:$4 sm:$0xff]  }
 0x3f7   :  { %3940 = vmatpush1.bf16.msra.mxu0 %v10360_v50  ;;  %4022 = vmatpush1.bf16.msra.mxu1 %v10363_v25  ;;  %v8910_v50 = vcombine.low %v11284_v13, %v11284_v13  ;;  %v10446_v25 = vld [vmem:[#allocation13] ss:$8 sps:$4 sm:$0xff]   ;;  %v10484_v13 = vld [vmem:[#allocation13 + $0xc4] ss:$8 sps:$4 sm:$0xff]  }
 0x3f8   :  { %3941 = vmatprep.subr.bf16.mxu0 %v10368_v52  ;;  %4023 = vmatprep.subr.bf16.mxu1 %v10371_v53  ;;  %v10448_v52 = vld [vmem:[#allocation13 + $0x4] ss:$8 sps:$4 sm:$0xff]   ;;  %v10451_v53 = vld [vmem:[#allocation13 + $0x14] ss:$8 sps:$4 sm:$0xff]  }
 0x3fb   :  { %3942 = vmatpush1.bf16.msra.mxu0 %v10366_v54  ;;  %4024 = vmatpush1.bf16.msra.mxu1 %v10369_v56  ;;  %v10449_v54 = vld [vmem:[#allocation13 + $0x10] ss:$8 sps:$4 sm:$0xff]   ;;  %v10454_v56 = vld [vmem:[#allocation13 + $0x24] ss:$8 sps:$4 sm:$0xff]  }
 0x3fc   :  { %3943 = vmatprep.subr.bf16.mxu0 %v10374_v57  ;;  %4025 = vmatprep.subr.bf16.mxu1 %v10377_v58  ;;  %v10452_v57 = vld [vmem:[#allocation13 + $0x20] ss:$8 sps:$4 sm:$0xff]   ;;  %v10457_v58 = vld [vmem:[#allocation13 + $0x34] ss:$8 sps:$4 sm:$0xff]  }
 0x3ff   :  { %3944 = vmatpush1.bf16.msra.mxu0 %v10372_v59  ;;  %4026 = vmatpush1.bf16.msra.mxu1 %v10375_v60  ;;  %v10455_v59 = vld [vmem:[#allocation13 + $0x30] ss:$8 sps:$4 sm:$0xff]   ;;  %v10460_v60 = vld [vmem:[#allocation13 + $0x44] ss:$8 sps:$4 sm:$0xff]  }
 0x400   :  { %3945 = vmatprep.subr.bf16.mxu0 %v10380_v61  ;;  %4027 = vmatprep.subr.bf16.mxu1 %v10383_v62  ;;  %v10458_v61 = vld [vmem:[#allocation13 + $0x40] ss:$8 sps:$4 sm:$0xff]   ;;  %v10463_v62 = vld [vmem:[#allocation13 + $0x54] ss:$8 sps:$4 sm:$0xff]  }
 0x403   :  { %3946 = vmatpush1.bf16.msra.mxu0 %v10378_v63  ;;  %4028 = vmatpush1.bf16.msra.mxu1 %v10381_v0  ;;  %v10461_v63 = vld [vmem:[#allocation13 + $0x50] ss:$8 sps:$4 sm:$0xff]   ;;  %v10466_v0 = vld [vmem:[#allocation13 + $0x64] ss:$8 sps:$4 sm:$0xff]  }
 0x404   :  { %3947 = vmatprep.subr.bf16.mxu0 %v10386_v1  ;;  %4029 = vmatprep.subr.bf16.mxu1 %v10389_v2  ;;  %v10464_v1 = vld [vmem:[#allocation13 + $0x60] ss:$8 sps:$4 sm:$0xff]   ;;  %v10469_v2 = vld [vmem:[#allocation13 + $0x74] ss:$8 sps:$4 sm:$0xff]  }
 0x407   :  { %3948 = vmatpush1.bf16.msra.mxu0 %v10384_v3  ;;  %4030 = vmatpush1.bf16.msra.mxu1 %v10387_v4  ;;  %v10467_v3 = vld [vmem:[#allocation13 + $0x70] ss:$8 sps:$4 sm:$0xff]   ;;  %v10472_v4 = vld [vmem:[#allocation13 + $0x84] ss:$8 sps:$4 sm:$0xff]  }
 0x408   :  { %3949 = vmatprep.subr.bf16.mxu0 %v10392_v6  ;;  %4031 = vmatprep.subr.bf16.mxu1 %v10395_v7  ;;  %v10475_v6 = vld [vmem:[#allocation13 + $0x94] ss:$8 sps:$4 sm:$0xff]   ;;  %v10473_v7 = vld [vmem:[#allocation13 + $0x90] ss:$8 sps:$4 sm:$0xff]  }
 0x40b   :  { %3950 = vmatpush1.bf16.msra.mxu0 %v10390_v8  ;;  %4032 = vmatpush1.bf16.msra.mxu1 %v10393_v9  ;;  %v10478_v8 = vld [vmem:[#allocation13 + $0xa4] ss:$8 sps:$4 sm:$0xff]   ;;  %v10476_v9 = vld [vmem:[#allocation13 + $0xa0] ss:$8 sps:$4 sm:$0xff]  }
 0x40c   :  { %4254 = vmatprep.subr.bf16.mxu0 %v10398_v12  ;;  %4501 = vmatprep.subr.bf16.mxu1 %v10448_v52  ;;  %v10479_v12 = vld [vmem:[#allocation13 + $0xb0] ss:$8 sps:$4 sm:$0xff]  }
 0x40d   :  { %v10533_v52 = vld [vmem:[#allocation14 + $0xd0] ss:$8 sps:$4 sm:$0xff]  }
 0x40e   :  { %3952 = vmatmul.mubr.bf16.vlgmr.msra.gmra.mrb[8].mxu0 %v3086_v16  ;;  %4034 = vmatmul.mubr.bf16.vlgmr.msra.gmra.mrb[8].mxu1 %v3086_v16  ;;  %v10485_v16 = vld [vmem:[#allocation13 + $0xd0] ss:$8 sps:$4 sm:$0xff]  }
 0x40f   :  { %4255 = vmatpush1.bf16.msra.mxu0 %v10396_v15  ;;  %4286 = vmatprep.mubr.bf16.mxu0 %v8911_v51  ;;  %v10482_v15 = vld [vmem:[#allocation13 + $0xc0] ss:$8 sps:$4 sm:$0xff]   ;;  %v10487_v51 = vld [vmem:[#allocation13 + $0xd4] ss:$8 sps:$4 sm:$0xff]  }
 0x410   :  { %4256 = vmatprep.subr.bf16.mxu0 %v10401_v21  ;;  %4502 = vmatpush1.bf16.msra.mxu1 %v10446_v25  ;;  %v10490_v21 = vld [vmem:[#allocation13 + $0xe4] ss:$8 sps:$4 sm:$0xff]   ;;  %v11293_v25 = vld [vmem:[%s11461_s12 + $0x8] sm:$0xf] }
 0x411   :  { %4503 = vmatprep.subr.bf16.mxu1 %v10451_v53  ;;  %v10538_v53 = vld [vmem:[#allocation14 + $0xe4] ss:$8 sps:$4 sm:$0xff]  }
 0x413   :  { %4257 = vmatpush1.bf16.msra.mxu0 %v10399_v22  ;;  %v10488_v22 = vld [vmem:[#allocation13 + $0xe0] ss:$8 sps:$4 sm:$0xff]  }
 0x414   :  { %4258 = vmatprep.subr.bf16.mxu0 %v10404_v55  ;;  %4504 = vmatpush1.bf16.msra.mxu1 %v10449_v54  ;;  %v10493_v55 = vld [vmem:[#allocation13 + $0xf4] ss:$8 sps:$4 sm:$0xff]   ;;  %v3229_v54 = vrot.slane %v11293_v25, %v11263_v33 }
 0x415   :  { %4505 = vmatprep.subr.bf16.mxu1 %v10454_v56  ;;  %v10536_v56 = vld [vmem:[#allocation14 + $0xe0] ss:$8 sps:$4 sm:$0xff]  }
 0x417   :  { %4259 = vmatpush1.bf16.msra.mxu0 %v10402_v23  ;;  %v10491_v23 = vld [vmem:[#allocation13 + $0xf0] ss:$8 sps:$4 sm:$0xff]  }
 0x418   :  { %4260 = vmatprep.subr.bf16.mxu0 %v10407_v24  ;;  %4506 = vmatpush1.bf16.msra.mxu1 %v10452_v57  ;;  %v10494_v24 = vld [vmem:[#allocation14] ss:$8 sps:$4 sm:$0xff]  }
 0x419   :  { %4507 = vmatprep.subr.bf16.mxu1 %v10457_v58 }
 0x41b   :  { %4261 = vmatpush1.bf16.msra.mxu0 %v10405_v14  ;;  %v10496_v14 = vld [vmem:[#allocation14 + $0x4] ss:$8 sps:$4 sm:$0xff]  }
 0x41c   :  { %4262 = vmatprep.subr.bf16.mxu0 %v10410_v26  ;;  %4508 = vmatpush1.bf16.msra.mxu1 %v10455_v59  ;;  %v10499_v26 = vld [vmem:[#allocation14 + $0x14] ss:$8 sps:$4 sm:$0xff]  }
 0x41d   :  { %4509 = vmatprep.subr.bf16.mxu1 %v10460_v60 }
 0x41f   :  { %4263 = vmatpush1.bf16.msra.mxu0 %v10408_v27  ;;  %v10497_v27 = vld [vmem:[#allocation14 + $0x10] ss:$8 sps:$4 sm:$0xff]  }
 0x420   :  { %4264 = vmatprep.subr.bf16.mxu0 %v10413_v28  ;;  %4510 = vmatpush1.bf16.msra.mxu1 %v10458_v61  ;;  %v10502_v28 = vld [vmem:[#allocation14 + $0x24] ss:$8 sps:$4 sm:$0xff]  }
 0x421   :  { %4511 = vmatprep.subr.bf16.mxu1 %v10463_v62 }
 0x423   :  { %4265 = vmatpush1.bf16.msra.mxu0 %v10411_v29  ;;  %v10500_v29 = vld [vmem:[#allocation14 + $0x20] ss:$8 sps:$4 sm:$0xff]  }
 0x424   :  { %4266 = vmatprep.subr.bf16.mxu0 %v10416_v30  ;;  %4512 = vmatpush1.bf16.msra.mxu1 %v10461_v63  ;;  %v10505_v30 = vld [vmem:[#allocation14 + $0x34] ss:$8 sps:$4 sm:$0xff]  }
 0x425   :  { %4513 = vmatprep.subr.bf16.mxu1 %v10466_v0 }
 0x427   :  { %4267 = vmatpush1.bf16.msra.mxu0 %v10414_v31  ;;  %v10503_v31 = vld [vmem:[#allocation14 + $0x30] ss:$8 sps:$4 sm:$0xff]  }
 0x428   :  { %4268 = vmatprep.subr.bf16.mxu0 %v10419_v32  ;;  %4514 = vmatpush1.bf16.msra.mxu1 %v10464_v1  ;;  %v10508_v32 = vld [vmem:[#allocation14 + $0x44] ss:$8 sps:$4 sm:$0xff]  }
 0x429   :  { %4515 = vmatprep.subr.bf16.mxu1 %v10469_v2  ;;  %v4075_v2 = vld [vmem:[%s11461_s12 + $0xc] sm:$0x3] }
 0x42b   :  { %4269 = vmatpush1.bf16.msra.mxu0 %v10417_v34  ;;  %v10506_v34 = vld [vmem:[#allocation14 + $0x40] ss:$8 sps:$4 sm:$0xff]  }
 0x42c   :  { %4270 = vmatprep.subr.bf16.mxu0 %v10422_v35  ;;  %4516 = vmatpush1.bf16.msra.mxu1 %v10467_v3  ;;  %v10511_v35 = vld [vmem:[#allocation14 + $0x54] ss:$8 sps:$4 sm:$0xff]   ;;  %v4080_v3 = vrot.slane %v4075_v2, %v11241_v18 }
 0x42d   :  { %4517 = vmatprep.subr.bf16.mxu1 %v10472_v4  ;;  %v4084_v4 = vrot.slane %v4075_v2, %v11249_v20  ;;  %v5127_v2 = vld [vmem:[#allocation17 + $0x260] sm:$0xff] }
 0x42f   :  { %4271 = vmatpush1.bf16.msra.mxu0 %v10420_v36  ;;  %v10509_v36 = vld [vmem:[#allocation14 + $0x50] ss:$8 sps:$4 sm:$0xff]  }
 0x430   :  { %4272 = vmatprep.subr.bf16.mxu0 %v10425_v37  ;;  %4518 = vmatpush1.bf16.msra.mxu1 %v10470_v5  ;;  %v10514_v37 = vld [vmem:[#allocation14 + $0x64] ss:$8 sps:$4 sm:$0xff]  }
 0x431   :  { %4519 = vmatprep.subr.bf16.mxu1 %v10475_v6 }
 0x433   :  { %4273 = vmatpush1.bf16.msra.mxu0 %v10423_v38  ;;  %v10512_v38 = vld [vmem:[#allocation14 + $0x60] ss:$8 sps:$4 sm:$0xff]  }
 0x434   :  { %4274 = vmatprep.subr.bf16.mxu0 %v10428_v39  ;;  %4520 = vmatpush1.bf16.msra.mxu1 %v10473_v7  ;;  %v10517_v39 = vld [vmem:[#allocation14 + $0x74] ss:$8 sps:$4 sm:$0xff]  }
 0x435   :  { %4521 = vmatprep.subr.bf16.mxu1 %v10478_v8 }
 0x437   :  { %4275 = vmatpush1.bf16.msra.mxu0 %v10426_v40  ;;  %v10515_v40 = vld [vmem:[#allocation14 + $0x70] ss:$8 sps:$4 sm:$0xff]  }
 0x438   :  { %4276 = vmatprep.subr.bf16.mxu0 %v10431_v41  ;;  %4522 = vmatpush1.bf16.msra.mxu1 %v10476_v9  ;;  %v10520_v41 = vld [vmem:[#allocation14 + $0x84] ss:$8 sps:$4 sm:$0xff]  }
 0x439   :  { %4523 = vmatprep.subr.bf16.mxu1 %v10481_v10 }
 0x43b   :  { %4277 = vmatpush1.bf16.msra.mxu0 %v10429_v42  ;;  %v10518_v42 = vld [vmem:[#allocation14 + $0x80] ss:$8 sps:$4 sm:$0xff]  }
 0x43c   :  { %4278 = vmatprep.subr.bf16.mxu0 %v10434_v43  ;;  %4524 = vmatpush1.bf16.msra.mxu1 %v10479_v12  ;;  %v10523_v43 = vld [vmem:[#allocation14 + $0x94] ss:$8 sps:$4 sm:$0xff]  }
 0x43d   :  { %4525 = vmatprep.subr.bf16.mxu1 %v10484_v13 }
 0x43f   :  { %4279 = vmatpush1.bf16.msra.mxu0 %v10432_v44  ;;  %v10521_v44 = vld [vmem:[#allocation14 + $0x90] ss:$8 sps:$4 sm:$0xff]  }
 0x440   :  { %4280 = vmatprep.subr.bf16.mxu0 %v10437_v45  ;;  %4526 = vmatpush1.bf16.msra.mxu1 %v10482_v15  ;;  %v10526_v45 = vld [vmem:[#allocation14 + $0xa4] ss:$8 sps:$4 sm:$0xff]   ;;  %v10541_v15 = vld [vmem:[#allocation14 + $0xf4] ss:$8 sps:$4 sm:$0xff]  }
 0x441   :  { %4527 = vmatprep.subr.bf16.mxu1 %v10487_v51  ;;  %v10539_v51 = vld [vmem:[#allocation14 + $0xf0] ss:$8 sps:$4 sm:$0xff]  }
 0x443   :  { %4281 = vmatpush1.bf16.msra.mxu0 %v10435_v46  ;;  %v10524_v46 = vld [vmem:[#allocation14 + $0xa0] ss:$8 sps:$4 sm:$0xff]  }
 0x444   :  { %4282 = vmatprep.subr.bf16.mxu0 %v10440_v47  ;;  %4528 = vmatpush1.bf16.msra.mxu1 %v10485_v16  ;;  %v10529_v47 = vld [vmem:[#allocation14 + $0xb4] ss:$8 sps:$4 sm:$0xff]   ;;  %v5051_v16 = vld [vmem:[#allocation17] sm:$0xff] }
 0x445   :  { %4529 = vmatprep.subr.bf16.mxu1 %v10490_v21  ;;  %v5055_v21 = vld [vmem:[#allocation17 + $0x20] sm:$0xff] }
 0x447   :  { %4283 = vmatpush1.bf16.msra.mxu0 %v10438_v48  ;;  %v10527_v48 = vld [vmem:[#allocation14 + $0xb0] ss:$8 sps:$4 sm:$0xff]  }
 0x448   :  { %4284 = vmatprep.subr.bf16.mxu0 %v10443_v19  ;;  %4530 = vmatpush1.bf16.msra.mxu1 %v10488_v22  ;;  %v10532_v19 = vld [vmem:[#allocation14 + $0xc4] ss:$8 sps:$4 sm:$0xff]  }
 0x449   :  { %4531 = vmatprep.subr.bf16.mxu1 %v10493_v55  ;;  %v11310_v22 = vld [vmem:[#allocation17 + $0x8] sm:$0xff]  ;;  %v9008_v55 = vcombine.low %v5051_v16, %v5055_v21 }
 0x44b   :  { %4285 = vmatpush1.bf16.msra.mxu0 %v10441_v49  ;;  %v10530_v49 = vld [vmem:[#allocation14 + $0xc0] ss:$8 sps:$4 sm:$0xff]  }
 0x44c   :  { %4532 = vmatpush1.bf16.msra.mxu1 %v10491_v23  ;;  %4748 = vmatprep.subr.bf16.mxu0 %v10496_v14  ;;  %v9009_v23 = vcombine.high %v5051_v16, %v5055_v21  ;;  %v5059_v14 = vld [vmem:[#allocation17 + $0x40] sm:$0xff] }
 0x44e   :  { %4287 = vmatmul.mubr.bf16.vlgmr.msra.gmra.mrb[12].mxu0 %v8910_v50  ;;  %v10535_v50 = vld [vmem:[#allocation14 + $0xd4] ss:$8 sps:$4 sm:$0xff]   ;;  %5819 = vmatprep.subr.bf16.mxu1 %v9009_v23  ;;  %v5159_v23 = vld [vmem:[#allocation17 + $0x360] sm:$0xff] }
 0x44f   :  { %4749 = vmatpush1.bf16.msra.mxu0 %v10494_v24  ;;  %v11312_v24 = vld [vmem:[#allocation17 + $0x28] sm:$0xff] }
 0x450   :  { %4750 = vmatprep.subr.bf16.mxu0 %v10499_v26  ;;  %v5063_v26 = vld [vmem:[#allocation17 + $0x60] sm:$0xff] }
 0x453   :  { %4751 = vmatpush1.bf16.msra.mxu0 %v10497_v27  ;;  %v9010_v27 = vcombine.low %v11310_v22, %v11312_v24 }
 0x454   :  { %4752 = vmatprep.subr.bf16.mxu0 %v10502_v28  ;;  %v9011_v28 = vcombine.high %v11310_v22, %v11312_v24 }
 0x457   :  { %4753 = vmatpush1.bf16.msra.mxu0 %v10500_v29  ;;  %v9017_v29 = vcombine.high %v5059_v14, %v5063_v26 }
 0x458   :  { %4754 = vmatprep.subr.bf16.mxu0 %v10505_v30  ;;  %v9016_v30 = vcombine.low %v5059_v14, %v5063_v26 }
 0x45b   :  { %4755 = vmatpush1.bf16.msra.mxu0 %v10503_v31  ;;  %v5067_v31 = vld [vmem:[#allocation17 + $0x80] sm:$0xff] }
 0x45c   :  { %4756 = vmatprep.subr.bf16.mxu0 %v10508_v32  ;;  %v5071_v32 = vld [vmem:[#allocation17 + $0xa0] sm:$0xff] }
 0x45f   :  { %4757 = vmatpush1.bf16.msra.mxu0 %v10506_v34  ;;  %v9025_v34 = vcombine.high %v5067_v31, %v5071_v32 }
 0x460   :  { %4758 = vmatprep.subr.bf16.mxu0 %v10511_v35  ;;  %v9024_v35 = vcombine.low %v5067_v31, %v5071_v32  ;;  %v4329_v32 = vld [vmem:[%s11461_s12 + $0xe] sm:$0x3] }
 0x463   :  { %4759 = vmatpush1.bf16.msra.mxu0 %v10509_v36  ;;  %v5075_v36 = vld [vmem:[#allocation17 + $0xc0] sm:$0xff] }
 0x464   :  { %4760 = vmatprep.subr.bf16.mxu0 %v10514_v37  ;;  %v5079_v37 = vld [vmem:[#allocation17 + $0xe0] sm:$0xff] }
 0x467   :  { %4761 = vmatpush1.bf16.msra.mxu0 %v10512_v38  ;;  %v9033_v38 = vcombine.high %v5075_v36, %v5079_v37 }
 0x468   :  { %4762 = vmatprep.subr.bf16.mxu0 %v10517_v39  ;;  %v9032_v39 = vcombine.low %v5075_v36, %v5079_v37 }
 0x46b   :  { %4763 = vmatpush1.bf16.msra.mxu0 %v10515_v40  ;;  %v5083_v40 = vld [vmem:[#allocation17 + $0x100] sm:$0xff] }
 0x46c   :  { %4764 = vmatprep.subr.bf16.mxu0 %v10520_v41  ;;  %v5087_v41 = vld [vmem:[#allocation17 + $0x120] sm:$0xff] }
 0x46f   :  { %4765 = vmatpush1.bf16.msra.mxu0 %v10518_v42  ;;  %v9041_v42 = vcombine.high %v5083_v40, %v5087_v41 }
 0x470   :  { %4766 = vmatprep.subr.bf16.mxu0 %v10523_v43  ;;  %v9040_v43 = vcombine.low %v5083_v40, %v5087_v41  ;;  %v5060_v41 = vld [vmem:[#allocation17 + $0x48] sm:$0xff] }
 0x473   :  { %4767 = vmatpush1.bf16.msra.mxu0 %v10521_v44  ;;  %v5091_v44 = vld [vmem:[#allocation17 + $0x140] sm:$0xff] }
 0x474   :  { %4768 = vmatprep.subr.bf16.mxu0 %v10526_v45  ;;  %v5095_v45 = vld [vmem:[#allocation17 + $0x160] sm:$0xff] }
 0x477   :  { %4769 = vmatpush1.bf16.msra.mxu0 %v10524_v46  ;;  %v9049_v46 = vcombine.high %v5091_v44, %v5095_v45 }
 0x478   :  { %4770 = vmatprep.subr.bf16.mxu0 %v10529_v47  ;;  %v9048_v47 = vcombine.low %v5091_v44, %v5095_v45 }
 0x47b   :  { %4771 = vmatpush1.bf16.msra.mxu0 %v10527_v48  ;;  %v5099_v48 = vld [vmem:[#allocation17 + $0x180] sm:$0xff] }
 0x47c   :  { %4772 = vmatprep.subr.bf16.mxu0 %v10532_v19  ;;  %v5103_v19 = vld [vmem:[#allocation17 + $0x1a0] sm:$0xff] }
 0x47f   :  { %4773 = vmatpush1.bf16.msra.mxu0 %v10530_v49  ;;  %v9057_v49 = vcombine.high %v5099_v48, %v5103_v19 }
 0x480   :  { %4774 = vmatprep.subr.bf16.mxu0 %v10535_v50  ;;  %v9056_v50 = vcombine.low %v5099_v48, %v5103_v19  ;;  %v5072_v48 = vld [vmem:[#allocation17 + $0xa8] sm:$0xff] }
 0x483   :  { %4775 = vmatpush1.bf16.msra.mxu0 %v10533_v52  ;;  %v5107_v52 = vld [vmem:[#allocation17 + $0x1c0] sm:$0xff] }
 0x484   :  { %4776 = vmatprep.subr.bf16.mxu0 %v10538_v53  ;;  %v5111_v53 = vld [vmem:[#allocation17 + $0x1e0] sm:$0xff] }
 0x487   :  { %4777 = vmatpush1.bf16.msra.mxu0 %v10536_v56  ;;  %v9064_v56 = vcombine.low %v5107_v52, %v5111_v53 }
 0x488   :  { %4778 = vmatprep.subr.bf16.mxu0 %v10541_v15  ;;  %v5147_v15 = vld [vmem:[#allocation17 + $0x300] sm:$0xff] }
 0x48b   :  { %4779 = vmatpush1.bf16.msra.mxu0 %v10539_v51  ;;  %v5151_v51 = vld [vmem:[#allocation17 + $0x320] sm:$0xff] }
 0x48c   :  { %5860 = vmatprep.subr.bf16.mxu0 %v9011_v28  ;;  %v9105_v16 = vcombine.high %v5147_v15, %v5151_v51  ;;  %v9104_v21 = vcombine.low %v5147_v15, %v5151_v51  ;;  %v5163_v28 = vld [vmem:[#allocation17 + $0x380] sm:$0xff]  ;;  %v5124_v15 = vld [vmem:[#allocation17 + $0x248] sm:$0xff] }
 0x48d   :  { %v5128_v51 = vld [vmem:[#allocation17 + $0x268] sm:$0xff] }
 0x4e1   :  { %v11297_v57 = vpop.f32.mrb[8].mxu0  ;;  %v4035_v58 = vpop.f32.mrb[8].mxu1 }
 0x4e2   :  { %v11299_v59 = vadd.f32 %v4035_v58, %v3229_v54  ;;  %v11301_v60 = vpop.f32.mrb[9].mxu0  ;;  %v11303_v61 = vpop.f32.mrb[9].mxu1  ;;  %v9065_v54 = vcombine.high %v5107_v52, %v5111_v53  ;;  %v5115_v58 = vld [vmem:[#allocation17 + $0x200] sm:$0xff]  ;;  %v5080_v52 = vld [vmem:[#allocation17 + $0xe8] sm:$0xff] }
 0x4e3   :  { %v3957_v62 = vpop.f32.mrb[10].mxu0  ;;  %v4039_v63 = vpop.f32.mrb[10].mxu1 }
 0x4e4   :  { %v3958_v0 = vpop.f32.mrb[11].mxu0  ;;  %v4040_v1 = vpop.f32.mrb[11].mxu1  ;;  %v5119_v62 = vld [vmem:[#allocation17 + $0x220] sm:$0xff] }
 0x4e5   :  { %v9073_v63 = vcombine.high %v5115_v58, %v5119_v62  ;;  %v9072_v0 = vcombine.low %v5115_v58, %v5119_v62  ;;  %v5123_v1 = vld [vmem:[#allocation17 + $0x240] sm:$0xff]  ;;  %v5088_v58 = vld [vmem:[#allocation17 + $0x128] sm:$0xff] }
 0x521   :  { %v4288_v5 = vpop.f32.mrb[12].mxu0 }
 0x522   :  { %v4289_v6 = vadd.f32 %v4288_v5, %v4080_v3  ;;  %v4290_v7 = vpop.f32.mrb[13].mxu0  ;;  %v9081_v3 = vcombine.high %v5123_v1, %v5127_v2  ;;  %v5131_v5 = vld [vmem:[#allocation17 + $0x280] sm:$0xff] }
 0x523   :  { %v4291_v8 = vadd.f32 %v4290_v7, %v4084_v4  ;;  %v4292_v9 = vpop.f32.mrb[14].mxu0  ;;  %v9080_v4 = vcombine.low %v5123_v1, %v5127_v2  ;;  %v5096_v1 = vld [vmem:[#allocation17 + $0x168] sm:$0xff] }
 0x524   :  { %v4293_v10 = vpop.f32.mrb[15].mxu0  ;;  %v4295_v13 = vpack.c.bf16 %v4289_v6, %v4289_v6  ;;  %v5135_v6 = vld [vmem:[#allocation17 + $0x2a0] sm:$0xff]  ;;  %v5104_v2 = vld [vmem:[#allocation17 + $0x1a8] sm:$0xff] }
 0x525   :  { %v4296_v12 = vpack.c.bf16 %v4291_v8, %v4291_v8  ;;  %v9089_v7 = vcombine.high %v5131_v5, %v5135_v6  ;;  %v9088_v8 = vcombine.low %v5131_v5, %v5135_v6  ;;  %v5139_v9 = vld [vmem:[#allocation17 + $0x2c0] sm:$0xff]  ;;  %v5108_v5 = vld [vmem:[#allocation17 + $0x1c8] sm:$0xff] }
 0x526   :  { %v5143_v10 = vld [vmem:[#allocation17 + $0x2e0] sm:$0xff]  ;;  %v5112_v6 = vld [vmem:[#allocation17 + $0x1e8] sm:$0xff] }
 0x527   :  { %4533 = vmatprep.mubr.bf16.mxu1 %v4296_v12  ;;  %v9097_v12 = vcombine.high %v5139_v9, %v5143_v10 }
 0x528   :  { %4534 = vmatmul.mubr.bf16.vlgmr.msra.gmra.mrb[12].mxu1 %v4295_v13  ;;  %v9096_v13 = vcombine.low %v5139_v9, %v5143_v10  ;;  %v5116_v9 = vld [vmem:[#allocation17 + $0x208] sm:$0xff] }
 0x529   :  { %5820 = vmatpush1.bf16.msra.mxu1 %v9008_v55  ;;  %v5155_v55 = vld [vmem:[#allocation17 + $0x340] sm:$0xff]  ;;  %v5120_v10 = vld [vmem:[#allocation17 + $0x228] sm:$0xff] }
 0x52a   :  { %5821 = vmatprep.subr.bf16.mxu1 %v9017_v29  ;;  %v9113_v14 = vcombine.high %v5155_v55, %v5159_v23  ;;  %v9112_v26 = vcombine.low %v5155_v55, %v5159_v23  ;;  %v5167_v29 = vld [vmem:[#allocation17 + $0x3a0] sm:$0xff]  ;;  %v5132_v55 = vld [vmem:[#allocation17 + $0x288] sm:$0xff] }
 0x52b   :  { %v9120_v31 = vcombine.low %v5163_v28, %v5167_v29  ;;  %v5136_v23 = vld [vmem:[#allocation17 + $0x2a8] sm:$0xff] }
 0x52d   :  { %5822 = vmatpush1.bf16.msra.mxu1 %v9016_v30  ;;  %v9121_v30 = vcombine.high %v5163_v28, %v5167_v29  ;;  %v5140_v28 = vld [vmem:[#allocation17 + $0x2c8] sm:$0xff] }
 0x52e   :  { %5823 = vmatprep.subr.bf16.mxu1 %v9025_v34  ;;  %v4334_v34 = vrot.slane %v4329_v32, %v11241_v18  ;;  %v5144_v29 = vld [vmem:[#allocation17 + $0x2e8] sm:$0xff] }
 0x531   :  { %5824 = vmatpush1.bf16.msra.mxu1 %v9024_v35  ;;  %v4338_v35 = vrot.slane %v4329_v32, %v11249_v20  ;;  %v5148_v32 = vld [vmem:[#allocation17 + $0x308] sm:$0xff] }
 0x532   :  { %5825 = vmatprep.subr.bf16.mxu1 %v9033_v38 }
 0x535   :  { %5826 = vmatpush1.bf16.msra.mxu1 %v9032_v39 }
 0x536   :  { %5827 = vmatprep.subr.bf16.mxu1 %v9041_v42  ;;  %v5064_v42 = vld [vmem:[#allocation17 + $0x68] sm:$0xff] }
 0x537   :  { %v9018_v19 = vcombine.low %v5060_v41, %v5064_v42 }
 0x539   :  { %5828 = vmatpush1.bf16.msra.mxu1 %v9040_v43 }
 0x53a   :  { %5829 = vmatprep.subr.bf16.mxu1 %v9049_v46  ;;  %v9019_v46 = vcombine.high %v5060_v41, %v5064_v42  ;;  %v5164_v41 = vld [vmem:[#allocation17 + $0x388] sm:$0xff] }
 0x53b   :  { %v5168_v42 = vld [vmem:[#allocation17 + $0x3a8] sm:$0xff] }
 0x53d   :  { %5830 = vmatpush1.bf16.msra.mxu1 %v9048_v47  ;;  %v5068_v47 = vld [vmem:[#allocation17 + $0x88] sm:$0xff] }
 0x53e   :  { %5831 = vmatprep.subr.bf16.mxu1 %v9057_v49  ;;  %v9027_v49 = vcombine.high %v5068_v47, %v5072_v48  ;;  %v9026_v53 = vcombine.low %v5068_v47, %v5072_v48  ;;  %v5175_v47 = vld [vmem:[#allocation17 + $0x3e0] sm:$0xff]  ;;  %v5172_v48 = vld [vmem:[#allocation17 + $0x3c8] sm:$0xff] }
 0x541   :  { %5832 = vmatpush1.bf16.msra.mxu1 %v9056_v50  ;;  %v5076_v50 = vld [vmem:[#allocation17 + $0xc8] sm:$0xff] }
 0x542   :  { %5833 = vmatprep.subr.bf16.mxu1 %v9065_v54  ;;  %v9035_v54 = vcombine.high %v5076_v50, %v5080_v52  ;;  %v9034_v62 = vcombine.low %v5076_v50, %v5080_v52 }
 0x545   :  { %5834 = vmatpush1.bf16.msra.mxu1 %v9064_v56  ;;  %v5084_v56 = vld [vmem:[#allocation17 + $0x108] sm:$0xff] }
 0x546   :  { %5835 = vmatprep.subr.bf16.mxu1 %v9073_v63  ;;  %v9043_v63 = vcombine.high %v5084_v56, %v5088_v58  ;;  %v9042_v22 = vcombine.low %v5084_v56, %v5088_v58  ;;  %v5057_v56 = vld [vmem:[#allocation17 + $0x30] sm:$0xff]  ;;  %v5054_v58 = vld [vmem:[#allocation17 + $0x18] sm:$0xff] }
 0x549   :  { %5836 = vmatpush1.bf16.msra.mxu1 %v9072_v0  ;;  %v5092_v0 = vld [vmem:[#allocation17 + $0x148] sm:$0xff] }
 0x54a   :  { %5837 = vmatprep.subr.bf16.mxu1 %v9081_v3  ;;  %v9051_v24 = vcombine.high %v5092_v0, %v5096_v1  ;;  %v9050_v3 = vcombine.low %v5092_v0, %v5096_v1 }
 0x54d   :  { %5838 = vmatpush1.bf16.msra.mxu1 %v9080_v4 }
 0x54e   :  { %5839 = vmatprep.subr.bf16.mxu1 %v9089_v7 }
 0x551   :  { %5840 = vmatpush1.bf16.msra.mxu1 %v9088_v8  ;;  %v9067_v8 = vcombine.high %v5108_v5, %v5112_v6 }
 0x552   :  { %5841 = vmatprep.subr.bf16.mxu1 %v9097_v12  ;;  %v9066_v12 = vcombine.low %v5108_v5, %v5112_v6 }
 0x555   :  { %5842 = vmatpush1.bf16.msra.mxu1 %v9096_v13  ;;  %v9075_v13 = vcombine.high %v5116_v9, %v5120_v10 }
 0x556   :  { %5843 = vmatprep.subr.bf16.mxu1 %v9105_v16  ;;  %v9074_v16 = vcombine.low %v5116_v9, %v5120_v10  ;;  %v5065_v10 = vld [vmem:[#allocation17 + $0x70] sm:$0xff] }
 0x559   :  { %5844 = vmatpush1.bf16.msra.mxu1 %v9104_v21  ;;  %v9083_v21 = vcombine.high %v5124_v15, %v5128_v51 }
 0x55a   :  { %5845 = vmatprep.subr.bf16.mxu1 %v9113_v14  ;;  %v9082_v14 = vcombine.low %v5124_v15, %v5128_v51 }
 0x55d   :  { %5846 = vmatpush1.bf16.msra.mxu1 %v9112_v26  ;;  %v9091_v26 = vcombine.high %v5132_v55, %v5136_v23 }
 0x55e   :  { %5847 = vmatprep.subr.bf16.mxu1 %v9121_v30  ;;  %v9090_v30 = vcombine.low %v5132_v55, %v5136_v23  ;;  %v5073_v23 = vld [vmem:[#allocation17 + $0xb0] sm:$0xff] }
 0x561   :  { %5848 = vmatpush1.bf16.msra.mxu1 %v9120_v31  ;;  %v9099_v31 = vcombine.high %v5140_v28, %v5144_v29 }
 0x5fb   :  { %v4535_v36 = vpop.f32.mrb[12].mxu1 }
 0x5fc   :  { %v4536_v37 = vadd.f32 %v4535_v36, %v4334_v34  ;;  %v4537_v38 = vpop.f32.mrb[13].mxu1  ;;  %v5152_v34 = vld [vmem:[#allocation17 + $0x328] sm:$0xff] }
 0x5fd   :  { %v4538_v39 = vadd.f32 %v4537_v38, %v4338_v35  ;;  %v4539_v40 = vpop.f32.mrb[14].mxu1  ;;  %v9098_v35 = vcombine.low %v5140_v28, %v5144_v29  ;;  %v9107_v36 = vcombine.high %v5148_v32, %v5152_v34  ;;  %v5160_v38 = vld [vmem:[#allocation17 + $0x368] sm:$0xff] }
 0x5fe   :  { %v4540_v43 = vpop.f32.mrb[15].mxu1  ;;  %v4542_v45 = vpack.c.bf16 %v4536_v37, %v4536_v37  ;;  %v5156_v37 = vld [vmem:[#allocation17 + $0x348] sm:$0xff] }
 0x5ff   :  { %v4543_v44 = vpack.c.bf16 %v4538_v39, %v4538_v39  ;;  %v9106_v39 = vcombine.low %v5148_v32, %v5152_v34  ;;  %v9115_v40 = vcombine.high %v5156_v37, %v5160_v38  ;;  %v9114_v43 = vcombine.low %v5156_v37, %v5160_v38  ;;  %v5077_v32 = vld [vmem:[#allocation17 + $0xd0] sm:$0xff] }
 0x600   :  { %v5081_v34 = vld [vmem:[#allocation17 + $0xf0] sm:$0xff] }
 0x601   :  { %4780 = vmatprep.mubr.bf16.mxu0 %v4543_v44  ;;  %v9123_v44 = vcombine.high %v5164_v41, %v5168_v42 }
 0x602   :  { %4781 = vmatmul.mubr.bf16.vlgmr.msra.gmra.mrb[16].mxu0 %v4542_v45  ;;  %v9122_v45 = vcombine.low %v5164_v41, %v5168_v42  ;;  %v5085_v41 = vld [vmem:[#allocation17 + $0x110] sm:$0xff] }
 0x603   :  { %5861 = vmatpush1.bf16.msra.mxu0 %v9010_v27  ;;  %v5100_v27 = vld [vmem:[#allocation17 + $0x188] sm:$0xff]  ;;  %v5089_v42 = vld [vmem:[#allocation17 + $0x130] sm:$0xff] }
 0x604   :  { %5862 = vmatprep.subr.bf16.mxu0 %v9019_v46  ;;  %v9059_v4 = vcombine.high %v5100_v27, %v5104_v2  ;;  %v9058_v7 = vcombine.low %v5100_v27, %v5104_v2  ;;  %v5171_v46 = vld [vmem:[#allocation17 + $0x3c0] sm:$0xff] }
 0x605   :  { %v9128_v50 = vcombine.low %v5171_v46, %v5175_v47 }
 0x607   :  { %5863 = vmatpush1.bf16.msra.mxu0 %v9018_v19  ;;  %v9129_v19 = vcombine.high %v5171_v46, %v5175_v47  ;;  %v9045_v47 = vcombine.high %v5085_v41, %v5089_v42 }
 0x608   :  { %5864 = vmatprep.subr.bf16.mxu0 %v9027_v49  ;;  %v5176_v49 = vld [vmem:[#allocation17 + $0x3e8] sm:$0xff] }
 0x609   :  { %v9130_v52 = vcombine.low %v5172_v48, %v5176_v49  ;;  %5849 = vmatprep.subr.bf16.mxu1 %v9129_v19  ;;  %v5093_v19 = vld [vmem:[#allocation17 + $0x150] sm:$0xff] }
 0x60a   :  { %5850 = vmatpush1.bf16.msra.mxu1 %v9128_v50  ;;  %v5094_v50 = vld [vmem:[#allocation17 + $0x158] sm:$0xff] }
 0x60b   :  { %5865 = vmatpush1.bf16.msra.mxu0 %v9026_v53  ;;  %v9131_v53 = vcombine.high %v5172_v48, %v5176_v49  ;;  %v5097_v49 = vld [vmem:[#allocation17 + $0x170] sm:$0xff] }
 0x60c   :  { %5866 = vmatprep.subr.bf16.mxu0 %v9035_v54  ;;  %v5053_v54 = vld [vmem:[#allocation17 + $0x10] sm:$0xff] }
 0x60d   :  { %v9012_v0 = vcombine.low %v5053_v54, %v5057_v56 }
 0x60f   :  { %5867 = vmatpush1.bf16.msra.mxu0 %v9034_v62  ;;  %v9013_v62 = vcombine.high %v5053_v54, %v5057_v56  ;;  %v9053_v56 = vcombine.high %v5093_v19, %v5097_v49 }
 0x610   :  { %5868 = vmatprep.subr.bf16.mxu0 %v9043_v63  ;;  %v5058_v63 = vld [vmem:[#allocation17 + $0x38] sm:$0xff] }
 0x611   :  { %v9014_v1 = vcombine.low %v5054_v58, %v5058_v63  ;;  %5901 = vmatprep.subr.bf16.mxu1 %v9013_v62  ;;  %v5101_v62 = vld [vmem:[#allocation17 + $0x190] sm:$0xff] }
 0x613   :  { %5869 = vmatpush1.bf16.msra.mxu0 %v9042_v22  ;;  %v9015_v22 = vcombine.high %v5054_v58, %v5058_v63  ;;  %v5105_v63 = vld [vmem:[#allocation17 + $0x1b0] sm:$0xff] }
 0x614   :  { %5870 = vmatprep.subr.bf16.mxu0 %v9051_v24  ;;  %v4576_v24 = vld [vmem:[%s11461_s12 + $0x10] sm:$0x3] }
 0x615   :  { %v4581_v27 = vrot.slane %v4576_v24, %v11241_v18  ;;  %v4585_v2 = vrot.slane %v4576_v24, %v11249_v20 }
 0x617   :  { %5871 = vmatpush1.bf16.msra.mxu0 %v9050_v3 }
 0x618   :  { %5872 = vmatprep.subr.bf16.mxu0 %v9059_v4 }
 0x61b   :  { %5873 = vmatpush1.bf16.msra.mxu0 %v9058_v7 }
 0x61c   :  { %5874 = vmatprep.subr.bf16.mxu0 %v9067_v8  ;;  %v5061_v8 = vld [vmem:[#allocation17 + $0x50] sm:$0xff] }
 0x61d   :  { %v9020_v28 = vcombine.low %v5061_v8, %v5065_v10 }
 0x61f   :  { %5875 = vmatpush1.bf16.msra.mxu0 %v9066_v12  ;;  %v5062_v12 = vld [vmem:[#allocation17 + $0x58] sm:$0xff] }
 0x620   :  { %5876 = vmatprep.subr.bf16.mxu0 %v9075_v13  ;;  %v5066_v13 = vld [vmem:[#allocation17 + $0x78] sm:$0xff] }
 0x621   :  { %v9023_v55 = vcombine.high %v5062_v12, %v5066_v13  ;;  %v9022_v29 = vcombine.low %v5062_v12, %v5066_v13  ;;  %v5117_v12 = vld [vmem:[#allocation17 + $0x210] sm:$0xff] }
 0x622   :  { %v5121_v13 = vld [vmem:[#allocation17 + $0x230] sm:$0xff] }
 0x623   :  { %5877 = vmatpush1.bf16.msra.mxu0 %v9074_v16  ;;  %v5069_v16 = vld [vmem:[#allocation17 + $0x90] sm:$0xff] }
 0x624   :  { %5878 = vmatprep.subr.bf16.mxu0 %v9083_v21  ;;  %v9021_v21 = vcombine.high %v5061_v8, %v5065_v10  ;;  %v9028_v37 = vcombine.low %v5069_v16, %v5073_v23 }
 0x627   :  { %5879 = vmatpush1.bf16.msra.mxu0 %v9082_v14  ;;  %v5070_v14 = vld [vmem:[#allocation17 + $0x98] sm:$0xff] }
 0x628   :  { %5880 = vmatprep.subr.bf16.mxu0 %v9091_v26  ;;  %v5074_v26 = vld [vmem:[#allocation17 + $0xb8] sm:$0xff] }
 0x629   :  { %v9030_v38 = vcombine.low %v5070_v14, %v5074_v26 }
 0x62b   :  { %5881 = vmatpush1.bf16.msra.mxu0 %v9090_v30  ;;  %v9029_v30 = vcombine.high %v5069_v16, %v5073_v23  ;;  %v5122_v16 = vld [vmem:[#allocation17 + $0x238] sm:$0xff]  ;;  %v9077_v23 = vcombine.high %v5117_v12, %v5121_v13 }
 0x62c   :  { %5882 = vmatprep.subr.bf16.mxu0 %v9099_v31  ;;  %v9031_v31 = vcombine.high %v5070_v14, %v5074_v26  ;;  %v5125_v26 = vld [vmem:[#allocation17 + $0x250] sm:$0xff] }
 0x62f   :  { %5883 = vmatpush1.bf16.msra.mxu0 %v9098_v35  ;;  %v5078_v35 = vld [vmem:[#allocation17 + $0xd8] sm:$0xff] }
 0x630   :  { %5884 = vmatprep.subr.bf16.mxu0 %v9107_v36  ;;  %v5082_v36 = vld [vmem:[#allocation17 + $0xf8] sm:$0xff] }
 0x631   :  { %v9038_v46 = vcombine.low %v5078_v35, %v5082_v36 }
 0x633   :  { %5885 = vmatpush1.bf16.msra.mxu0 %v9106_v39  ;;  %v9037_v39 = vcombine.high %v5077_v32, %v5081_v34 }
 0x634   :  { %5886 = vmatprep.subr.bf16.mxu0 %v9115_v40  ;;  %v9039_v40 = vcombine.high %v5078_v35, %v5082_v36  ;;  %v5133_v36 = vld [vmem:[#allocation17 + $0x290] sm:$0xff] }
 0x637   :  { %5887 = vmatpush1.bf16.msra.mxu0 %v9114_v43  ;;  %v5086_v43 = vld [vmem:[#allocation17 + $0x118] sm:$0xff] }
 0x638   :  { %5888 = vmatprep.subr.bf16.mxu0 %v9123_v44  ;;  %v5090_v44 = vld [vmem:[#allocation17 + $0x138] sm:$0xff] }
 0x639   :  { %v9047_v48 = vcombine.high %v5086_v43, %v5090_v44  ;;  %v9046_v54 = vcombine.low %v5086_v43, %v5090_v44  ;;  %v5141_v44 = vld [vmem:[#allocation17 + $0x2d0] sm:$0xff] }
 0x63b   :  { %5889 = vmatpush1.bf16.msra.mxu0 %v9122_v45  ;;  %v9036_v45 = vcombine.low %v5077_v32, %v5081_v34 }
 0x63c   :  { %5890 = vmatprep.subr.bf16.mxu0 %v9131_v53  ;;  %v9044_v53 = vcombine.low %v5085_v41, %v5089_v42 }
 0x63f   :  { %5891 = vmatpush1.bf16.msra.mxu0 %v9130_v52  ;;  %v5098_v52 = vld [vmem:[#allocation17 + $0x178] sm:$0xff] }
 0x640   :  { %5942 = vmatprep.subr.bf16.mxu0 %v9015_v22  ;;  %v9055_v58 = vcombine.high %v5094_v50, %v5098_v52  ;;  %v9052_v22 = vcombine.low %v5093_v19, %v5097_v49  ;;  %v9054_v24 = vcombine.low %v5094_v50, %v5098_v52  ;;  %v5149_v52 = vld [vmem:[#allocation17 + $0x310] sm:$0xff] }
 0x6d5   :  { %v4782_v3 = vpop.f32.mrb[16].mxu0 }
 0x6d6   :  { %v4783_v4 = vadd.f32 %v4782_v3, %v4581_v27  ;;  %v4784_v5 = vpop.f32.mrb[17].mxu0  ;;  %v9061_v27 = vcombine.high %v5101_v62, %v5105_v63  ;;  %v5109_v3 = vld [vmem:[#allocation17 + $0x1d0] sm:$0xff] }
 0x6d7   :  { %v4785_v6 = vadd.f32 %v4784_v5, %v4585_v2  ;;  %v4786_v7 = vpop.f32.mrb[18].mxu0  ;;  %v5110_v5 = vld [vmem:[#allocation17 + $0x1d8] sm:$0xff] }
 0x6d8   :  { %v4787_v9 = vpop.f32.mrb[19].mxu0  ;;  %v11331_v51 = vpack.c.bf16 %v4783_v4, %v4783_v4  ;;  %v5113_v4 = vld [vmem:[#allocation17 + $0x1f0] sm:$0xff]  ;;  %v9060_v7 = vcombine.low %v5101_v62, %v5105_v63 }
 0x6d9   :  { %v5050_v15 = vpack.c.bf16 %v4785_v6, %v4785_v6  ;;  %v5114_v6 = vld [vmem:[#allocation17 + $0x1f8] sm:$0xff]  ;;  %v9069_v9 = vcombine.high %v5109_v3, %v5113_v4 }
 0x6da   :  { %v9071_v10 = vcombine.high %v5110_v5, %v5114_v6 }
 0x6db   :  { %5851 = vmatprep.mubr.bf16.mxu1 %v5050_v15  ;;  %5892 = vmatprep.mubr.bf16.mxu0 %v5050_v15 }
 0x6dc   :  { %5852 = vmatmul.mubr.bf16.vlgmr.msra.gmra.mrb[16].mxu1 %v11331_v51  ;;  %5893 = vmatmul.mubr.bf16.vlgmr.msra.gmra.mrb[20].mxu0 %v11331_v51 }
 0x6dd   :  { %5902 = vmatpush1.bf16.msra.mxu1 %v9012_v0  ;;  %5943 = vmatpush1.bf16.msra.mxu0 %v9014_v1  ;;  %v5102_v0 = vld [vmem:[#allocation17 + $0x198] sm:$0xff] }
 0x6de   :  { %5933 = vmatprep.mubr.bf16.mxu1 %v5050_v15  ;;  %5974 = vmatprep.mubr.bf16.mxu0 %v5050_v15  ;;  %v5106_v1 = vld [vmem:[#allocation17 + $0x1b8] sm:$0xff] }
 0x6df   :  { %5903 = vmatprep.subr.bf16.mxu1 %v9021_v21  ;;  %5944 = vmatprep.subr.bf16.mxu0 %v9023_v55  ;;  %v9063_v2 = vcombine.high %v5102_v0, %v5106_v1  ;;  %v9062_v8 = vcombine.low %v5102_v0, %v5106_v1  ;;  %v5118_v15 = vld [vmem:[#allocation17 + $0x218] sm:$0xff]  ;;  %v9068_v21 = vcombine.low %v5109_v3, %v5113_v4  ;;  %v5157_v1 = vld [vmem:[#allocation17 + $0x350] sm:$0xff] }
 0x6e0   :  { %v9070_v55 = vcombine.low %v5110_v5, %v5114_v6  ;;  %v9079_v14 = vcombine.high %v5118_v15, %v5122_v16  ;;  %v9078_v32 = vcombine.low %v5118_v15, %v5122_v16  ;;  %v5165_v6 = vld [vmem:[#allocation17 + $0x390] sm:$0xff] }
 0x6e1   :  { %5904 = vmatpush1.bf16.msra.mxu1 %v9020_v28  ;;  %5945 = vmatpush1.bf16.msra.mxu0 %v9022_v29  ;;  %v5129_v28 = vld [vmem:[#allocation17 + $0x270] sm:$0xff]  ;;  %v5126_v29 = vld [vmem:[#allocation17 + $0x258] sm:$0xff] }
 0x6e2   :  { %5905 = vmatprep.subr.bf16.mxu1 %v9029_v30  ;;  %5946 = vmatprep.subr.bf16.mxu0 %v9031_v31  ;;  %v5130_v30 = vld [vmem:[#allocation17 + $0x278] sm:$0xff]  ;;  %v9076_v31 = vcombine.low %v5117_v12, %v5121_v13  ;;  %v9085_v34 = vcombine.high %v5125_v26, %v5129_v28  ;;  %v5173_v16 = vld [vmem:[#allocation17 + $0x3d0] sm:$0xff] }
 0x6e3   :  { %v9087_v35 = vcombine.high %v5126_v29, %v5130_v30  ;;  %v9086_v41 = vcombine.low %v5126_v29, %v5130_v30  ;;  %v4793_v30 = vld [vmem:[#allocation16] sm:$0xff] }
 0x6e5   :  { %5906 = vmatpush1.bf16.msra.mxu1 %v9028_v37  ;;  %5947 = vmatpush1.bf16.msra.mxu0 %v9030_v38  ;;  %v5137_v37 = vld [vmem:[#allocation17 + $0x2b0] sm:$0xff]  ;;  %v5134_v38 = vld [vmem:[#allocation17 + $0x298] sm:$0xff] }
 0x6e6   :  { %5907 = vmatprep.subr.bf16.mxu1 %v9037_v39  ;;  %5948 = vmatprep.subr.bf16.mxu0 %v9039_v40  ;;  %v5138_v39 = vld [vmem:[#allocation17 + $0x2b8] sm:$0xff]  ;;  %v9084_v40 = vcombine.low %v5125_v26, %v5129_v28  ;;  %v9093_v42 = vcombine.high %v5133_v36, %v5137_v37 }
 0x6e7   :  { %v9095_v43 = vcombine.high %v5134_v38, %v5138_v39  ;;  %v9094_v19 = vcombine.low %v5134_v38, %v5138_v39 }
 0x6e9   :  { %5908 = vmatpush1.bf16.msra.mxu1 %v9036_v45  ;;  %5949 = vmatpush1.bf16.msra.mxu0 %v9038_v46  ;;  %v5145_v45 = vld [vmem:[#allocation17 + $0x2f0] sm:$0xff]  ;;  %v5142_v46 = vld [vmem:[#allocation17 + $0x2d8] sm:$0xff] }
 0x6ea   :  { %5909 = vmatprep.subr.bf16.mxu1 %v9045_v47  ;;  %5950 = vmatprep.subr.bf16.mxu0 %v9047_v48  ;;  %v5146_v47 = vld [vmem:[#allocation17 + $0x2f8] sm:$0xff]  ;;  %v9092_v48 = vcombine.low %v5133_v36, %v5137_v37  ;;  %v9101_v49 = vcombine.high %v5141_v44, %v5145_v45  ;;  %v3233_v36 = vrot.slane %v11293_v25, %v11252_v11 }
 0x6eb   :  { %v9103_v50 = vcombine.high %v5142_v46, %v5146_v47  ;;  %v9102_v62 = vcombine.low %v5142_v46, %v5146_v47  ;;  %v4933_v46 = vld [vmem:[#allocation16 + $0x460] sm:$0xff] }
 0x6ed   :  { %5910 = vmatpush1.bf16.msra.mxu1 %v9044_v53  ;;  %5951 = vmatpush1.bf16.msra.mxu0 %v9046_v54  ;;  %v5153_v53 = vld [vmem:[#allocation17 + $0x330] sm:$0xff]  ;;  %v5150_v54 = vld [vmem:[#allocation17 + $0x318] sm:$0xff] }
 0x6ee   :  { %5911 = vmatprep.subr.bf16.mxu1 %v9053_v56  ;;  %5952 = vmatprep.subr.bf16.mxu0 %v9055_v58  ;;  %v5154_v56 = vld [vmem:[#allocation17 + $0x338] sm:$0xff]  ;;  %v9100_v58 = vcombine.low %v5141_v44, %v5145_v45  ;;  %v9109_v63 = vcombine.high %v5149_v52, %v5153_v53  ;;  %v4805_v44 = vld [vmem:[#allocation16 + $0x60] sm:$0xff] }
 0x6ef   :  { %v9111_v0 = vcombine.high %v5150_v54, %v5154_v56  ;;  %v9110_v3 = vcombine.low %v5150_v54, %v5154_v56  ;;  %v4929_v45 = vld [vmem:[#allocation16 + $0x440] sm:$0xff] }
 0x6f0   :  { %v9272_v56 = vcombine.low %v4929_v45, %v4933_v46 }
 0x6f1   :  { %5912 = vmatpush1.bf16.msra.mxu1 %v9052_v22  ;;  %5953 = vmatpush1.bf16.msra.mxu0 %v9054_v24  ;;  %v5161_v22 = vld [vmem:[#allocation17 + $0x370] sm:$0xff]  ;;  %v5158_v24 = vld [vmem:[#allocation17 + $0x358] sm:$0xff] }
 0x6f2   :  { %5913 = vmatprep.subr.bf16.mxu1 %v9061_v27  ;;  %5954 = vmatprep.subr.bf16.mxu0 %v9063_v2  ;;  %v5162_v27 = vld [vmem:[#allocation17 + $0x378] sm:$0xff]  ;;  %v9108_v2 = vcombine.low %v5149_v52, %v5153_v53  ;;  %v9117_v4 = vcombine.high %v5157_v1, %v5161_v22  ;;  %v4813_v52 = vld [vmem:[#allocation16 + $0xa0] sm:$0xff] }
 0x6f3   :  { %v9119_v5 = vcombine.high %v5158_v24, %v5162_v27  ;;  %v9118_v12 = vcombine.low %v5158_v24, %v5162_v27 }
 0x6f5   :  { %5914 = vmatpush1.bf16.msra.mxu1 %v9060_v7  ;;  %5955 = vmatpush1.bf16.msra.mxu0 %v9062_v8  ;;  %v5169_v7 = vld [vmem:[#allocation17 + $0x3b0] sm:$0xff]  ;;  %v5166_v8 = vld [vmem:[#allocation17 + $0x398] sm:$0xff] }
 0x6f6   :  { %5915 = vmatprep.subr.bf16.mxu1 %v9069_v9  ;;  %5956 = vmatprep.subr.bf16.mxu0 %v9071_v10  ;;  %v5170_v9 = vld [vmem:[#allocation17 + $0x3b8] sm:$0xff]  ;;  %v9116_v10 = vcombine.low %v5157_v1, %v5161_v22  ;;  %v9125_v13 = vcombine.high %v5165_v6, %v5169_v7  ;;  %v4945_v1 = vld [vmem:[#allocation16 + $0x4c0] sm:$0xff] }
 0x6f7   :  { %v9127_v15 = vcombine.high %v5166_v8, %v5170_v9  ;;  %v9126_v26 = vcombine.low %v5166_v8, %v5170_v9  ;;  %v4949_v22 = vld [vmem:[#allocation16 + $0x4e0] sm:$0xff] }
 0x6f8   :  { %v9288_v8 = vcombine.low %v4945_v1, %v4949_v22 }
 0x6f9   :  { %5916 = vmatpush1.bf16.msra.mxu1 %v9068_v21  ;;  %5957 = vmatpush1.bf16.msra.mxu0 %v9070_v55  ;;  %v5177_v21 = vld [vmem:[#allocation17 + $0x3f0] sm:$0xff]  ;;  %v5174_v55 = vld [vmem:[#allocation17 + $0x3d8] sm:$0xff] }
 0x6fa   :  { %5917 = vmatprep.subr.bf16.mxu1 %v9077_v23  ;;  %5958 = vmatprep.subr.bf16.mxu0 %v9079_v14  ;;  %v5178_v23 = vld [vmem:[#allocation17 + $0x3f8] sm:$0xff]  ;;  %v9124_v14 = vcombine.low %v5165_v6, %v5169_v7  ;;  %v9133_v28 = vcombine.high %v5173_v16, %v5177_v21  ;;  %v9132_v37 = vcombine.low %v5173_v16, %v5177_v21  ;;  %v4957_v6 = vld [vmem:[#allocation16 + $0x520] sm:$0xff] }
 0x6fb   :  { %v9135_v29 = vcombine.high %v5174_v55, %v5178_v23  ;;  %v9134_v38 = vcombine.low %v5174_v55, %v5178_v23  ;;  %v4965_v16 = vld [vmem:[#allocation16 + $0x560] sm:$0xff] }
 0x6fd   :  { %5918 = vmatpush1.bf16.msra.mxu1 %v9076_v31  ;;  %5959 = vmatpush1.bf16.msra.mxu0 %v9078_v32  ;;  %v3225_v31 = vrot.slane %v11293_v25, %v11249_v20  ;;  %v4797_v32 = vld [vmem:[#allocation16 + $0x20] sm:$0xff] }
 0x6fe   :  { %5919 = vmatprep.subr.bf16.mxu1 %v9085_v34  ;;  %5960 = vmatprep.subr.bf16.mxu0 %v9087_v35  ;;  %v4921_v34 = vld [vmem:[#allocation16 + $0x400] sm:$0xff]  ;;  %v9137_v39 = vcombine.high %v4793_v30, %v4797_v32  ;;  %v9136_v47 = vcombine.low %v4793_v30, %v4797_v32 }
 0x6ff   :  { %v4925_v35 = vld [vmem:[#allocation16 + $0x420] sm:$0xff] }
 0x700   :  { %v9264_v25 = vcombine.low %v4921_v34, %v4925_v35  ;;  %v4973_v30 = vld [vmem:[#allocation16 + $0x5a0] sm:$0xff] }
 0x701   :  { %5920 = vmatpush1.bf16.msra.mxu1 %v9084_v40  ;;  %5961 = vmatpush1.bf16.msra.mxu0 %v9086_v41  ;;  %v9265_v40 = vcombine.high %v4921_v34, %v4925_v35  ;;  %v9555_v41 = vadd.f32 %v11301_v60, %v3225_v31  ;;  %v4937_v60 = vld [vmem:[#allocation16 + $0x480] sm:$0xff] }
 0x702   :  { %5921 = vmatprep.subr.bf16.mxu1 %v9093_v42  ;;  %5962 = vmatprep.subr.bf16.mxu0 %v9095_v43  ;;  %v4801_v42 = vld [vmem:[#allocation16 + $0x40] sm:$0xff]  ;;  %v9557_v43 = vadd.f32 %v11303_v61, %v3233_v36 }
 0x703   :  { %v4941_v61 = vld [vmem:[#allocation16 + $0x4a0] sm:$0xff]  ;;  %v9144_v54 = vcombine.low %v4801_v42, %v4805_v44 }
 0x704   :  { %v11343_v53 = vpack.c.bf16 %v9557_v43, %v9557_v43  ;;  %v9280_v24 = vcombine.low %v4937_v60, %v4941_v61  ;;  %v4849_v36 = vld [vmem:[#allocation16 + $0x1c0] sm:$0xff] }
 0x705   :  { %5922 = vmatpush1.bf16.msra.mxu1 %v9092_v48  ;;  %5963 = vmatpush1.bf16.msra.mxu0 %v9094_v19  ;;  %v11341_v48 = vpack.c.bf16 %v9555_v41, %v9555_v41  ;;  %v9145_v19 = vcombine.high %v4801_v42, %v4805_v44  ;;  %v4857_v44 = vld [vmem:[#allocation16 + $0x200] sm:$0xff] }
 0x706   :  { %5923 = vmatprep.subr.bf16.mxu1 %v9101_v49  ;;  %5964 = vmatprep.subr.bf16.mxu0 %v9103_v50  ;;  %v9273_v49 = vcombine.high %v4929_v45, %v4933_v46  ;;  %v4809_v50 = vld [vmem:[#allocation16 + $0x80] sm:$0xff] }
 0x707   :  { %v4861_v45 = vld [vmem:[#allocation16 + $0x220] sm:$0xff] }
 0x708   :  { %v4985_v46 = vld [vmem:[#allocation16 + $0x600] sm:$0xff] }
 0x709   :  { %5924 = vmatpush1.bf16.msra.mxu1 %v9100_v58  ;;  %5965 = vmatpush1.bf16.msra.mxu0 %v9102_v62  ;;  %v9153_v58 = vcombine.high %v4809_v50, %v4813_v52  ;;  %v9281_v62 = vcombine.high %v4937_v60, %v4941_v61  ;;  %v4869_v60 = vld [vmem:[#allocation16 + $0x260] sm:$0xff] }
 0x70a   :  { %5925 = vmatprep.subr.bf16.mxu1 %v9109_v63  ;;  %5966 = vmatprep.subr.bf16.mxu0 %v9111_v0  ;;  %v4817_v63 = vld [vmem:[#allocation16 + $0xc0] sm:$0xff] }
 0x70b   :  { %v4821_v0 = vld [vmem:[#allocation16 + $0xe0] sm:$0xff] }
 0x70c   :  { %v9161_v27 = vcombine.high %v4817_v63, %v4821_v0  ;;  %v9160_v7 = vcombine.low %v4817_v63, %v4821_v0  ;;  %v4993_v61 = vld [vmem:[#allocation16 + $0x640] sm:$0xff] }
 0x70d   :  { %5926 = vmatpush1.bf16.msra.mxu1 %v9108_v2  ;;  %5967 = vmatpush1.bf16.msra.mxu0 %v9110_v3  ;;  %v9289_v2 = vcombine.high %v4945_v1, %v4949_v22  ;;  %v4825_v3 = vld [vmem:[#allocation16 + $0x100] sm:$0xff] }
 0x70e   :  { %5927 = vmatprep.subr.bf16.mxu1 %v9117_v4  ;;  %5968 = vmatprep.subr.bf16.mxu0 %v9119_v5  ;;  %v4829_v4 = vld [vmem:[#allocation16 + $0x120] sm:$0xff] }
 0x70f   :  { %v4953_v5 = vld [vmem:[#allocation16 + $0x500] sm:$0xff]  ;;  %v9169_v9 = vcombine.high %v4825_v3, %v4829_v4  ;;  %v9168_v21 = vcombine.low %v4825_v3, %v4829_v4 }
 0x710   :  { %v9296_v55 = vcombine.low %v4953_v5, %v4957_v6  ;;  %v4873_v0 = vld [vmem:[#allocation16 + $0x280] sm:$0xff] }
 0x711   :  { %5928 = vmatpush1.bf16.msra.mxu1 %v9116_v10  ;;  %5969 = vmatpush1.bf16.msra.mxu0 %v9118_v12  ;;  %v9297_v10 = vcombine.high %v4953_v5, %v4957_v6  ;;  %v4833_v12 = vld [vmem:[#allocation16 + $0x140] sm:$0xff] }
 0x712   :  { %5929 = vmatprep.subr.bf16.mxu1 %v9125_v13  ;;  %5970 = vmatprep.subr.bf16.mxu0 %v9127_v15  ;;  %v4837_v13 = vld [vmem:[#allocation16 + $0x160] sm:$0xff] }
 0x713   :  { %v4961_v15 = vld [vmem:[#allocation16 + $0x540] sm:$0xff]  ;;  %v9177_v23 = vcombine.high %v4833_v12, %v4837_v13  ;;  %v9176_v31 = vcombine.low %v4833_v12, %v4837_v13 }
 0x714   :  { %v9304_v32 = vcombine.low %v4961_v15, %v4965_v16  ;;  %v4877_v1 = vld [vmem:[#allocation16 + $0x2a0] sm:$0xff] }
 0x715   :  { %5930 = vmatpush1.bf16.msra.mxu1 %v9124_v14  ;;  %5971 = vmatpush1.bf16.msra.mxu0 %v9126_v26  ;;  %v9305_v14 = vcombine.high %v4961_v15, %v4965_v16  ;;  %v4841_v26 = vld [vmem:[#allocation16 + $0x180] sm:$0xff] }
 0x716   :  { %5931 = vmatprep.subr.bf16.mxu1 %v9133_v28  ;;  %5972 = vmatprep.subr.bf16.mxu0 %v9135_v29  ;;  %v4845_v28 = vld [vmem:[#allocation16 + $0x1a0] sm:$0xff] }
 0x717   :  { %v4969_v29 = vld [vmem:[#allocation16 + $0x580] sm:$0xff]  ;;  %v9185_v34 = vcombine.high %v4841_v26, %v4845_v28 }
 0x718   :  { %v9313_v35 = vcombine.high %v4969_v29, %v4973_v30  ;;  %v9312_v41 = vcombine.low %v4969_v29, %v4973_v30  ;;  %v5001_v22 = vld [vmem:[#allocation16 + $0x680] sm:$0xff] }
 0x719   :  { %5932 = vmatpush1.bf16.msra.mxu1 %v9132_v37  ;;  %5973 = vmatpush1.bf16.msra.mxu0 %v9134_v38  ;;  %v4853_v37 = vld [vmem:[#allocation16 + $0x1e0] sm:$0xff] }
 0x71a   :  { %7263 = vmatprep.subr.bf16.mxu1 %v9137_v39  ;;  %7304 = vmatprep.subr.bf16.mxu0 %v9265_v40  ;;  %v4977_v38 = vld [vmem:[#allocation16 + $0x5c0] sm:$0xff]  ;;  %v9184_v40 = vcombine.low %v4841_v26, %v4845_v28  ;;  %v9193_v42 = vcombine.high %v4849_v36, %v4853_v37 }
 0x71b   :  { %v4981_v39 = vld [vmem:[#allocation16 + $0x5e0] sm:$0xff] }
 0x71c   :  { %5934 = vmatmul.mubr.bf16.vlgmr.msra.gmra.mrb[20].mxu1 %v11331_v51  ;;  %5975 = vmatmul.mubr.bf16.vlgmr.msra.gmra.mrb[24].mxu0 %v11331_v51  ;;  %v9152_v51 = vcombine.low %v4809_v50, %v4813_v52  ;;  %v9321_v43 = vcombine.high %v4977_v38, %v4981_v39  ;;  %v4865_v52 = vld [vmem:[#allocation16 + $0x240] sm:$0xff] }
 0x71d   :  { %7264 = vmatpush1.bf16.msra.mxu1 %v9136_v47  ;;  %7295 = vmatprep.mubr.bf16.mxu1 %v11341_v48  ;;  %v4989_v47 = vld [vmem:[#allocation16 + $0x620] sm:$0xff] }
 0x71e   :  { %7305 = vmatpush1.bf16.msra.mxu0 %v9264_v25  ;;  %7336 = vmatprep.mubr.bf16.mxu0 %v11343_v53  ;;  %v9192_v25 = vcombine.low %v4849_v36, %v4853_v37  ;;  %v9329_v50 = vcombine.high %v4985_v46, %v4989_v47  ;;  %v4881_v4 = vld [vmem:[#allocation16 + $0x2c0] sm:$0xff] }
 0x71f   :  { %7265 = vmatprep.subr.bf16.mxu1 %v9145_v19  ;;  %7306 = vmatprep.subr.bf16.mxu0 %v9273_v49  ;;  %v9320_v19 = vcombine.low %v4977_v38, %v4981_v39  ;;  %v9201_v49 = vcombine.high %v4857_v44, %v4861_v45  ;;  %v4885_v5 = vld [vmem:[#allocation16 + $0x2e0] sm:$0xff] }
 0x720   :  { %v5009_v6 = vld [vmem:[#allocation16 + $0x6c0] sm:$0xff] }
 0x721   :  { %7266 = vmatpush1.bf16.msra.mxu1 %v9144_v54  ;;  %v4997_v54 = vld [vmem:[#allocation16 + $0x660] sm:$0xff] }
 0x722   :  { %7307 = vmatpush1.bf16.msra.mxu0 %v9272_v56  ;;  %7267 = vmatprep.subr.bf16.mxu1 %v9153_v58  ;;  %v9200_v56 = vcombine.low %v4857_v44, %v4861_v45  ;;  %v9328_v58 = vcombine.low %v4985_v46, %v4989_v47  ;;  %v9337_v63 = vcombine.high %v4993_v61, %v4997_v54  ;;  %v4889_v13 = vld [vmem:[#allocation16 + $0x300] sm:$0xff] }
 0x723   :  { %7308 = vmatprep.subr.bf16.mxu0 %v9281_v62  ;;  %v9209_v62 = vcombine.high %v4865_v52, %v4869_v60  ;;  %v4893_v15 = vld [vmem:[#allocation16 + $0x320] sm:$0xff] }
 0x724   :  { %v5017_v16 = vld [vmem:[#allocation16 + $0x700] sm:$0xff] }
 0x725   :  { %7268 = vmatpush1.bf16.msra.mxu1 %v9152_v51  ;;  %v5005_v51 = vld [vmem:[#allocation16 + $0x6a0] sm:$0xff] }
 0x726   :  { %7309 = vmatpush1.bf16.msra.mxu0 %v9280_v24  ;;  %7269 = vmatprep.subr.bf16.mxu1 %v9161_v27  ;;  %v9208_v24 = vcombine.low %v4865_v52, %v4869_v60  ;;  %v9336_v27 = vcombine.low %v4993_v61, %v4997_v54  ;;  %v9345_v3 = vcombine.high %v5001_v22, %v5005_v51  ;;  %v4897_v28 = vld [vmem:[#allocation16 + $0x340] sm:$0xff]  ;;  %v4794_v54 = vld [vmem:[#allocation16 + $0x8] sm:$0xff] }
 0x727   :  { %7310 = vmatprep.subr.bf16.mxu0 %v9289_v2  ;;  %v9217_v2 = vcombine.high %v4873_v0, %v4877_v1  ;;  %v4901_v29 = vld [vmem:[#allocation16 + $0x360] sm:$0xff] }
 0x728   :  { %v5025_v30 = vld [vmem:[#allocation16 + $0x740] sm:$0xff] }
 0x729   :  { %7270 = vmatpush1.bf16.msra.mxu1 %v9160_v7  ;;  %v5013_v7 = vld [vmem:[#allocation16 + $0x6e0] sm:$0xff] }
 0x72a   :  { %7311 = vmatpush1.bf16.msra.mxu0 %v9288_v8  ;;  %7271 = vmatprep.subr.bf16.mxu1 %v9169_v9  ;;  %v9216_v8 = vcombine.low %v4873_v0, %v4877_v1  ;;  %v9344_v9 = vcombine.low %v5001_v22, %v5005_v51  ;;  %v9353_v12 = vcombine.high %v5009_v6, %v5013_v7  ;;  %v4905_v37 = vld [vmem:[#allocation16 + $0x380] sm:$0xff] }
 0x72b   :  { %7312 = vmatprep.subr.bf16.mxu0 %v9297_v10  ;;  %v9225_v10 = vcombine.high %v4881_v4, %v4885_v5  ;;  %v4909_v38 = vld [vmem:[#allocation16 + $0x3a0] sm:$0xff] }
 0x72c   :  { %v5033_v39 = vld [vmem:[#allocation16 + $0x780] sm:$0xff] }
 0x72d   :  { %7272 = vmatpush1.bf16.msra.mxu1 %v9168_v21  ;;  %v5021_v21 = vld [vmem:[#allocation16 + $0x720] sm:$0xff] }
 0x72e   :  { %7313 = vmatpush1.bf16.msra.mxu0 %v9296_v55  ;;  %7273 = vmatprep.subr.bf16.mxu1 %v9177_v23  ;;  %v9224_v55 = vcombine.low %v4881_v4, %v4885_v5  ;;  %v9352_v23 = vcombine.low %v5009_v6, %v5013_v7  ;;  %v9361_v26 = vcombine.high %v5017_v16, %v5021_v21  ;;  %v4913_v45 = vld [vmem:[#allocation16 + $0x3c0] sm:$0xff]  ;;  %v4934_v4 = vld [vmem:[#allocation16 + $0x468] sm:$0xff] }
 0x72f   :  { %7314 = vmatprep.subr.bf16.mxu0 %v9305_v14  ;;  %v9233_v14 = vcombine.high %v4889_v13, %v4893_v15  ;;  %v4917_v46 = vld [vmem:[#allocation16 + $0x3e0] sm:$0xff] }
 0x730   :  { %v5041_v47 = vld [vmem:[#allocation16 + $0x7c0] sm:$0xff]  ;;  %v9257_v60 = vcombine.high %v4913_v45, %v4917_v46 }
 0x731   :  { %7274 = vmatpush1.bf16.msra.mxu1 %v9176_v31  ;;  %v5029_v31 = vld [vmem:[#allocation16 + $0x760] sm:$0xff] }
 0x732   :  { %7315 = vmatpush1.bf16.msra.mxu0 %v9304_v32  ;;  %7275 = vmatprep.subr.bf16.mxu1 %v9185_v34  ;;  %v9232_v32 = vcombine.low %v4889_v13, %v4893_v15  ;;  %v9360_v34 = vcombine.low %v5017_v16, %v5021_v21  ;;  %v9369_v36 = vcombine.high %v5025_v30, %v5029_v31  ;;  %v4942_v13 = vld [vmem:[#allocation16 + $0x4a8] sm:$0xff] }
 0x733   :  { %7316 = vmatprep.subr.bf16.mxu0 %v9313_v35  ;;  %v9241_v35 = vcombine.high %v4897_v28, %v4901_v29 }
 0x735   :  { %7276 = vmatpush1.bf16.msra.mxu1 %v9184_v40  ;;  %v5037_v40 = vld [vmem:[#allocation16 + $0x7a0] sm:$0xff] }
 0x736   :  { %7317 = vmatpush1.bf16.msra.mxu0 %v9312_v41  ;;  %7277 = vmatprep.subr.bf16.mxu1 %v9193_v42  ;;  %v9240_v41 = vcombine.low %v4897_v28, %v4901_v29  ;;  %v9368_v42 = vcombine.low %v5025_v30, %v5029_v31  ;;  %v9377_v44 = vcombine.high %v5033_v39, %v5037_v40 }
 0x737   :  { %7318 = vmatprep.subr.bf16.mxu0 %v9321_v43  ;;  %v9249_v43 = vcombine.high %v4905_v37, %v4909_v38  ;;  %v9376_v52 = vcombine.low %v5033_v39, %v5037_v40 }
 0x739   :  { %7278 = vmatpush1.bf16.msra.mxu1 %v9192_v25  ;;  %v5045_v25 = vld [vmem:[#allocation16 + $0x7e0] sm:$0xff] }
 0x73a   :  { %7319 = vmatpush1.bf16.msra.mxu0 %v9320_v19  ;;  %7279 = vmatprep.subr.bf16.mxu1 %v9201_v49  ;;  %v9248_v19 = vcombine.low %v4905_v37, %v4909_v38  ;;  %v10614_v49 = vld [vmem:[%s11461_s12 + $0x8] sm:$0xf]  ;;  %v9385_v61 = vcombine.high %v5041_v47, %v5045_v25  ;;  %v9384_v1 = vcombine.low %v5041_v47, %v5045_v25 }
 0x73b   :  { %7320 = vmatprep.subr.bf16.mxu0 %v9329_v50  ;;  %v3221_v50 = vrot.slane %v10614_v49, %v11241_v18  ;;  %v4846_v49 = vld [vmem:[#allocation16 + $0x1a8] sm:$0xff] }
 0x73d   :  { %7280 = vmatpush1.bf16.msra.mxu1 %v9200_v56  ;;  %v4798_v56 = vld [vmem:[#allocation16 + $0x28] sm:$0xff]  ;;  %v9554_v0 = vadd.f32 %v11297_v57, %v3221_v50  ;;  %v11358_v57 = vpack.c.bf16 %v11299_v59, %v11299_v59 }
 0x73e   :  { %7321 = vmatpush1.bf16.msra.mxu0 %v9328_v58  ;;  %7281 = vmatprep.subr.bf16.mxu1 %v9209_v62  ;;  %v4922_v58 = vld [vmem:[#allocation16 + $0x408] sm:$0xff]  ;;  %v9139_v22 = vcombine.high %v4794_v54, %v4798_v56 }
 0x73f   :  { %7322 = vmatprep.subr.bf16.mxu0 %v9337_v63  ;;  %v4926_v62 = vld [vmem:[#allocation16 + $0x428] sm:$0xff]  ;;  %v9256_v63 = vcombine.low %v4913_v45, %v4917_v46  ;;  %v11354_v5 = vpack.c.bf16 %v9554_v0, %v9554_v0 }
 0x740   :  { %v9267_v51 = vcombine.high %v4922_v58, %v4926_v62  ;;  %v9266_v6 = vcombine.low %v4922_v58, %v4926_v62  ;;  %v4970_v50 = vld [vmem:[#allocation16 + $0x588] sm:$0xff] }
 0x741   :  { %7282 = vmatpush1.bf16.msra.mxu1 %v9208_v24  ;;  %v4802_v24 = vld [vmem:[#allocation16 + $0x48] sm:$0xff] }
 0x742   :  { %7323 = vmatpush1.bf16.msra.mxu0 %v9336_v27  ;;  %7283 = vmatprep.subr.bf16.mxu1 %v9217_v2  ;;  %v4806_v27 = vld [vmem:[#allocation16 + $0x68] sm:$0xff]  ;;  %v9138_v2 = vcombine.low %v4794_v54, %v4798_v56 }
 0x743   :  { %7324 = vmatprep.subr.bf16.mxu0 %v9345_v3  ;;  %v4930_v3 = vld [vmem:[#allocation16 + $0x448] sm:$0xff]  ;;  %v9147_v7 = vcombine.high %v4802_v24, %v4806_v27  ;;  %v9146_v15 = vcombine.low %v4802_v24, %v4806_v27 }
 0x744   :  { %v9274_v16 = vcombine.low %v4930_v3, %v4934_v4  ;;  %v4850_v58 = vld [vmem:[#allocation16 + $0x1c8] sm:$0xff] }
 0x745   :  { %7284 = vmatpush1.bf16.msra.mxu1 %v9216_v8  ;;  %v4810_v8 = vld [vmem:[#allocation16 + $0x88] sm:$0xff] }
 0x746   :  { %7325 = vmatpush1.bf16.msra.mxu0 %v9344_v9  ;;  %7285 = vmatprep.subr.bf16.mxu1 %v9225_v10  ;;  %v4814_v9 = vld [vmem:[#allocation16 + $0xa8] sm:$0xff]  ;;  %v9275_v10 = vcombine.high %v4930_v3, %v4934_v4 }
 0x747   :  { %7326 = vmatprep.subr.bf16.mxu0 %v9353_v12  ;;  %v4938_v12 = vld [vmem:[#allocation16 + $0x488] sm:$0xff]  ;;  %v9155_v21 = vcombine.high %v4810_v8, %v4814_v9  ;;  %v9154_v28 = vcombine.low %v4810_v8, %v4814_v9 }
 0x748   :  { %v9283_v59 = vcombine.high %v4938_v12, %v4942_v13  ;;  %v9282_v29 = vcombine.low %v4938_v12, %v4942_v13  ;;  %v4854_v62 = vld [vmem:[#allocation16 + $0x1e8] sm:$0xff] }
 0x749   :  { %7286 = vmatpush1.bf16.msra.mxu1 %v9224_v55  ;;  %v4818_v55 = vld [vmem:[#allocation16 + $0xc8] sm:$0xff] }
 0x74a   :  { %7327 = vmatpush1.bf16.msra.mxu0 %v9352_v23  ;;  %7287 = vmatprep.subr.bf16.mxu1 %v9233_v14  ;;  %v4822_v23 = vld [vmem:[#allocation16 + $0xe8] sm:$0xff] }
 0x74b   :  { %7328 = vmatprep.subr.bf16.mxu0 %v9361_v26  ;;  %v4946_v14 = vld [vmem:[#allocation16 + $0x4c8] sm:$0xff]  ;;  %v9163_v30 = vcombine.high %v4818_v55, %v4822_v23  ;;  %v9162_v37 = vcombine.low %v4818_v55, %v4822_v23 }
 0x74c   :  { %v4950_v26 = vld [vmem:[#allocation16 + $0x4e8] sm:$0xff] }
 0x74d   :  { %7288 = vmatpush1.bf16.msra.mxu1 %v9232_v32  ;;  %v9291_v31 = vcombine.high %v4946_v14, %v4950_v26  ;;  %v4826_v32 = vld [vmem:[#allocation16 + $0x108] sm:$0xff]  ;;  %v9290_v38 = vcombine.low %v4946_v14, %v4950_v26 }
 0x74e   :  { %7329 = vmatpush1.bf16.msra.mxu0 %v9360_v34  ;;  %7289 = vmatprep.subr.bf16.mxu1 %v9241_v35  ;;  %v4830_v34 = vld [vmem:[#allocation16 + $0x128] sm:$0xff] }
 0x74f   :  { %7330 = vmatprep.subr.bf16.mxu0 %v9369_v36  ;;  %v4954_v35 = vld [vmem:[#allocation16 + $0x508] sm:$0xff]  ;;  %v9171_v39 = vcombine.high %v4826_v32, %v4830_v34  ;;  %v9170_v45 = vcombine.low %v4826_v32, %v4830_v34 }
 0x750   :  { %v4958_v36 = vld [vmem:[#allocation16 + $0x528] sm:$0xff] }
 0x751   :  { %7290 = vmatpush1.bf16.msra.mxu1 %v9240_v41  ;;  %v9299_v40 = vcombine.high %v4954_v35, %v4958_v36  ;;  %v4834_v41 = vld [vmem:[#allocation16 + $0x148] sm:$0xff]  ;;  %v9298_v46 = vcombine.low %v4954_v35, %v4958_v36 }
 0x752   :  { %7331 = vmatpush1.bf16.msra.mxu0 %v9368_v42  ;;  %7291 = vmatprep.subr.bf16.mxu1 %v9249_v43  ;;  %v4838_v42 = vld [vmem:[#allocation16 + $0x168] sm:$0xff] }
 0x753   :  { %7332 = vmatprep.subr.bf16.mxu0 %v9377_v44  ;;  %v4962_v43 = vld [vmem:[#allocation16 + $0x548] sm:$0xff]  ;;  %v9179_v47 = vcombine.high %v4834_v41, %v4838_v42 }
 0x754   :  { %v4966_v44 = vld [vmem:[#allocation16 + $0x568] sm:$0xff] }
 0x755   :  { %7292 = vmatpush1.bf16.msra.mxu1 %v9248_v19  ;;  %v9307_v25 = vcombine.high %v4962_v43, %v4966_v44  ;;  %v4842_v19 = vld [vmem:[#allocation16 + $0x188] sm:$0xff] }
 0x756   :  { %7333 = vmatpush1.bf16.msra.mxu0 %v9376_v52  ;;  %7293 = vmatprep.subr.bf16.mxu1 %v9257_v60  ;;  %v4974_v52 = vld [vmem:[#allocation16 + $0x5a8] sm:$0xff]  ;;  %v9178_v60 = vcombine.low %v4834_v41, %v4838_v42  ;;  %v9187_v54 = vcombine.high %v4842_v19, %v4846_v49 }
 0x757   :  { %7334 = vmatprep.subr.bf16.mxu0 %v9385_v61  ;;  %v9306_v61 = vcombine.low %v4962_v43, %v4966_v44  ;;  %v9315_v56 = vcombine.high %v4970_v50, %v4974_v52  ;;  %v4982_v0 = vld [vmem:[#allocation16 + $0x5e8] sm:$0xff] }
 0x758   :  { %v4858_v27 = vld [vmem:[#allocation16 + $0x208] sm:$0xff] }
 0x759   :  { %7294 = vmatpush1.bf16.msra.mxu1 %v9256_v63  ;;  %v4978_v63 = vld [vmem:[#allocation16 + $0x5c8] sm:$0xff] }
 0x75a   :  { %7335 = vmatpush1.bf16.msra.mxu0 %v9384_v1  ;;  %7345 = vmatprep.subr.bf16.mxu1 %v9139_v22  ;;  %v9186_v1 = vcombine.low %v4842_v19, %v4846_v49  ;;  %v9314_v22 = vcombine.low %v4970_v50, %v4974_v52  ;;  %v9323_v24 = vcombine.high %v4978_v63, %v4982_v0  ;;  %v4986_v3 = vld [vmem:[#allocation16 + $0x608] sm:$0xff] }
 0x75b   :  { %7386 = vmatprep.subr.bf16.mxu0 %v9267_v51  ;;  %v9195_v51 = vcombine.high %v4850_v58, %v4854_v62  ;;  %v4990_v4 = vld [vmem:[#allocation16 + $0x628] sm:$0xff] }
 0x75c   :  { %7296 = vmatmul.mubr.bf16.vlgmr.msra.gmra.mrb[24].mxu1 %v11354_v5  ;;  %v9331_v9 = vcombine.high %v4986_v3, %v4990_v4  ;;  %v4870_v12 = vld [vmem:[#allocation16 + $0x268] sm:$0xff] }
 0x75d   :  { %7337 = vmatmul.mubr.bf16.vlgmr.msra.gmra.mrb[28].mxu0 %v11358_v57  ;;  %7346 = vmatpush1.bf16.msra.mxu1 %v9138_v2  ;;  %v4862_v2 = vld [vmem:[#allocation16 + $0x228] sm:$0xff] }
 0x75e   :  { %7377 = vmatprep.mubr.bf16.mxu1 %v11341_v48  ;;  %7387 = vmatpush1.bf16.msra.mxu0 %v9266_v6  ;;  %v9194_v6 = vcombine.low %v4850_v58, %v4854_v62  ;;  %v9203_v8 = vcombine.high %v4858_v27, %v4862_v2  ;;  %v4994_v13 = vld [vmem:[#allocation16 + $0x648] sm:$0xff] }
 0x75f   :  { %7418 = vmatprep.mubr.bf16.mxu0 %v11343_v53  ;;  %7347 = vmatprep.subr.bf16.mxu1 %v9147_v7  ;;  %v9322_v7 = vcombine.low %v4978_v63, %v4982_v0  ;;  %v4874_v23 = vld [vmem:[#allocation16 + $0x288] sm:$0xff] }
 0x760   :  { %7388 = vmatprep.subr.bf16.mxu0 %v9275_v10  ;;  %v4866_v10 = vld [vmem:[#allocation16 + $0x248] sm:$0xff] }
 0x761   :  { %7348 = vmatpush1.bf16.msra.mxu1 %v9146_v15  ;;  %v4998_v15 = vld [vmem:[#allocation16 + $0x668] sm:$0xff] }
 0x762   :  { %7389 = vmatpush1.bf16.msra.mxu0 %v9274_v16  ;;  %7349 = vmatprep.subr.bf16.mxu1 %v9155_v21  ;;  %v9202_v16 = vcombine.low %v4858_v27, %v4862_v2  ;;  %v9330_v21 = vcombine.low %v4986_v3, %v4990_v4  ;;  %v9339_v55 = vcombine.high %v4994_v13, %v4998_v15  ;;  %v4878_v14 = vld [vmem:[#allocation16 + $0x2a8] sm:$0xff] }
 0x763   :  { %7390 = vmatprep.subr.bf16.mxu0 %v9283_v59  ;;  %v9211_v59 = vcombine.high %v4866_v10, %v4870_v12  ;;  %v5002_v26 = vld [vmem:[#allocation16 + $0x688] sm:$0xff] }
 0x764   :  { %v4882_v34 = vld [vmem:[#allocation16 + $0x2c8] sm:$0xff] }
 0x765   :  { %7350 = vmatpush1.bf16.msra.mxu1 %v9154_v28  ;;  %v5006_v28 = vld [vmem:[#allocation16 + $0x6a8] sm:$0xff] }
 0x766   :  { %7391 = vmatpush1.bf16.msra.mxu0 %v9282_v29  ;;  %7351 = vmatprep.subr.bf16.mxu1 %v9163_v30  ;;  %v9210_v29 = vcombine.low %v4866_v10, %v4870_v12  ;;  %v9338_v30 = vcombine.low %v4994_v13, %v4998_v15  ;;  %v9347_v32 = vcombine.high %v5002_v26, %v5006_v28  ;;  %v4886_v35 = vld [vmem:[#allocation16 + $0x2e8] sm:$0xff]  ;;  %v4795_v12 = vld [vmem:[#allocation16 + $0x10] sm:$0xff] }
 0x767   :  { %7392 = vmatprep.subr.bf16.mxu0 %v9291_v31  ;;  %v9219_v31 = vcombine.high %v4874_v23, %v4878_v14  ;;  %v5010_v36 = vld [vmem:[#allocation16 + $0x6c8] sm:$0xff]  ;;  %v4799_v13 = vld [vmem:[#allocation16 + $0x30] sm:$0xff] }
 0x768   :  { %v4890_v42 = vld [vmem:[#allocation16 + $0x308] sm:$0xff]  ;;  %v4923_v15 = vld [vmem:[#allocation16 + $0x410] sm:$0xff] }
 0x769   :  { %7352 = vmatpush1.bf16.msra.mxu1 %v9162_v37  ;;  %v5014_v37 = vld [vmem:[#allocation16 + $0x6e8] sm:$0xff] }
 0x76a   :  { %7393 = vmatpush1.bf16.msra.mxu0 %v9290_v38  ;;  %7353 = vmatprep.subr.bf16.mxu1 %v9171_v39  ;;  %v9218_v38 = vcombine.low %v4874_v23, %v4878_v14  ;;  %v9346_v39 = vcombine.low %v5002_v26, %v5006_v28  ;;  %v9355_v41 = vcombine.high %v5010_v36, %v5014_v37  ;;  %v4894_v43 = vld [vmem:[#allocation16 + $0x328] sm:$0xff]  ;;  %v4803_v14 = vld [vmem:[#allocation16 + $0x50] sm:$0xff] }
 0x76b   :  { %7394 = vmatprep.subr.bf16.mxu0 %v9299_v40  ;;  %v9227_v40 = vcombine.high %v4882_v34, %v4886_v35  ;;  %v5018_v44 = vld [vmem:[#allocation16 + $0x708] sm:$0xff]  ;;  %v4807_v26 = vld [vmem:[#allocation16 + $0x70] sm:$0xff]  ;;  %v9140_v28 = vcombine.low %v4795_v12, %v4799_v13 }
 0x76c   :  { %v4898_v49 = vld [vmem:[#allocation16 + $0x348] sm:$0xff] }
 0x76d   :  { %7354 = vmatpush1.bf16.msra.mxu1 %v9170_v45  ;;  %v5022_v45 = vld [vmem:[#allocation16 + $0x728] sm:$0xff] }
 0x76e   :  { %7395 = vmatpush1.bf16.msra.mxu0 %v9298_v46  ;;  %7355 = vmatprep.subr.bf16.mxu1 %v9179_v47  ;;  %v9226_v46 = vcombine.low %v4882_v34, %v4886_v35  ;;  %v9354_v47 = vcombine.low %v5010_v36, %v5014_v37  ;;  %v9363_v19 = vcombine.high %v5018_v44, %v5022_v45  ;;  %v4902_v50 = vld [vmem:[#allocation16 + $0x368] sm:$0xff]  ;;  %v4811_v34 = vld [vmem:[#allocation16 + $0x90] sm:$0xff] }
 0x76f   :  { %7396 = vmatprep.subr.bf16.mxu0 %v9307_v25  ;;  %v9235_v25 = vcombine.high %v4890_v42, %v4894_v43  ;;  %v5026_v52 = vld [vmem:[#allocation16 + $0x748] sm:$0xff]  ;;  %v4815_v35 = vld [vmem:[#allocation16 + $0xb0] sm:$0xff] }
 0x770   :  { %v4906_v62 = vld [vmem:[#allocation16 + $0x388] sm:$0xff]  ;;  %v4939_v37 = vld [vmem:[#allocation16 + $0x490] sm:$0xff] }
 0x771   :  { %7356 = vmatpush1.bf16.msra.mxu1 %v9178_v60  ;;  %v5030_v60 = vld [vmem:[#allocation16 + $0x768] sm:$0xff] }
 0x772   :  { %7397 = vmatpush1.bf16.msra.mxu0 %v9306_v61  ;;  %7357 = vmatprep.subr.bf16.mxu1 %v9187_v54  ;;  %v9234_v61 = vcombine.low %v4890_v42, %v4894_v43  ;;  %v9362_v54 = vcombine.low %v5018_v44, %v5022_v45  ;;  %v9371_v58 = vcombine.high %v5026_v52, %v5030_v60  ;;  %v4910_v63 = vld [vmem:[#allocation16 + $0x3a8] sm:$0xff]  ;;  %v4819_v43 = vld [vmem:[#allocation16 + $0xd0] sm:$0xff] }
 0x773   :  { %7398 = vmatprep.subr.bf16.mxu0 %v9315_v56  ;;  %v9243_v56 = vcombine.high %v4898_v49, %v4902_v50  ;;  %v5034_v0 = vld [vmem:[#allocation16 + $0x788] sm:$0xff]  ;;  %v4823_v44 = vld [vmem:[#allocation16 + $0xf0] sm:$0xff] }
 0x774   :  { %v4914_v2 = vld [vmem:[#allocation16 + $0x3c8] sm:$0xff]  ;;  %v4947_v45 = vld [vmem:[#allocation16 + $0x4d0] sm:$0xff] }
 0x775   :  { %7358 = vmatpush1.bf16.msra.mxu1 %v9186_v1  ;;  %v5038_v1 = vld [vmem:[#allocation16 + $0x7a8] sm:$0xff] }
 0x776   :  { %7399 = vmatpush1.bf16.msra.mxu0 %v9314_v22  ;;  %7359 = vmatprep.subr.bf16.mxu1 %v9195_v51  ;;  %v9242_v22 = vcombine.low %v4898_v49, %v4902_v50  ;;  %v9370_v51 = vcombine.low %v5026_v52, %v5030_v60  ;;  %v9379_v27 = vcombine.high %v5034_v0, %v5038_v1  ;;  %v4918_v3 = vld [vmem:[#allocation16 + $0x3e8] sm:$0xff]  ;;  %v4827_v50 = vld [vmem:[#allocation16 + $0x110] sm:$0xff] }
 0x777   :  { %7400 = vmatprep.subr.bf16.mxu0 %v9323_v24  ;;  %v9251_v24 = vcombine.high %v4906_v62, %v4910_v63  ;;  %v5042_v4 = vld [vmem:[#allocation16 + $0x7c8] sm:$0xff]  ;;  %v4831_v52 = vld [vmem:[#allocation16 + $0x130] sm:$0xff] }
 0x778   :  { %v4955_v60 = vld [vmem:[#allocation16 + $0x510] sm:$0xff] }
 0x779   :  { %7360 = vmatpush1.bf16.msra.mxu1 %v9194_v6  ;;  %v5046_v6 = vld [vmem:[#allocation16 + $0x7e8] sm:$0xff] }
 0x77a   :  { %7401 = vmatpush1.bf16.msra.mxu0 %v9322_v7  ;;  %7361 = vmatprep.subr.bf16.mxu1 %v9203_v8  ;;  %v9250_v7 = vcombine.low %v4906_v62, %v4910_v63  ;;  %v9378_v8 = vcombine.low %v5034_v0, %v5038_v1  ;;  %v9387_v10 = vcombine.high %v5042_v4, %v5046_v6  ;;  %v4835_v63 = vld [vmem:[#allocation16 + $0x150] sm:$0xff] }
 0x77b   :  { %7402 = vmatprep.subr.bf16.mxu0 %v9331_v9  ;;  %v9259_v9 = vcombine.high %v4914_v2, %v4918_v3  ;;  %v4839_v0 = vld [vmem:[#allocation16 + $0x170] sm:$0xff] }
 0x77c   :  { %v4963_v1 = vld [vmem:[#allocation16 + $0x550] sm:$0xff] }
 0x77d   :  { %7362 = vmatpush1.bf16.msra.mxu1 %v9202_v16  ;;  %v4927_v16 = vld [vmem:[#allocation16 + $0x430] sm:$0xff] }
 0x77e   :  { %7403 = vmatpush1.bf16.msra.mxu0 %v9330_v21  ;;  %7363 = vmatprep.subr.bf16.mxu1 %v9211_v59  ;;  %v9258_v21 = vcombine.low %v4914_v2, %v4918_v3  ;;  %v9386_v59 = vcombine.low %v5042_v4, %v5046_v6  ;;  %v9269_v23 = vcombine.high %v4923_v15, %v4927_v16  ;;  %v4843_v3 = vld [vmem:[#allocation16 + $0x190] sm:$0xff] }
 0x77f   :  { %7404 = vmatprep.subr.bf16.mxu0 %v9339_v55  ;;  %v9141_v55 = vcombine.high %v4795_v12, %v4799_v13  ;;  %v4847_v4 = vld [vmem:[#allocation16 + $0x1b0] sm:$0xff] }
 0x780   :  { %v4971_v6 = vld [vmem:[#allocation16 + $0x590] sm:$0xff] }
 0x781   :  { %7364 = vmatpush1.bf16.msra.mxu1 %v9210_v29  ;;  %v4931_v29 = vld [vmem:[#allocation16 + $0x450] sm:$0xff] }
 0x782   :  { %7405 = vmatpush1.bf16.msra.mxu0 %v9338_v30  ;;  %7365 = vmatprep.subr.bf16.mxu1 %v9219_v31  ;;  %v4935_v30 = vld [vmem:[#allocation16 + $0x470] sm:$0xff]  ;;  %v9268_v31 = vcombine.low %v4923_v15, %v4927_v16 }
 0x783   :  { %7406 = vmatprep.subr.bf16.mxu0 %v9347_v32  ;;  %v9149_v32 = vcombine.high %v4803_v14, %v4807_v26  ;;  %v9277_v36 = vcombine.high %v4931_v29, %v4935_v30  ;;  %v4851_v16 = vld [vmem:[#allocation16 + $0x1d0] sm:$0xff] }
 0x785   :  { %7366 = vmatpush1.bf16.msra.mxu1 %v9218_v38  ;;  %v4943_v38 = vld [vmem:[#allocation16 + $0x4b0] sm:$0xff] }
 0x786   :  { %7407 = vmatpush1.bf16.msra.mxu0 %v9346_v39  ;;  %7367 = vmatprep.subr.bf16.mxu1 %v9227_v40  ;;  %v9148_v39 = vcombine.low %v4803_v14, %v4807_v26  ;;  %v9276_v40 = vcombine.low %v4931_v29, %v4935_v30  ;;  %v9285_v42 = vcombine.high %v4939_v37, %v4943_v38  ;;  %v4983_v14 = vld [vmem:[#allocation16 + $0x5f0] sm:$0xff] }
 0x787   :  { %7408 = vmatprep.subr.bf16.mxu0 %v9355_v41  ;;  %v9157_v41 = vcombine.high %v4811_v34, %v4815_v35  ;;  %v9188_v29 = vcombine.low %v4843_v3, %v4847_v4 }
 0x789   :  { %7368 = vmatpush1.bf16.msra.mxu1 %v9226_v46  ;;  %v4951_v46 = vld [vmem:[#allocation16 + $0x4f0] sm:$0xff] }
 0x78a   :  { %7409 = vmatpush1.bf16.msra.mxu0 %v9354_v47  ;;  %7369 = vmatprep.subr.bf16.mxu1 %v9235_v25  ;;  %v9156_v47 = vcombine.low %v4811_v34, %v4815_v35  ;;  %v9284_v25 = vcombine.low %v4939_v37, %v4943_v38  ;;  %v9293_v49 = vcombine.high %v4947_v45, %v4951_v46  ;;  %v4863_v37 = vld [vmem:[#allocation16 + $0x230] sm:$0xff] }
 0x78b   :  { %7410 = vmatprep.subr.bf16.mxu0 %v9363_v19  ;;  %v9165_v19 = vcombine.high %v4819_v43, %v4823_v44  ;;  %v4987_v38 = vld [vmem:[#allocation16 + $0x610] sm:$0xff] }
 0x78d   :  { %7370 = vmatpush1.bf16.msra.mxu1 %v9234_v61  ;;  %v4959_v61 = vld [vmem:[#allocation16 + $0x530] sm:$0xff] }
 0x78e   :  { %7411 = vmatpush1.bf16.msra.mxu0 %v9362_v54  ;;  %7371 = vmatprep.subr.bf16.mxu1 %v9243_v56  ;;  %v9164_v54 = vcombine.low %v4819_v43, %v4823_v44  ;;  %v9292_v56 = vcombine.low %v4947_v45, %v4951_v46  ;;  %v9301_v62 = vcombine.high %v4955_v60, %v4959_v61  ;;  %v4867_v44 = vld [vmem:[#allocation16 + $0x250] sm:$0xff] }
 0x78f   :  { %7412 = vmatprep.subr.bf16.mxu0 %v9371_v58  ;;  %v9173_v58 = vcombine.high %v4827_v50, %v4831_v52  ;;  %v4871_v45 = vld [vmem:[#allocation16 + $0x270] sm:$0xff] }
 0x790   :  { %v4995_v46 = vld [vmem:[#allocation16 + $0x650] sm:$0xff] }
 0x791   :  { %7372 = vmatpush1.bf16.msra.mxu1 %v9242_v22  ;;  %v4967_v22 = vld [vmem:[#allocation16 + $0x570] sm:$0xff] }
 0x792   :  { %7413 = vmatpush1.bf16.msra.mxu0 %v9370_v51  ;;  %7373 = vmatprep.subr.bf16.mxu1 %v9251_v24  ;;  %v9172_v51 = vcombine.low %v4827_v50, %v4831_v52  ;;  %v9300_v24 = vcombine.low %v4955_v60, %v4959_v61  ;;  %v9309_v2 = vcombine.high %v4963_v1, %v4967_v22  ;;  %v4875_v52 = vld [vmem:[#allocation16 + $0x290] sm:$0xff] }
 0x793   :  { %7414 = vmatprep.subr.bf16.mxu0 %v9379_v27  ;;  %v9181_v27 = vcombine.high %v4835_v63, %v4839_v0  ;;  %v4879_v60 = vld [vmem:[#allocation16 + $0x2b0] sm:$0xff] }
 0x794   :  { %v5003_v61 = vld [vmem:[#allocation16 + $0x690] sm:$0xff] }
 0x795   :  { %7374 = vmatpush1.bf16.msra.mxu1 %v9250_v7  ;;  %v4975_v7 = vld [vmem:[#allocation16 + $0x5b0] sm:$0xff] }
 0x796   :  { %7415 = vmatpush1.bf16.msra.mxu0 %v9378_v8  ;;  %7375 = vmatprep.subr.bf16.mxu1 %v9259_v9  ;;  %v9180_v8 = vcombine.low %v4835_v63, %v4839_v0  ;;  %v9308_v9 = vcombine.low %v4963_v1, %v4967_v22  ;;  %v9317_v15 = vcombine.high %v4971_v6, %v4975_v7  ;;  %v4883_v0 = vld [vmem:[#allocation16 + $0x2d0] sm:$0xff] }
 0x797   :  { %7416 = vmatprep.subr.bf16.mxu0 %v9387_v10  ;;  %v9189_v10 = vcombine.high %v4843_v3, %v4847_v4  ;;  %v4887_v1 = vld [vmem:[#allocation16 + $0x2f0] sm:$0xff] }
 0x798   :  { %v5011_v22 = vld [vmem:[#allocation16 + $0x6d0] sm:$0xff] }
 0x799   :  { %7376 = vmatpush1.bf16.msra.mxu1 %v9258_v21  ;;  %v4855_v21 = vld [vmem:[#allocation16 + $0x1f0] sm:$0xff] }
 0x79a   :  { %7417 = vmatpush1.bf16.msra.mxu0 %v9386_v59  ;;  %7427 = vmatprep.subr.bf16.mxu1 %v9141_v55  ;;  %v9197_v34 = vcombine.high %v4851_v16, %v4855_v21  ;;  %v4891_v4 = vld [vmem:[#allocation16 + $0x310] sm:$0xff] }
 0x79b   :  { %7468 = vmatprep.subr.bf16.mxu0 %v9269_v23  ;;  %v4979_v23 = vld [vmem:[#allocation16 + $0x5d0] sm:$0xff] }
 0x79c   :  { %7378 = vmatmul.mubr.bf16.vlgmr.msra.gmra.mrb[28].mxu1 %v11354_v5  ;;  %v9325_v35 = vcombine.high %v4979_v23, %v4983_v14 }
 0x79d   :  { %7419 = vmatmul.mubr.bf16.vlgmr.msra.gmra.mrb[32].mxu0 %v11358_v57  ;;  %7428 = vmatpush1.bf16.msra.mxu1 %v9140_v28 }
 0x79e   :  { %7459 = vmatprep.mubr.bf16.mxu1 %v11341_v48  ;;  %7469 = vmatpush1.bf16.msra.mxu0 %v9268_v31 }
 0x79f   :  { %7500 = vmatprep.mubr.bf16.mxu0 %v11343_v53  ;;  %7429 = vmatprep.subr.bf16.mxu1 %v9149_v32  ;;  %v9316_v32 = vcombine.low %v4971_v6, %v4975_v7  ;;  %v4895_v6 = vld [vmem:[#allocation16 + $0x330] sm:$0xff] }
 0x7a0   :  { %7470 = vmatprep.subr.bf16.mxu0 %v9277_v36  ;;  %v4859_v36 = vld [vmem:[#allocation16 + $0x210] sm:$0xff] }
 0x7a1   :  { %7430 = vmatpush1.bf16.msra.mxu1 %v9148_v39  ;;  %v4991_v39 = vld [vmem:[#allocation16 + $0x630] sm:$0xff] }
 0x7a2   :  { %7471 = vmatpush1.bf16.msra.mxu0 %v9276_v40  ;;  %7431 = vmatprep.subr.bf16.mxu1 %v9157_v41  ;;  %v9196_v40 = vcombine.low %v4851_v16, %v4855_v21  ;;  %v9324_v41 = vcombine.low %v4979_v23, %v4983_v14  ;;  %v9333_v43 = vcombine.high %v4987_v38, %v4991_v39  ;;  %v5019_v7 = vld [vmem:[#allocation16 + $0x710] sm:$0xff] }
 0x7a3   :  { %7472 = vmatprep.subr.bf16.mxu0 %v9285_v42  ;;  %v9205_v42 = vcombine.high %v4859_v36, %v4863_v37  ;;  %v4899_v21 = vld [vmem:[#allocation16 + $0x350] sm:$0xff] }
 0x7a4   :  { %v4903_v23 = vld [vmem:[#allocation16 + $0x370] sm:$0xff] }
 0x7a5   :  { %7432 = vmatpush1.bf16.msra.mxu1 %v9156_v47  ;;  %v4999_v47 = vld [vmem:[#allocation16 + $0x670] sm:$0xff] }
 0x7a6   :  { %7473 = vmatpush1.bf16.msra.mxu0 %v9284_v25  ;;  %7433 = vmatprep.subr.bf16.mxu1 %v9165_v19  ;;  %v9204_v25 = vcombine.low %v4859_v36, %v4863_v37  ;;  %v9332_v19 = vcombine.low %v4987_v38, %v4991_v39  ;;  %v9341_v50 = vcombine.high %v4995_v46, %v4999_v47  ;;  %v5027_v14 = vld [vmem:[#allocation16 + $0x750] sm:$0xff] }
 0x7a7   :  { %7474 = vmatprep.subr.bf16.mxu0 %v9293_v49  ;;  %v9213_v49 = vcombine.high %v4867_v44, %v4871_v45  ;;  %v5039_v36 = vld [vmem:[#allocation16 + $0x7b0] sm:$0xff]  ;;  %v9244_v37 = vcombine.low %v4899_v21, %v4903_v23 }
 0x7a9   :  { %7434 = vmatpush1.bf16.msra.mxu1 %v9164_v54  ;;  %v5007_v54 = vld [vmem:[#allocation16 + $0x6b0] sm:$0xff] }
 0x7aa   :  { %7475 = vmatpush1.bf16.msra.mxu0 %v9292_v56  ;;  %7435 = vmatprep.subr.bf16.mxu1 %v9173_v58  ;;  %v9212_v56 = vcombine.low %v4867_v44, %v4871_v45  ;;  %v9340_v58 = vcombine.low %v4995_v46, %v4999_v47  ;;  %v9349_v63 = vcombine.high %v5003_v61, %v5007_v54  ;;  %v5047_v44 = vld [vmem:[#allocation16 + $0x7f0] sm:$0xff] }
 0x7ab   :  { %7476 = vmatprep.subr.bf16.mxu0 %v9301_v62  ;;  %v9221_v62 = vcombine.high %v4875_v52, %v4879_v60 }
 0x7ad   :  { %7436 = vmatpush1.bf16.msra.mxu1 %v9172_v51  ;;  %v5015_v51 = vld [vmem:[#allocation16 + $0x6f0] sm:$0xff] }
 0x7ae   :  { %7477 = vmatpush1.bf16.msra.mxu0 %v9300_v24  ;;  %7437 = vmatprep.subr.bf16.mxu1 %v9181_v27  ;;  %v9220_v24 = vcombine.low %v4875_v52, %v4879_v60  ;;  %v9348_v27 = vcombine.low %v5003_v61, %v5007_v54  ;;  %v9357_v3 = vcombine.high %v5011_v22, %v5015_v51  ;;  %v4928_v52 = vld [vmem:[#allocation16 + $0x438] sm:$0xff] }
 0x7af   :  { %v11368_v12 = vpop.f32.mrb[16].mxu1  ;;  %v11370_v13 = vpop.f32.mrb[20].mxu0  ;;  %7478 = vmatprep.subr.bf16.mxu0 %v9309_v2  ;;  %v9229_v2 = vcombine.high %v4883_v0, %v4887_v1 }
 0x7b0   :  { %v11372_v59 = vpop.f32.mrb[17].mxu1  ;;  %v11374_v55 = vpop.f32.mrb[21].mxu0 }
 0x7b1   :  { %7438 = vmatpush1.bf16.msra.mxu1 %v9180_v8  ;;  %v5857_v26 = vpop.f32.mrb[18].mxu1  ;;  %v5898_v28 = vpop.f32.mrb[22].mxu0  ;;  %v5023_v8 = vld [vmem:[#allocation16 + $0x730] sm:$0xff] }
 0x7b2   :  { %7479 = vmatpush1.bf16.msra.mxu0 %v9308_v9  ;;  %v5858_v30 = vpop.f32.mrb[19].mxu1  ;;  %v5899_v31 = vpop.f32.mrb[23].mxu0  ;;  %7439 = vmatprep.subr.bf16.mxu1 %v9189_v10  ;;  %v9228_v9 = vcombine.low %v4883_v0, %v4887_v1  ;;  %v9356_v10 = vcombine.low %v5011_v22, %v5015_v51  ;;  %v9365_v16 = vcombine.high %v5019_v7, %v5023_v8  ;;  %v5031_v26 = vld [vmem:[#allocation16 + $0x770] sm:$0xff]  ;;  %v4932_v0 = vld [vmem:[#allocation16 + $0x458] sm:$0xff] }
 0x7b3   :  { %7480 = vmatprep.subr.bf16.mxu0 %v9317_v15  ;;  %v9237_v15 = vcombine.high %v4891_v4, %v4895_v6  ;;  %v9236_v28 = vcombine.low %v4891_v4, %v4895_v6  ;;  %v9245_v30 = vcombine.high %v4899_v21, %v4903_v23  ;;  %v9373_v31 = vcombine.high %v5027_v14, %v5031_v26  ;;  %v4936_v1 = vld [vmem:[#allocation16 + $0x478] sm:$0xff] }
 0x7b4   :  { %v9372_v38 = vcombine.low %v5027_v14, %v5031_v26  ;;  %v4944_v4 = vld [vmem:[#allocation16 + $0x4b8] sm:$0xff] }
 0x7b5   :  { %7440 = vmatpush1.bf16.msra.mxu1 %v9188_v29  ;;  %v9364_v29 = vcombine.low %v5019_v7, %v5023_v8  ;;  %v9278_v7 = vcombine.low %v4932_v0, %v4936_v1  ;;  %v4952_v21 = vld [vmem:[#allocation16 + $0x4f8] sm:$0xff] }
 0x7b6   :  { %7481 = vmatpush1.bf16.msra.mxu0 %v9316_v32  ;;  %7441 = vmatprep.subr.bf16.mxu1 %v9197_v34  ;;  %v4907_v32 = vld [vmem:[#allocation16 + $0x390] sm:$0xff] }
 0x7b7   :  { %7482 = vmatprep.subr.bf16.mxu0 %v9325_v35  ;;  %v4911_v34 = vld [vmem:[#allocation16 + $0x3b0] sm:$0xff] }
 0x7b8   :  { %v5035_v35 = vld [vmem:[#allocation16 + $0x790] sm:$0xff]  ;;  %v9253_v39 = vcombine.high %v4907_v32, %v4911_v34  ;;  %v9252_v45 = vcombine.low %v4907_v32, %v4911_v34 }
 0x7b9   :  { %7442 = vmatpush1.bf16.msra.mxu1 %v9196_v40  ;;  %v9381_v40 = vcombine.high %v5035_v35, %v5039_v36  ;;  %v9380_v46 = vcombine.low %v5035_v35, %v5039_v36  ;;  %v4836_v36 = vld [vmem:[#allocation16 + $0x158] sm:$0xff] }
 0x7ba   :  { %7483 = vmatpush1.bf16.msra.mxu0 %v9324_v41  ;;  %7443 = vmatprep.subr.bf16.mxu1 %v9205_v42  ;;  %v4915_v41 = vld [vmem:[#allocation16 + $0x3d0] sm:$0xff] }
 0x7bb   :  { %7484 = vmatprep.subr.bf16.mxu0 %v9333_v43  ;;  %v4919_v42 = vld [vmem:[#allocation16 + $0x3f0] sm:$0xff] }
 0x7bc   :  { %v5043_v43 = vld [vmem:[#allocation16 + $0x7d0] sm:$0xff]  ;;  %v9261_v47 = vcombine.high %v4915_v41, %v4919_v42  ;;  %v9260_v60 = vcombine.low %v4915_v41, %v4919_v42 }
 0x7bd   :  { %7444 = vmatpush1.bf16.msra.mxu1 %v9204_v25  ;;  %v9389_v25 = vcombine.high %v5043_v43, %v5047_v44  ;;  %v9388_v61 = vcombine.low %v5043_v43, %v5047_v44  ;;  %v4844_v44 = vld [vmem:[#allocation16 + $0x198] sm:$0xff] }
 0x7be   :  { %7485 = vmatpush1.bf16.msra.mxu0 %v9332_v19  ;;  %7445 = vmatprep.subr.bf16.mxu1 %v9213_v49  ;;  %v4796_v19 = vld [vmem:[#allocation16 + $0x18] sm:$0xff] }
 0x7bf   :  { %7486 = vmatprep.subr.bf16.mxu0 %v9341_v50  ;;  %v4800_v49 = vld [vmem:[#allocation16 + $0x38] sm:$0xff] }
 0x7c0   :  { %v4924_v50 = vld [vmem:[#allocation16 + $0x418] sm:$0xff]  ;;  %v9143_v54 = vcombine.high %v4796_v19, %v4800_v49 }
 0x7c1   :  { %7446 = vmatpush1.bf16.msra.mxu1 %v9212_v56  ;;  %v9271_v56 = vcombine.high %v4924_v50, %v4928_v52  ;;  %v9270_v22 = vcombine.low %v4924_v50, %v4928_v52 }
 0x7c2   :  { %7487 = vmatpush1.bf16.msra.mxu0 %v9340_v58  ;;  %7447 = vmatprep.subr.bf16.mxu1 %v9221_v62  ;;  %v4804_v58 = vld [vmem:[#allocation16 + $0x58] sm:$0xff] }
 0x7c3   :  { %7488 = vmatprep.subr.bf16.mxu0 %v9349_v63  ;;  %v4808_v62 = vld [vmem:[#allocation16 + $0x78] sm:$0xff]  ;;  %v9142_v63 = vcombine.low %v4796_v19, %v4800_v49 }
 0x7c4   :  { %v9151_v51 = vcombine.high %v4804_v58, %v4808_v62  ;;  %v9150_v6 = vcombine.low %v4804_v58, %v4808_v62  ;;  %v4980_v62 = vld [vmem:[#allocation16 + $0x5d8] sm:$0xff] }
 0x7c5   :  { %7448 = vmatpush1.bf16.msra.mxu1 %v9220_v24  ;;  %v4812_v24 = vld [vmem:[#allocation16 + $0x98] sm:$0xff] }
 0x7c6   :  { %7489 = vmatpush1.bf16.msra.mxu0 %v9348_v27  ;;  %7449 = vmatprep.subr.bf16.mxu1 %v9229_v2  ;;  %v4816_v27 = vld [vmem:[#allocation16 + $0xb8] sm:$0xff]  ;;  %v9279_v2 = vcombine.high %v4932_v0, %v4936_v1 }
 0x7c7   :  { %7490 = vmatprep.subr.bf16.mxu0 %v9357_v3  ;;  %v4940_v3 = vld [vmem:[#allocation16 + $0x498] sm:$0xff]  ;;  %v9159_v8 = vcombine.high %v4812_v24, %v4816_v27  ;;  %v9158_v23 = vcombine.low %v4812_v24, %v4816_v27 }
 0x7c8   :  { %v9286_v14 = vcombine.low %v4940_v3, %v4944_v4 }
 0x7c9   :  { %7450 = vmatpush1.bf16.msra.mxu1 %v9228_v9  ;;  %v9287_v9 = vcombine.high %v4940_v3, %v4944_v4  ;;  %v4860_v4 = vld [vmem:[#allocation16 + $0x218] sm:$0xff] }
 0x7ca   :  { %7491 = vmatpush1.bf16.msra.mxu0 %v9356_v10  ;;  %7451 = vmatprep.subr.bf16.mxu1 %v9237_v15  ;;  %v4820_v10 = vld [vmem:[#allocation16 + $0xd8] sm:$0xff] }
 0x7cb   :  { %7492 = vmatprep.subr.bf16.mxu0 %v9365_v16  ;;  %v4824_v15 = vld [vmem:[#allocation16 + $0xf8] sm:$0xff] }
 0x7cc   :  { %v4948_v16 = vld [vmem:[#allocation16 + $0x4d8] sm:$0xff]  ;;  %v9167_v26 = vcombine.high %v4820_v10, %v4824_v15 }
 0x7cd   :  { %7452 = vmatpush1.bf16.msra.mxu1 %v9236_v28  ;;  %v4828_v28 = vld [vmem:[#allocation16 + $0x118] sm:$0xff]  ;;  %v9294_v32 = vcombine.low %v4948_v16, %v4952_v21 }
 0x7ce   :  { %7493 = vmatpush1.bf16.msra.mxu0 %v9364_v29  ;;  %7453 = vmatprep.subr.bf16.mxu1 %v9245_v30  ;;  %v4832_v29 = vld [vmem:[#allocation16 + $0x138] sm:$0xff] }
 0x7cf   :  { %7494 = vmatprep.subr.bf16.mxu0 %v9373_v31  ;;  %v4956_v30 = vld [vmem:[#allocation16 + $0x518] sm:$0xff]  ;;  %v9175_v34 = vcombine.high %v4828_v28, %v4832_v29 }
 0x7d0   :  { %v4960_v31 = vld [vmem:[#allocation16 + $0x538] sm:$0xff] }
 0x7d1   :  { %7454 = vmatpush1.bf16.msra.mxu1 %v9244_v37  ;;  %v9303_v35 = vcombine.high %v4956_v30, %v4960_v31  ;;  %v4840_v37 = vld [vmem:[#allocation16 + $0x178] sm:$0xff]  ;;  %v9302_v41 = vcombine.low %v4956_v30, %v4960_v31 }
 0x7d2   :  { %7495 = vmatpush1.bf16.msra.mxu0 %v9372_v38  ;;  %7455 = vmatprep.subr.bf16.mxu1 %v9253_v39  ;;  %v4964_v38 = vld [vmem:[#allocation16 + $0x558] sm:$0xff]  ;;  %v9183_v42 = vcombine.high %v4836_v36, %v4840_v37 }
 0x7d3   :  { %7496 = vmatprep.subr.bf16.mxu0 %v9381_v40  ;;  %v4968_v39 = vld [vmem:[#allocation16 + $0x578] sm:$0xff]  ;;  %v9174_v40 = vcombine.low %v4828_v28, %v4832_v29 }
 0x7d4   :  { %v9311_v43 = vcombine.high %v4964_v38, %v4968_v39  ;;  %v9310_v19 = vcombine.low %v4964_v38, %v4968_v39  ;;  %v4876_v31 = vld [vmem:[#allocation16 + $0x298] sm:$0xff] }
 0x7d5   :  { %7456 = vmatpush1.bf16.msra.mxu1 %v9252_v45  ;;  %v4848_v45 = vld [vmem:[#allocation16 + $0x1b8] sm:$0xff] }
 0x7d6   :  { %7497 = vmatpush1.bf16.msra.mxu0 %v9380_v46  ;;  %7457 = vmatprep.subr.bf16.mxu1 %v9261_v47  ;;  %v4972_v46 = vld [vmem:[#allocation16 + $0x598] sm:$0xff]  ;;  %v9191_v49 = vcombine.high %v4844_v44, %v4848_v45 }
 0x7d7   :  { %7498 = vmatprep.subr.bf16.mxu0 %v9389_v25  ;;  %v4976_v47 = vld [vmem:[#allocation16 + $0x5b8] sm:$0xff]  ;;  %v9182_v25 = vcombine.low %v4836_v36, %v4840_v37 }
 0x7d8   :  { %v9318_v27 = vcombine.low %v4972_v46, %v4976_v47  ;;  %v4884_v39 = vld [vmem:[#allocation16 + $0x2d8] sm:$0xff] }
 0x7d9   :  { %7458 = vmatpush1.bf16.msra.mxu1 %v9260_v60  ;;  %v9319_v60 = vcombine.high %v4972_v46, %v4976_v47  ;;  %v4892_v47 = vld [vmem:[#allocation16 + $0x318] sm:$0xff] }
 0x7da   :  { %7499 = vmatpush1.bf16.msra.mxu0 %v9388_v61  ;;  %7509 = vmatprep.subr.bf16.mxu1 %v9143_v54  ;;  %v4852_v61 = vld [vmem:[#allocation16 + $0x1d8] sm:$0xff] }
 0x7db   :  { %7550 = vmatprep.subr.bf16.mxu0 %v9271_v56  ;;  %v4856_v54 = vld [vmem:[#allocation16 + $0x1f8] sm:$0xff] }
 0x7dc   :  { %7460 = vmatmul.mubr.bf16.vlgmr.msra.gmra.mrb[32].mxu1 %v11354_v5 }
 0x7dd   :  { %7501 = vmatmul.mubr.bf16.vlgmr.msra.gmra.mrb[36].mxu0 %v11358_v57  ;;  %7510 = vmatpush1.bf16.msra.mxu1 %v9142_v63  ;;  %v4984_v63 = vld [vmem:[#allocation16 + $0x5f8] sm:$0xff] }
 0x7de   :  { %7541 = vmatprep.mubr.bf16.mxu1 %v11341_v48  ;;  %7551 = vmatpush1.bf16.msra.mxu0 %v9270_v22  ;;  %v9295_v48 = vcombine.high %v4948_v16, %v4952_v21  ;;  %v9190_v22 = vcombine.low %v4844_v44, %v4848_v45  ;;  %v9327_v3 = vcombine.high %v4980_v62, %v4984_v63  ;;  %v4868_v21 = vld [vmem:[#allocation16 + $0x258] sm:$0xff] }
 0x7df   :  { %7582 = vmatprep.mubr.bf16.mxu0 %v11343_v53  ;;  %7511 = vmatprep.subr.bf16.mxu1 %v9151_v51  ;;  %v9166_v53 = vcombine.low %v4820_v10, %v4824_v15  ;;  %v9326_v10 = vcombine.low %v4980_v62, %v4984_v63  ;;  %v4900_v63 = vld [vmem:[#allocation16 + $0x358] sm:$0xff] }
 0x7e0   :  { %7552 = vmatprep.subr.bf16.mxu0 %v9279_v2  ;;  %v9199_v2 = vcombine.high %v4852_v61, %v4856_v54 }
 0x7e1   :  { %7512 = vmatpush1.bf16.msra.mxu1 %v9150_v6  ;;  %v4864_v6 = vld [vmem:[#allocation16 + $0x238] sm:$0xff] }
 0x7e2   :  { %7553 = vmatpush1.bf16.msra.mxu0 %v9278_v7  ;;  %7513 = vmatprep.subr.bf16.mxu1 %v9159_v8  ;;  %v4988_v7 = vld [vmem:[#allocation16 + $0x618] sm:$0xff]  ;;  %v9207_v15 = vcombine.high %v4860_v4, %v4864_v6 }
 0x7e3   :  { %7554 = vmatprep.subr.bf16.mxu0 %v9287_v9  ;;  %v4992_v8 = vld [vmem:[#allocation16 + $0x638] sm:$0xff]  ;;  %v9198_v9 = vcombine.low %v4852_v61, %v4856_v54 }
 0x7e4   :  { %v9335_v16 = vcombine.high %v4988_v7, %v4992_v8  ;;  %v9334_v28 = vcombine.low %v4988_v7, %v4992_v8  ;;  %v5040_v7 = vld [vmem:[#allocation16 + $0x7b8] sm:$0xff] }
 0x7e5   :  { %7514 = vmatpush1.bf16.msra.mxu1 %v9158_v23  ;;  %v4872_v23 = vld [vmem:[#allocation16 + $0x278] sm:$0xff] }
 0x7e6   :  { %7555 = vmatpush1.bf16.msra.mxu0 %v9286_v14  ;;  %7515 = vmatprep.subr.bf16.mxu1 %v9167_v26  ;;  %v4996_v14 = vld [vmem:[#allocation16 + $0x658] sm:$0xff]  ;;  %v9215_v29 = vcombine.high %v4868_v21, %v4872_v23 }
 0x7e7   :  { %7556 = vmatprep.subr.bf16.mxu0 %v9295_v48  ;;  %v5000_v26 = vld [vmem:[#allocation16 + $0x678] sm:$0xff]  ;;  %v9206_v48 = vcombine.low %v4860_v4, %v4864_v6 }
 0x7e8   :  { %v9343_v30 = vcombine.high %v4996_v14, %v5000_v26  ;;  %v9342_v36 = vcombine.low %v4996_v14, %v5000_v26  ;;  %v4912_v4 = vld [vmem:[#allocation16 + $0x3b8] sm:$0xff] }
 0x7e9   :  { %7516 = vmatpush1.bf16.msra.mxu1 %v9166_v53  ;;  %v4880_v53 = vld [vmem:[#allocation16 + $0x2b8] sm:$0xff] }
 0x7ea   :  { %7557 = vmatpush1.bf16.msra.mxu0 %v9294_v32  ;;  %7517 = vmatprep.subr.bf16.mxu1 %v9175_v34  ;;  %v5004_v32 = vld [vmem:[#allocation16 + $0x698] sm:$0xff]  ;;  %v9223_v37 = vcombine.high %v4876_v31, %v4880_v53 }
 0x7eb   :  { %7558 = vmatprep.subr.bf16.mxu0 %v9303_v35  ;;  %v5008_v34 = vld [vmem:[#allocation16 + $0x6b8] sm:$0xff]  ;;  %v9214_v35 = vcombine.low %v4868_v21, %v4872_v23 }
 0x7ec   :  { %v9351_v38 = vcombine.high %v5004_v32, %v5008_v34  ;;  %v9350_v44 = vcombine.low %v5004_v32, %v5008_v34  ;;  %v5036_v6 = vld [vmem:[#allocation16 + $0x798] sm:$0xff]  ;;  %v10574_v32 = vld [vmem:[#allocation20 + $0x40] sm:$0xff]  }
 0x7ed   :  { %7518 = vmatpush1.bf16.msra.mxu1 %v9174_v40  ;;  %v4888_v40 = vld [vmem:[#allocation16 + $0x2f8] sm:$0xff]  ;;  %v10543_v34 = vld [vmem:[#allocation19] sm:$0xff]  }
 0x7ee   :  { %7559 = vmatpush1.bf16.msra.mxu0 %v9302_v41  ;;  %7519 = vmatprep.subr.bf16.mxu1 %v9183_v42  ;;  %v5012_v41 = vld [vmem:[#allocation16 + $0x6d8] sm:$0xff]  ;;  %v9231_v45 = vcombine.high %v4884_v39, %v4888_v40 }
 0x7ef   :  { %v11380_v50 = vpop.f32.mrb[20].mxu1  ;;  %v11382_v52 = vpop.f32.mrb[24].mxu0  ;;  %7560 = vmatprep.subr.bf16.mxu0 %v9311_v43  ;;  %v5016_v42 = vld [vmem:[#allocation16 + $0x6f8] sm:$0xff]  ;;  %v9222_v43 = vcombine.low %v4876_v31, %v4880_v53  ;;  %v10542_v53 = vld [vmem:[#allocation19 + $0x40] sm:$0xff]  }
 0x7f0   :  { %v11384_v56 = vpop.f32.mrb[21].mxu1  ;;  %v11386_v58 = vpop.f32.mrb[25].mxu0  ;;  %v9359_v46 = vcombine.high %v5012_v41, %v5016_v42  ;;  %v9358_v61 = vcombine.low %v5012_v41, %v5016_v42  ;;  %v4920_v21 = vld [vmem:[#allocation16 + $0x3f8] sm:$0xff]  ;;  %v10578_v41 = vld [vmem:[#allocation20 + $0x50] sm:$0xff]  }
 0x7f1   :  { %v5939_v0 = vpop.f32.mrb[22].mxu1  ;;  %v5980_v1 = vpop.f32.mrb[26].mxu0  ;;  %7520 = vmatpush1.bf16.msra.mxu1 %v9182_v25  ;;  %v4896_v25 = vld [vmem:[#allocation16 + $0x338] sm:$0xff]  ;;  %v10547_v42 = vld [vmem:[#allocation19 + $0x10] sm:$0xff]  }
 0x7f2   :  { %7561 = vmatpush1.bf16.msra.mxu0 %v9310_v19  ;;  %v5940_v51 = vpop.f32.mrb[23].mxu1  ;;  %v5981_v24 = vpop.f32.mrb[27].mxu0  ;;  %7521 = vmatprep.subr.bf16.mxu1 %v9191_v49  ;;  %v5020_v19 = vld [vmem:[#allocation16 + $0x718] sm:$0xff]  ;;  %v9239_v54 = vcombine.high %v4892_v47, %v4896_v25 }
 0x7f3   :  { %7562 = vmatprep.subr.bf16.mxu0 %v9319_v60  ;;  %v5024_v49 = vld [vmem:[#allocation16 + $0x738] sm:$0xff]  ;;  %v9230_v60 = vcombine.low %v4884_v39, %v4888_v40  ;;  %v9238_v51 = vcombine.low %v4892_v47, %v4896_v25  ;;  %v10546_v39 = vld [vmem:[#allocation19 + $0x50] sm:$0xff]   ;;  %v10577_v40 = vld [vmem:[#allocation20 + $0x8] sm:$0xff]  }
 0x7f4   :  { %v9367_v62 = vcombine.high %v5020_v19, %v5024_v49  ;;  %v4904_v0 = vld [vmem:[#allocation16 + $0x378] sm:$0xff]  ;;  %v9366_v24 = vcombine.low %v5020_v19, %v5024_v49  ;;  %v10582_v47 = vld [vmem:[#allocation20 + $0x60] sm:$0xff]   ;;  %v10552_v19 = vld [vmem:[#allocation19 + $0x68] sm:$0xff]  }
 0x7f5   :  { %7522 = vmatpush1.bf16.msra.mxu1 %v9190_v22  ;;  %v5028_v1 = vld [vmem:[#allocation16 + $0x758] sm:$0xff]  ;;  %v9246_v8 = vcombine.low %v4900_v63, %v4904_v0  ;;  %v10551_v25 = vld [vmem:[#allocation19 + $0x20] sm:$0xff]  }
 0x7f6   :  { %7563 = vmatpush1.bf16.msra.mxu0 %v9318_v27  ;;  %7523 = vmatprep.subr.bf16.mxu1 %v9199_v2  ;;  %v5032_v22 = vld [vmem:[#allocation16 + $0x778] sm:$0xff]  ;;  %v9247_v27 = vcombine.high %v4900_v63, %v4904_v0  ;;  %v10583_v49 = vld [vmem:[#allocation20 + $0x20] sm:$0xff]   ;;  %v10585_v0 = vld [vmem:[#allocation20 + $0x28] sm:$0xff]  }
 0x7f7   :  { %7564 = vmatprep.subr.bf16.mxu0 %v9327_v3  ;;  %v9375_v2 = vcombine.high %v5028_v1, %v5032_v22  ;;  %v4908_v3 = vld [vmem:[#allocation16 + $0x398] sm:$0xff] }
 0x7f8   :  { %v5044_v23 = vld [vmem:[#allocation16 + $0x7d8] sm:$0xff]  ;;  %v9254_v26 = vcombine.low %v4908_v3, %v4912_v4 }
 0x7f9   :  { %7524 = vmatpush1.bf16.msra.mxu1 %v9198_v9  ;;  %v9374_v9 = vcombine.low %v5028_v1, %v5032_v22  ;;  %v5048_v14 = vld [vmem:[#allocation16 + $0x7f8] sm:$0xff] }
 0x7fa   :  { %7565 = vmatpush1.bf16.msra.mxu0 %v9326_v10  ;;  %7525 = vmatprep.subr.bf16.mxu1 %v9207_v15  ;;  %v9255_v10 = vcombine.high %v4908_v3, %v4912_v4  ;;  %v9383_v15 = vcombine.high %v5036_v6, %v5040_v7  ;;  %v9390_v31 = vcombine.low %v5044_v23, %v5048_v14  ;;  %v10555_v4 = vld [vmem:[#allocation19 + $0x30] sm:$0xff]  }
 0x7fb   :  { %7566 = vmatprep.subr.bf16.mxu0 %v9335_v16  ;;  %v4916_v16 = vld [vmem:[#allocation16 + $0x3d8] sm:$0xff] }
 0x7fd   :  { %7526 = vmatpush1.bf16.msra.mxu1 %v9206_v48  ;;  %v9382_v48 = vcombine.low %v5036_v6, %v5040_v7 }
 0x7fe   :  { %7567 = vmatpush1.bf16.msra.mxu0 %v9334_v28  ;;  %7527 = vmatprep.subr.bf16.mxu1 %v9215_v29  ;;  %v9263_v28 = vcombine.high %v4916_v16, %v4920_v21  ;;  %v9391_v29 = vcombine.high %v5044_v23, %v5048_v14  ;;  %v10558_v14 = vld [vmem:[#allocation19 + $0xc0] sm:$0xff]  }
 0x7ff   :  { %7568 = vmatprep.subr.bf16.mxu0 %v9343_v30  ;;  %v9262_v30 = vcombine.low %v4916_v16, %v4920_v21 }
 0x801   :  { %7528 = vmatpush1.bf16.msra.mxu1 %v9214_v35  ;;  %v10544_v35 = vld [vmem:[#allocation19 + $0x48] sm:$0xff]  }
 0x802   :  { %7569 = vmatpush1.bf16.msra.mxu0 %v9342_v36  ;;  %7529 = vmatprep.subr.bf16.mxu1 %v9223_v37  ;;  %v10575_v36 = vld [vmem:[#allocation20] sm:$0xff]   ;;  %v10576_v37 = vld [vmem:[#allocation20 + $0x48] sm:$0xff]  }
 0x803   :  { %7570 = vmatprep.subr.bf16.mxu0 %v9351_v38  ;;  %v10545_v38 = vld [vmem:[#allocation19 + $0x8] sm:$0xff]  }
 0x805   :  { %7530 = vmatpush1.bf16.msra.mxu1 %v9222_v43  ;;  %v10548_v43 = vld [vmem:[#allocation19 + $0x58] sm:$0xff]  }
 0x806   :  { %7571 = vmatpush1.bf16.msra.mxu0 %v9350_v44  ;;  %7531 = vmatprep.subr.bf16.mxu1 %v9231_v45  ;;  %v10579_v44 = vld [vmem:[#allocation20 + $0x10] sm:$0xff]   ;;  %v10580_v45 = vld [vmem:[#allocation20 + $0x58] sm:$0xff]  }
 0x807   :  { %7572 = vmatprep.subr.bf16.mxu0 %v9359_v46  ;;  %v10581_v46 = vld [vmem:[#allocation20 + $0x18] sm:$0xff]  }
 0x809   :  { %7532 = vmatpush1.bf16.msra.mxu1 %v9230_v60  ;;  %v10584_v60 = vld [vmem:[#allocation20 + $0x68] sm:$0xff]  }
 0x80a   :  { %7573 = vmatpush1.bf16.msra.mxu0 %v9358_v61  ;;  %7533 = vmatprep.subr.bf16.mxu1 %v9239_v54  ;;  %v10553_v61 = vld [vmem:[#allocation19 + $0x28] sm:$0xff]  }
 0x80b   :  { %7574 = vmatprep.subr.bf16.mxu0 %v9367_v62  ;;  %v11393_v54 = vld [vmem:[%s11461_s12 + $0x12] sm:$0xff] }
 0x80c   :  { %v10554_v62 = vld [vmem:[#allocation19 + $0x70] sm:$0xff]   ;;  %v7596_v7 = vrot.slane %v11393_v54, %v11241_v18  ;;  %v10589_v18 = vld [vmem:[#allocation20 + $0x38] sm:$0xff]  }
 0x80d   :  { %7534 = vmatpush1.bf16.msra.mxu1 %v9238_v51 }
 0x80e   :  { %7575 = vmatpush1.bf16.msra.mxu0 %v9366_v24  ;;  %7535 = vmatprep.subr.bf16.mxu1 %v9247_v27 }
 0x80f   :  { %7576 = vmatprep.subr.bf16.mxu0 %v9375_v2  ;;  %v7600_v2 = vrot.slane %v11393_v54, %v11249_v20  ;;  %v10557_v20 = vld [vmem:[#allocation19 + $0x38] sm:$0xff]  }
 0x811   :  { %7536 = vmatpush1.bf16.msra.mxu1 %v9246_v8 }
 0x812   :  { %7577 = vmatpush1.bf16.msra.mxu0 %v9374_v9  ;;  %7537 = vmatprep.subr.bf16.mxu1 %v9255_v10  ;;  %v10556_v10 = vld [vmem:[#allocation19 + $0x78] sm:$0xff]  }
 0x813   :  { %7578 = vmatprep.subr.bf16.mxu0 %v9383_v15 }
 0x815   :  { %7538 = vmatpush1.bf16.msra.mxu1 %v9254_v26  ;;  %v10588_v26 = vld [vmem:[#allocation20 + $0x78] sm:$0xff]  }
 0x816   :  { %7579 = vmatpush1.bf16.msra.mxu0 %v9382_v48  ;;  %7539 = vmatprep.subr.bf16.mxu1 %v9263_v28  ;;  %v10559_v28 = vld [vmem:[#allocation19 + $0x80] sm:$0xff]  }
 0x817   :  { %7580 = vmatprep.subr.bf16.mxu0 %v9391_v29 }
 0x819   :  { %7540 = vmatpush1.bf16.msra.mxu1 %v9262_v30  ;;  %v10560_v30 = vld [vmem:[#allocation19 + $0xc8] sm:$0xff]  }
 0x81a   :  { %7581 = vmatpush1.bf16.msra.mxu0 %v9390_v31  ;;  %9458 = vmatprep.subr.bf16.mxu1 %v10542_v53  ;;  %v10561_v31 = vld [vmem:[#allocation19 + $0x88] sm:$0xff]   ;;  %v10562_v53 = vld [vmem:[#allocation19 + $0xd0] sm:$0xff]  }
 0x81b   :  { %9502 = vmatprep.subr.bf16.mxu0 %v10574_v32  ;;  %v10563_v32 = vld [vmem:[#allocation19 + $0x90] sm:$0xff]  }
 0x81c   :  { %7542 = vmatmul.mubr.bf16.vlgmr.msra.gmra.mrb[36].mxu1 %v11354_v5  ;;  %v10549_v5 = vld [vmem:[#allocation19 + $0x18] sm:$0xff]  }
 0x81d   :  { %7583 = vmatmul.mubr.bf16.vlgmr.msra.gmra.mrb[40].mxu0 %v11358_v57  ;;  %9459 = vmatpush3.bf16.msra.mxu1 %v10543_v34  ;;  %v10550_v57 = vld [vmem:[#allocation19 + $0x60] sm:$0xff]   ;;  %v10564_v34 = vld [vmem:[#allocation19 + $0xd8] sm:$0xff]  }
 0x81e   :  { %9460 = vmatprep.subr.bf16.mxu1 %v10544_v35  ;;  %9503 = vmatpush3.bf16.msra.mxu0 %v10575_v36  ;;  %v10565_v35 = vld [vmem:[#allocation19 + $0x98] sm:$0xff]   ;;  %v10566_v36 = vld [vmem:[#allocation19 + $0xe0] sm:$0xff]  }
 0x81f   :  { %9504 = vmatprep.subr.bf16.mxu0 %v10576_v37  ;;  %v10567_v37 = vld [vmem:[#allocation19 + $0xa0] sm:$0xff]  }
 0x821   :  { %9461 = vmatpush3.bf16.msra.mxu1 %v10545_v38  ;;  %v10568_v38 = vld [vmem:[#allocation19 + $0xe8] sm:$0xff]  }
 0x822   :  { %9462 = vmatprep.subr.bf16.mxu1 %v10546_v39  ;;  %9505 = vmatpush3.bf16.msra.mxu0 %v10577_v40  ;;  %v10569_v39 = vld [vmem:[#allocation19 + $0xa8] sm:$0xff]   ;;  %v10570_v40 = vld [vmem:[#allocation19 + $0xf0] sm:$0xff]  }
 0x823   :  { %9506 = vmatprep.subr.bf16.mxu0 %v10578_v41  ;;  %v10571_v41 = vld [vmem:[#allocation19 + $0xb0] sm:$0xff]  }
 0x825   :  { %9463 = vmatpush3.bf16.msra.mxu1 %v10547_v42  ;;  %v10572_v42 = vld [vmem:[#allocation19 + $0xf8] sm:$0xff]  }
 0x826   :  { %9464 = vmatprep.subr.bf16.mxu1 %v10548_v43  ;;  %9507 = vmatpush3.bf16.msra.mxu0 %v10579_v44  ;;  %v10573_v43 = vld [vmem:[#allocation19 + $0xb8] sm:$0xff]   ;;  %v10590_v44 = vld [vmem:[#allocation20 + $0xc0] sm:$0xff]  }
 0x827   :  { %9508 = vmatprep.subr.bf16.mxu0 %v10580_v45 }
 0x829   :  { %9465 = vmatpush3.bf16.msra.mxu1 %v10549_v5 }
 0x82a   :  { %9466 = vmatprep.subr.bf16.mxu1 %v10550_v57  ;;  %9509 = vmatpush3.bf16.msra.mxu0 %v10581_v46  ;;  %v7604_v46 = vrot.slane %v11393_v54, %v11263_v33  ;;  %v10593_v33 = vld [vmem:[#allocation20 + $0x88] sm:$0xff]  }
 0x82b   :  { %9510 = vmatprep.subr.bf16.mxu0 %v10582_v47 }
 0x82d   :  { %9467 = vmatpush3.bf16.msra.mxu1 %v10551_v25 }
 0x82e   :  { %9468 = vmatprep.subr.bf16.mxu1 %v10552_v19  ;;  %9511 = vmatpush3.bf16.msra.mxu0 %v10583_v49  ;;  %v7608_v49 = vrot.slane %v11393_v54, %v11252_v11  ;;  %v10595_v11 = vld [vmem:[#allocation20 + $0x90] sm:$0xff]  }
 0x82f   :  { %v7297_v63 = vpop.f32.mrb[24].mxu1  ;;  %9512 = vmatprep.subr.bf16.mxu0 %v10584_v60 }
 0x830   :  { %v7298_v1 = vadd.f32 %v7297_v63, %v11368_v12  ;;  %v7338_v22 = vpop.f32.mrb[28].mxu0  ;;  %v7299_v51 = vpop.f32.mrb[25].mxu1  ;;  %v10586_v12 = vld [vmem:[#allocation20 + $0x70] sm:$0xff]  }
 0x831   :  { %v7300_v24 = vadd.f32 %v7299_v51, %v11372_v59  ;;  %v7340_v27 = vpop.f32.mrb[29].mxu0  ;;  %v7301_v3 = vpop.f32.mrb[26].mxu1  ;;  %9469 = vmatpush3.bf16.msra.mxu1 %v10553_v61  ;;  %v10587_v59 = vld [vmem:[#allocation20 + $0x30] sm:$0xff]  }
 0x832   :  { %v7339_v6 = vadd.f32 %v7338_v22, %v7298_v1  ;;  %v7342_v8 = vpop.f32.mrb[30].mxu0  ;;  %v7302_v9 = vpop.f32.mrb[27].mxu1  ;;  %9470 = vmatprep.subr.bf16.mxu1 %v10554_v62  ;;  %9513 = vmatpush3.bf16.msra.mxu0 %v10585_v0  ;;  %v10596_v3 = vld [vmem:[#allocation20 + $0xd8] sm:$0xff]  }
 0x833   :  { %v7341_v15 = vadd.f32 %v7340_v27, %v7300_v24  ;;  %v7343_v16 = vpop.f32.mrb[31].mxu0  ;;  %9514 = vmatprep.subr.bf16.mxu0 %v10586_v12  ;;  %v10591_v24 = vld [vmem:[#allocation20 + $0x80] sm:$0xff]   ;;  %v10600_v8 = vld [vmem:[#allocation20 + $0xe8] sm:$0xff]   ;;  %v10603_v12 = vld [vmem:[#allocation20 + $0xb0] sm:$0xff]  }
 0x834   :  { %v7633_v23 = vadd.f32 %v7596_v7, %v7339_v6  ;;  %v10598_v6 = vld [vmem:[#allocation20 + $0xe0] sm:$0xff]   ;;  %v10601_v9 = vld [vmem:[#allocation20 + $0xa8] sm:$0xff]   ;;  %v10605_v16 = vld [vmem:[#allocation20 + $0xb8] sm:$0xff]  }
 0x835   :  { %v7634_v21 = vadd.f32 %v7600_v2, %v7341_v15  ;;  %9471 = vmatpush3.bf16.msra.mxu1 %v10555_v4  ;;  %v10592_v2 = vld [vmem:[#allocation20 + $0xc8] sm:$0xff]   ;;  %v10597_v4 = vld [vmem:[#allocation20 + $0x98] sm:$0xff]   ;;  %v10599_v7 = vld [vmem:[#allocation20 + $0xa0] sm:$0xff]  }
 0x836   :  { %9472 = vmatprep.subr.bf16.mxu1 %v10556_v10  ;;  %9515 = vmatpush3.bf16.msra.mxu0 %v10587_v59  ;;  %v7641_v29 = vpack.c.bf16 %v7633_v23, %v7633_v23  ;;  %v10602_v10 = vld [vmem:[#allocation20 + $0xf0] sm:$0xff]   ;;  %v10604_v15 = vld [vmem:[#allocation20 + $0xf8] sm:$0xff]   ;;  %v7611_v59 = vsub.s32 4, %v11238_v17 }
 0x837   :  { %v7642_v48 = vpack.c.bf16 %v7634_v21, %v7634_v21  ;;  %9516 = vmatprep.subr.bf16.mxu0 %v10588_v26  ;;  %v7615_v21 = vsub.s32 5, %v11238_v17 }
 0x838   :  { %v7612_v26 = vrot.slane %v11393_v54, %v7611_v59 }
 0x839   :  { %9473 = vmatpush3.bf16.msra.mxu1 %v10557_v20  ;;  %7940 = vmatprep.mubr.bf16.mxu1 %v7642_v48 }
 0x83a   :  { %9480 = vmatprep.subr.bf16.mxu1 %v10558_v14  ;;  %9517 = vmatpush3.bf16.msra.mxu0 %v10589_v18 }
 0x83c   :  { %7941 = vmatmul.mubr.bf16.vlgmr.msra.gmra.mrb[40].mxu1 %v7641_v29  ;;  %v7616_v29 = vrot.slane %v11393_v54, %v7615_v21 }
 0x83d   :  { %9481 = vmatpush3.bf16.msra.mxu1 %v10559_v28 }
 0x83e   :  { %9482 = vmatprep.subr.bf16.mxu1 %v10560_v30 }
 0x841   :  { %9483 = vmatpush3.bf16.msra.mxu1 %v10561_v31 }
 0x842   :  { %9484 = vmatprep.subr.bf16.mxu1 %v10562_v53 }
 0x845   :  { %9485 = vmatpush3.bf16.msra.mxu1 %v10563_v32 }
 0x846   :  { %9486 = vmatprep.subr.bf16.mxu1 %v10564_v34 }
 0x849   :  { %9487 = vmatpush3.bf16.msra.mxu1 %v10565_v35 }
 0x84a   :  { %9488 = vmatprep.subr.bf16.mxu1 %v10566_v36 }
 0x84d   :  { %9489 = vmatpush3.bf16.msra.mxu1 %v10567_v37 }
 0x84e   :  { %9490 = vmatprep.subr.bf16.mxu1 %v10568_v38 }
 0x851   :  { %9491 = vmatpush3.bf16.msra.mxu1 %v10569_v39 }
 0x852   :  { %9492 = vmatprep.subr.bf16.mxu1 %v10570_v40  ;;  %v7623_v40 = vsub.s32 7, %v11238_v17 }
 0x855   :  { %9493 = vmatpush3.bf16.msra.mxu1 %v10571_v41 }
 0x856   :  { %9494 = vmatprep.subr.bf16.mxu1 %v10572_v42 }
 0x859   :  { %9495 = vmatpush3.bf16.msra.mxu1 %v10573_v43 }
 0x85a   :  { %9524 = vmatprep.subr.bf16.mxu1 %v10590_v44 }
 0x86f   :  { %v7379_v45 = vpop.f32.mrb[28].mxu1 }
 0x870   :  { %v7380_v5 = vadd.f32 %v7379_v45, %v11370_v13  ;;  %v7420_v57 = vpop.f32.mrb[32].mxu0  ;;  %v7381_v47 = vpop.f32.mrb[29].mxu1 }
 0x871   :  { %v7382_v25 = vadd.f32 %v7381_v47, %v11374_v55  ;;  %v7422_v19 = vpop.f32.mrb[33].mxu0  ;;  %v7383_v60 = vpop.f32.mrb[30].mxu1  ;;  %v10594_v55 = vld [vmem:[#allocation20 + $0xd0] sm:$0xff]  }
 0x872   :  { %v7421_v61 = vadd.f32 %v7420_v57, %v7380_v5  ;;  %v7424_v62 = vpop.f32.mrb[34].mxu0  ;;  %v7384_v63 = vpop.f32.mrb[31].mxu1  ;;  %v7624_v57 = vrot.slane %v11393_v54, %v7623_v40 }
 0x873   :  { %v7423_v0 = vadd.f32 %v7422_v19, %v7382_v25  ;;  %v7425_v1 = vpop.f32.mrb[35].mxu0 }
 0x874   :  { %v7635_v22 = vadd.f32 %v7604_v46, %v7421_v61 }
 0x875   :  { %v7636_v51 = vadd.f32 %v7608_v49, %v7423_v0 }
 0x876   :  { %v7643_v27 = vpack.c.bf16 %v7635_v22, %v7635_v22 }
 0x877   :  { %v7644_v13 = vpack.c.bf16 %v7636_v51, %v7636_v51 }
 0x879   :  { %7980 = vmatprep.mubr.bf16.mxu1 %v7644_v13 }
 0x87a   :  { %7981 = vmatmul.mubr.bf16.vlgmr.msra.gmra.mrb[44].mxu1 %v7643_v27 }
 0x87b   :  { %9525 = vmatpush3.bf16.msra.mxu1 %v10591_v24 }
 0x87c   :  { %9526 = vmatprep.subr.bf16.mxu1 %v10592_v2 }
 0x87f   :  { %9527 = vmatpush3.bf16.msra.mxu1 %v10593_v33 }
 0x880   :  { %9528 = vmatprep.subr.bf16.mxu1 %v10594_v55 }
 0x883   :  { %9529 = vmatpush3.bf16.msra.mxu1 %v10595_v11 }
 0x884   :  { %9530 = vmatprep.subr.bf16.mxu1 %v10596_v3 }
 0x887   :  { %9531 = vmatpush3.bf16.msra.mxu1 %v10597_v4 }
 0x888   :  { %9532 = vmatprep.subr.bf16.mxu1 %v10598_v6 }
 0x88b   :  { %9533 = vmatpush3.bf16.msra.mxu1 %v10599_v7 }
 0x88c   :  { %9534 = vmatprep.subr.bf16.mxu1 %v10600_v8  ;;  %v9425_v8 = vld [vmem:[%s11461_s12 + $0x1b] ss:$0 sm:$0xff] }
 0x88f   :  { %9535 = vmatpush3.bf16.msra.mxu1 %v10601_v9 }
 0x890   :  { %9536 = vmatprep.subr.bf16.mxu1 %v10602_v10 }
 0x893   :  { %9537 = vmatpush3.bf16.msra.mxu1 %v10603_v12 }
 0x894   :  { %9538 = vmatprep.subr.bf16.mxu1 %v10604_v15 }
 0x897   :  { %9539 = vmatpush3.bf16.msra.mxu1 %v10605_v16 }
 0x8af   :  { %v7461_v20 = vpop.f32.mrb[32].mxu1 }
 0x8b0   :  { %v7462_v23 = vadd.f32 %v7461_v20, %v11380_v50  ;;  %v7502_v14 = vpop.f32.mrb[36].mxu0  ;;  %v7463_v48 = vpop.f32.mrb[33].mxu1  ;;  %v7619_v50 = vsub.s32 6, %v11238_v17 }
 0x8b1   :  { %v7464_v18 = vadd.f32 %v7463_v48, %v11384_v56  ;;  %v7504_v28 = vpop.f32.mrb[37].mxu0  ;;  %v7465_v30 = vpop.f32.mrb[34].mxu1 }
 0x8b2   :  { %v7503_v31 = vadd.f32 %v7502_v14, %v7462_v23  ;;  %v7506_v53 = vpop.f32.mrb[38].mxu0  ;;  %v7466_v32 = vpop.f32.mrb[35].mxu1  ;;  %v7620_v43 = vrot.slane %v11393_v54, %v7619_v50  ;;  %v9392_v54 = vld [vmem:[%s11461_s12 + $0x1a] ss:$0 sm:$0xff]  ;;  %s10961_s12 = smov [#allocation22]  }
 0x8b3   :  { %v7505_v34 = vadd.f32 %v7504_v28, %v7464_v18  ;;  %v7507_v35 = vpop.f32.mrb[39].mxu0  ;;  %s8361_s23 = sshll.u32 %s10961_s12, 4  ;;  %s8362_s23 = int_to_ptr.vmem [resolvable:$true] %s8361_s23 }
 0x8b4   :  { %v7637_v36 = vadd.f32 %v7612_v26, %v7503_v31  ;;  %s10879_s24 = scalar_lea.vmem %s8362_s23, 128  ;;  %p10884_p13 = scmp.lt.s32.totalorder %s8362_s23, %s8362_s23 }
 0x8b5   :  { %v7638_v37 = vadd.f32 %v7616_v29, %v7505_v34  ;;  %p10880_p12 = scmp.ne.s32.totalorder %s8362_s23, %s10879_s24  ;;  %p10885_p0 = scmp.lt.s32.totalorder %s10879_s24, %s10879_s24 }
 0x8b6   :  { %v7988_v39 = vpack.c.bf16 %v7637_v36, %v7637_v36 }
 0x8b7   :  { %v7989_v38 = vpack.c.bf16 %v7638_v37, %v7638_v37  ;;  %p10886_p1 = por %p10885_p0, %p10884_p13 }
 0x8b9   :  { %8287 = vmatprep.mubr.bf16.mxu0 %v7989_v38  ;;  %p10887_p2 = pnand %p10886_p1, %p10880_p12 }
 0x8ba   :  { %8288 = vmatmul.mubr.bf16.vlgmr.msra.gmra.mrb[44].mxu0 %v7988_v39 }
 0x8ef   :  { %v7543_v56 = vpop.f32.mrb[36].mxu1 }
 0x8f0   :  { %v7544_v41 = vadd.f32 %v7543_v56, %v11382_v52  ;;  %v7584_v42 = vpop.f32.mrb[40].mxu0  ;;  %v7545_v44 = vpop.f32.mrb[37].mxu1 }
 0x8f1   :  { %v7546_v45 = vadd.f32 %v7545_v44, %v11386_v58  ;;  %v7586_v5 = vpop.f32.mrb[41].mxu0  ;;  %v7547_v46 = vpop.f32.mrb[38].mxu1 }
 0x8f2   :  { %v7585_v47 = vadd.f32 %v7584_v42, %v7544_v41  ;;  %v7588_v25 = vpop.f32.mrb[42].mxu0  ;;  %v7548_v19 = vpop.f32.mrb[39].mxu1 }
 0x8f3   :  { %v7587_v49 = vadd.f32 %v7586_v5, %v7546_v45  ;;  %v7589_v60 = vpop.f32.mrb[43].mxu0 }
 0x8f4   :  { %v7639_v61 = vadd.f32 %v7620_v43, %v7585_v47 }
 0x8f5   :  { %v7640_v17 = vadd.f32 %v7624_v57, %v7587_v49 }
 0x8f6   :  { %v7990_v63 = vpack.c.bf16 %v7639_v61, %v7639_v61 }
 0x8f7   :  { %v7991_v62 = vpack.c.bf16 %v7640_v17, %v7640_v17 }
 0x8f9   :  { %8327 = vmatprep.mubr.bf16.mxu1 %v7991_v62 }
 0x8fa   :  { %8328 = vmatmul.mubr.bf16.vlgmr.msra.gmra.mrb[48].mxu1 %v7990_v63 }
 0x90f   :  { %v9474_v52 = vpop.f32.mrb[40].mxu1 }
 0x910   :  { %v9475_v0 = vpop.f32.mrb[41].mxu1 }
 0x911   :  { %v9476_v1 = vadd.f32 %v9475_v0, %v9474_v52  ;;  %v9477_v22 = vpop.f32.mrb[42].mxu1 }
 0x912   :  { %v9478_v58 = vpop.f32.mrb[43].mxu1 }
 0x913   :  { %v7943_v24 = vadd.f32 %v9476_v1, %v9392_v54 }
 0x94d   :  { %v9496_v51 = vpop.f32.mrb[44].mxu1 }
 0x94e   :  { %v9497_v13 = vpop.f32.mrb[45].mxu1 }
 0x94f   :  { %v9498_v27 = vadd.f32 %v9497_v13, %v9496_v51  ;;  %v9499_v2 = vpop.f32.mrb[46].mxu1 }
 0x950   :  { %v9500_v33 = vpop.f32.mrb[47].mxu1 }
 0x951   :  { %v7983_v55 = vadd.f32 %v9498_v27, %v7943_v24 }
 0x953   :  { %8335 = vmax.xlane.f32.xlu0 %v7983_v55 }
 0x98d   :  { %v9518_v11 = vpop.f32.mrb[44].mxu0 }
 0x98e   :  { %v9519_v3 = vpop.f32.mrb[45].mxu0 }
 0x98f   :  { %v9520_v4 = vadd.f32 %v9519_v3, %v9518_v11  ;;  %v9521_v6 = vpop.f32.mrb[46].mxu0 }
 0x990   :  { %v9522_v7 = vpop.f32.mrb[47].mxu0 }
 0x991   :  { %v8290_v12 = vadd.f32 %v9520_v4, %v9425_v8 }
 0x9cd   :  { %v9540_v9 = vpop.f32.mrb[48].mxu1 }
 0x9ce   :  { %v9541_v10 = vpop.f32.mrb[49].mxu1 }
 0x9cf   :  { %v9542_v15 = vadd.f32 %v9541_v10, %v9540_v9  ;;  %v9543_v16 = vpop.f32.mrb[50].mxu1 }
 0x9d0   :  { %v9544_v59 = vpop.f32.mrb[51].mxu1 }
 0x9d1   :  { %v8330_v21 = vadd.f32 %v9542_v15, %v8290_v12 }
 0x9d3   :  { %8345 = vmax.xlane.f32.xlu0 %v8330_v21 }
 0x9e0   :  { %v8336_v20 = vpop.xlane.xlu0 %8335 }
 0x9e1   :  { %v8337_v23 = vsub.f32 %v7983_v55, %v8336_v20 }
 0x9e3   :  { %v8338_v14 = vmul.f32 1.442695, %v8337_v23 }
 0x9e5   :  { %10606 = vpow2.f32 %v8338_v14 }
 0x9ef   :  { %v10607_v26 = vpop.eup %10606 }
 0x9f0   :  { %8340 = vadd.xlane.f32.xlu1 %v10607_v26 }
 0xa60   :  { %v8346_v48 = vpop.xlane.xlu0 %8345 }
 0xa61   :  { %v8347_v18 = vsub.f32 %v8330_v21, %v8346_v48 }
 0xa63   :  { %v8348_v28 = vmul.f32 1.442695, %v8347_v18 }
 0xa65   :  { %10608 = vpow2.f32 %v8348_v28 }
 0xa6f   :  { %v10609_v29 = vpop.eup %10608 }
 0xa70   :  { %8350 = vadd.xlane.f32.xlu1 %v10609_v29 }
 0xa7d   :  { %v8341_v30 = vpop.xlane.xlu1 %8340 }
 0xa7e   :  { %10610 = vrcp.f32 %v8341_v30 }
 0xa88   :  { %v10611_v31 = vpop.eup %10610 }
 0xa89   :  { %v8343_v53 = vmul.f32 %v10611_v31, %v10607_v26 }
 0xa8b   :  { %8344 = vst [vmem:[#allocation22] sm:$0xff] %v8343_v53 }
 0xa8c   :  { %10890 = shalt.err (!%p10887_p2)
}
 0xa8d   :  { %s10891_s25 = scalar_lea.hbm %s11462_s13, 128 }
 0xa8e   :  { %p10892_p3 = scmp.ne.s32.totalorder %s11462_s13, %s10891_s25  ;;  %p10895_p4 = scmp.lt.u32.totalorder %s10891_s25, %s11462_s13 }
 0xa90   :  { %p10897_p5 = pnand %p10895_p4, %p10892_p3 }
 0xa92   :  { %10900 = shalt.err (!%p10897_p5)
}
 0xa93   :  { %8364 = dma.vmem_to_hbm [thread:$0]  %s8362_s23, 128, %s11462_s13, [#allocation4]  }
 0xa94   :  { %s10962_s27 = smov [#allocation23]  }
 0xa95   :  { %s8371_s1 = sshll.u32 %s10962_s27, 4  ;;  %s8372_s1 = int_to_ptr.vmem [resolvable:$true] %s8371_s1 }
 0xa96   :  { %s10901_s15 = scalar_lea.vmem %s8372_s1, 128  ;;  %p10906_p7 = scmp.lt.s32.totalorder %s8372_s1, %s8372_s1 }
 0xa97   :  { %p10902_p6 = scmp.ne.s32.totalorder %s8372_s1, %s10901_s15  ;;  %p10907_p8 = scmp.lt.s32.totalorder %s10901_s15, %s10901_s15 }
 0xa99   :  { %p10908_p9 = por %p10907_p8, %p10906_p7 }
 0xa9b   :  { %p10909_p10 = pnand %p10908_p9, %p10902_p6 }
 0xafd   :  { %v8351_v32 = vpop.xlane.xlu1 %8350 }
 0xafe   :  { %10612 = vrcp.f32 %v8351_v32 }
 0xb08   :  { %v10613_v34 = vpop.eup %10612 }
 0xb09   :  { %v8353_v35 = vmul.f32 %v10613_v34, %v10609_v29 }
 0xb0b   :  { %8354 = vst [vmem:[#allocation23] sm:$0xff] %v8353_v35 }
 0xb0c   :  { %10912 = shalt.err (!%p10909_p10)
}
 0xb0d   :  { %s10913_s16 = scalar_lea.hbm %s11463_s14, 128 }
 0xb0e   :  { %p10914_p11 = scmp.ne.s32.totalorder %s11463_s14, %s10913_s16  ;;  %p10917_p12 = scmp.lt.u32.totalorder %s10913_s16, %s11463_s14 }
 0xb10   :  { %p10919_p13 = pnand %p10917_p12, %p10914_p11 }
 0xb12   :  { %10922 = shalt.err (!%p10919_p13)
}
 0xb13   :  { %8374 = dma.vmem_to_hbm [thread:$0]  %s8372_s1, 128, %s11463_s14, [#allocation24]  }
 0xb14   :  { %10937 = dma.done.wait [#allocation4], 128  }
 0xb15   :  { %10938 = vsyncadd [#allocation4], 4294967168 }
 0xb16   :  { %10939 = dma.done.wait [#allocation24], 128  }
 0xb17   :  { %10940 = vsyncadd [#allocation24], 4294967168 }
 0xb18   :  { %8381 = vsyncpa [#allocation3], 1 }
 0xb19   :  { %8382 = vsyncpa [#allocation6], 1 }
 0xb1a   :  { %8383 = vsyncpa [#allocation9], 1 }
 0xb1b   :  { %8384 = vsyncpa [#allocation12], 1 }
 0xb1c   :  { %8385 = vsyncpa [#allocation15], 1 }
 0xb1d   :  { %8386 = vsyncpa [#allocation18], 1 }
 0xb1e   :  { %8387 = vsyncpa [#allocation21], 1 }
 0xb1f   :  { %8388 = vsyncpa [#allocation4], 1 }
 0xb20   :  { %8389 = vsyncpa [#allocation24], 1 }

</bundles_post_ra>
